<compile_context>
chip_gen: v7x
topology: tpu7x:2x2x1
jax: 0.10.0
libtpu: 0.0.40
codegen_flags: <defaults>
</compile_context>

<pallas_src>
import functools

import numpy as np
import jax
import jax.numpy as jnp
from jax import lax
from jax.experimental import pallas as pl
from jax.experimental.pallas import tpu as pltpu


def _round_up(x: int, m: int) -> int:
    return (x + m - 1) // m * m


def _discriminator_kernel(x_ref, y_ref, w1t_ref, b1_ref, w2t_ref, b2_ref,
                          w3_ref, b3_ref, o_ref, *, num_classes, f_pad):
    """One batch tile per grid step.  Grid = (batch tiles,)."""
    tm = x_ref.shape[0]
    hidden = w2t_ref.shape[0]

    x = x_ref[...]                                      # (tm, Fp) compute dtype
    acc = jnp.zeros((tm, hidden), jnp.float32)

    # Layer 1 with the outer product fused in:
    #   ad_in @ W1^T = sum_c  y[:, c] * (x @ W1_c^T)
    # (C is small and static -> unrolled Python loop; static ref slices are free.)
    for c in range(num_classes):
        w1c = w1t_ref[c * f_pad:(c + 1) * f_pad, :]     # (Fp, H) view -> load
        xw = lax.dot_general(
            x, w1c,
            dimension_numbers=(((1,), (0,)), ((), ())),
            preferred_element_type=jnp.float32)         # (tm, H) f32
        acc = acc + y_ref[:, c:c + 1].astype(jnp.float32) * xw

    # TODO(synk): Dropout(0.5) after each ReLU is treated as identity (eval-mode
    # forward); stochastic masking is not implemented.
    h1 = jnp.maximum(acc + b1_ref[...], 0.0)            # f32 epilogue math

    # Layer 2: (tm, H) x (H, H) -> (tm, H), lane-dense 1024-wide result.
    h2 = lax.dot_general(
        h1.astype(w2t_ref.dtype), w2t_ref[...],
        dimension_numbers=(((1,), (0,)), ((), ())),
        preferred_element_type=jnp.float32) + b2_ref[...]
    h2 = jnp.maximum(h2, 0.0)

    # Layer 3 (1024 -> 1): broadcast-multiply + lane reduce (XLU) instead of a
    # degenerate N=1 MXU matmul.  W3/b3 kept in f32 (negligible bytes).
    out = jnp.sum(h2 * w3_ref[...], axis=1, keepdims=True) + b3_ref[...]
    o_ref[...] = out.astype(o_ref.dtype)


def prepare_params(params, feature_len, total_classes,
                   compute_dtype=jnp.bfloat16):
    """One-time weight relayout/cast.  Run once per model, OUTSIDE the jit'd call."""
    hidden, d1 = params["w1"].shape
    assert d1 == feature_len * total_classes
    f_pad = _round_up(feature_len, 128)

    # W1: (H, C*F) -> per-class slabs (C*Fp, H), zero-padding each feature chunk.
    w1 = params["w1"].reshape(hidden, total_classes, feature_len)
    w1 = jnp.pad(w1, ((0, 0), (0, 0), (0, f_pad - feature_len)))
    w1t = jnp.transpose(w1, (1, 2, 0)).reshape(total_classes * f_pad, hidden)

    return {
        "w1t": w1t.astype(compute_dtype),                          # (C*Fp, H)
        "b1": params["b1"].reshape(1, hidden).astype(jnp.float32),
        "w2t": params["w2"].T.astype(compute_dtype),               # (H, H)
        "b2": params["b2"].reshape(1, hidden).astype(jnp.float32),
        "w3": params["w3"].reshape(1, hidden).astype(jnp.float32),
        "b3": params["b3"].reshape(1, 1).astype(jnp.float32),
    }


@functools.partial(jax.jit, static_argnames=("block_m",))
def discriminator_forward(x, y, prepared, *, block_m=256):
    """x: (B, F), y: (B, C), prepared: output of prepare_params().  Returns (B, 1)."""
    B, F = x.shape
    By, C = y.shape
    assert B == By
    compute_dtype = prepared["w1t"].dtype
    hidden = prepared["w2t"].shape[0]
    f_pad = prepared["w1t"].shape[0] // C
    assert f_pad >= F and f_pad % 128 == 0

    c_pad = _round_up(C, 128)
    # v5e fills its 4x128^2 MXU at M=128 (pass block_m=128 there); v6e/v7x have a
    # 2x256^2 MXU so M=256 is the default.
    tm = block_m if B >= block_m else _round_up(B, 8)
    Bp = _round_up(B, tm)

    x_p = jnp.pad(x.astype(compute_dtype), ((0, Bp - B), (0, f_pad - F)))
    y_p = jnp.pad(y.astype(jnp.float32), ((0, Bp - B), (0, c_pad - C)))

    kernel = functools.partial(_discriminator_kernel, num_classes=C, f_pad=f_pad)

    # VMEM budget from actual buffer sizes (+ headroom for acc/h1/h2 live values).
    itemsize = jnp.dtype(compute_dtype).itemsize
    buf_bytes = (2 * tm * f_pad * itemsize            # x tile (double-buffered)
                 + 2 * tm * c_pad * 4                 # y tile (double-buffered)
                 + C * f_pad * hidden * itemsize      # W1^T resident, single buffer
                 + hidden * hidden * itemsize         # W2^T resident, single buffer
                 + 3 * hidden * 4 + 128               # b1, b2, w3, b3
                 + 2 * tm * 4)                        # output tile
    interm_bytes = 4 * tm * hidden * 4
    vmem_limit = int(min(max(buf_bytes + interm_bytes + (8 << 20), 16 << 20),
                         96 << 20))

    resident = pl.Buffered(1)   # grid-invariant operands: no double-buffering

    out = pl.pallas_call(
        kernel,
        out_shape=jax.ShapeDtypeStruct((Bp, 1), jnp.float32),
        grid_spec=pltpu.PrefetchScalarGridSpec(
            num_scalar_prefetch=0,
            grid=(Bp // tm,),
            in_specs=[
                pl.BlockSpec((tm, f_pad), lambda i: (i, 0)),                 # x tile
                pl.BlockSpec((tm, c_pad), lambda i: (i, 0)),                 # y tile
                pl.BlockSpec((C * f_pad, hidden), lambda i: (0, 0),
                             pipeline_mode=resident),                        # W1^T
                pl.BlockSpec((1, hidden), lambda i: (0, 0),
                             pipeline_mode=resident),                        # b1
                pl.BlockSpec((hidden, hidden), lambda i: (0, 0),
                             pipeline_mode=resident),                        # W2^T
                pl.BlockSpec((1, hidden), lambda i: (0, 0),
                             pipeline_mode=resident),                        # b2
                pl.BlockSpec((1, hidden), lambda i: (0, 0),
                             pipeline_mode=resident),                        # W3
                pl.BlockSpec((1, 1), lambda i: (0, 0),
                             pipeline_mode=resident),                        # b3
            ],
            out_specs=pl.BlockSpec((tm, 1), lambda i: (i, 0)),
        ),
        compiler_params=pltpu.CompilerParams(
            dimension_semantics=("parallel",),
            vmem_limit_bytes=vmem_limit,
        ),
    )(x_p, y_p, prepared["w1t"], prepared["b1"], prepared["w2t"],
      prepared["b2"], prepared["w3"], prepared["b3"])

    return out[:B]


if __name__ == "__main__":
    # Small shapes consistent with the module: feature_len=32, total_classes=4,
    # batch=8 -> ad_layer1 input dim = 128, hidden = 1024, output = 1.
    batch, feature_len, total_classes, hidden = 8, 32, 4, 1024

    key = jax.random.PRNGKey(0)
    kx, ky, k1, k2, k3 = jax.random.split(key, 5)

    x = jax.random.normal(kx, (batch, feature_len), dtype=jnp.float32)
    y = jax.random.normal(ky, (batch, total_classes), dtype=jnp.float32)

    d1 = feature_len * total_classes
    # Deterministic parameter init mirroring the PyTorch __init__:
    #   layer1/layer2 weights ~ N(0, 0.01), layer3 weight ~ N(0, 0.3), biases 0.
    params = {
        "w1": 0.01 * jax.random.normal(k1, (hidden, d1), dtype=jnp.float32),
        "b1": jnp.zeros((hidden,), dtype=jnp.float32),
        "w2": 0.01 * jax.random.normal(k2, (hidden, hidden), dtype=jnp.float32),
        "b2": jnp.zeros((hidden,), dtype=jnp.float32),
        "w3": 0.3 * jax.random.normal(k3, (1, hidden), dtype=jnp.float32),
        "b3": jnp.zeros((1,), dtype=jnp.float32),
    }

    # High-precision numpy reference (eval-mode forward: dropout = identity).
    xn = np.asarray(x, np.float64)
    yn = np.asarray(y, np.float64)
    w1n = np.asarray(params["w1"], np.float64)
    w2n = np.asarray(params["w2"], np.float64)
    w3n = np.asarray(params["w3"], np.float64)
    ad_in = (yn[:, :, None] * xn[:, None, :]).reshape(batch, d1)
    h1 = np.maximum(ad_in @ w1n.T + np.asarray(params["b1"], np.float64), 0.0)
    h2 = np.maximum(h1 @ w2n.T + np.asarray(params["b2"], np.float64), 0.0)
    ref = h2 @ w3n.T + np.asarray(params["b3"], np.float64)

    # f32 path: tight correctness check.
    prep_f32 = prepare_params(params, feature_len, total_classes,
                              compute_dtype=jnp.float32)
    out_f32 = jax.block_until_ready(discriminator_forward(x, y, prep_f32))
    assert out_f32.shape == (batch, 1)
    err_f32 = float(np.max(np.abs(np.asarray(out_f32, np.float64) - ref)))
    assert np.allclose(np.asarray(out_f32, np.float64), ref,
                       atol=2e-3, rtol=2e-3), f"f32 max abs err {err_f32}"

    # Default bf16 fast path (bf16 MXU operands, f32 accumulation): looser tolerance.
    prep_bf16 = prepare_params(params, feature_len, total_classes)
    out_bf16 = jax.block_until_ready(discriminator_forward(x, y, prep_bf16))
    assert out_bf16.shape == (batch, 1)
    err_bf16 = float(np.max(np.abs(np.asarray(out_bf16, np.float64) - ref)))
    assert np.allclose(np.asarray(out_bf16, np.float64), ref,
                       atol=5e-2, rtol=5e-2), f"bf16 max abs err {err_bf16}"

    print("KERNEL_OK")
</pallas_src>

<mosaic_0001>
module attributes {stable_mosaic.version = 11 : i64} {
  func.func @_discriminator_kernel(%arg0: i32, %arg1: memref<8x128xf32, #tpu.memory_space<vmem>>, %arg2: memref<8x128xf32, #tpu.memory_space<vmem>>, %arg3: memref<512x1024xf32, #tpu.memory_space<vmem>>, %arg4: memref<1x1024xf32, #tpu.memory_space<vmem>>, %arg5: memref<1024x1024xf32, #tpu.memory_space<vmem>>, %arg6: memref<1x1024xf32, #tpu.memory_space<vmem>>, %arg7: memref<1x1024xf32, #tpu.memory_space<vmem>>, %arg8: memref<1x1xf32, #tpu.memory_space<vmem>>, %arg9: memref<8x1xf32, #tpu.memory_space<vmem>>) attributes {dimension_semantics = [#tpu.dimension_semantics<parallel>], iteration_bounds = array<i64: 1>, scalar_prefetch = 0 : i64, scratch_operands = 0 : i64, tpu.core_type = #tpu.core_type<tc>, window_params = [{transform_indices = @transform_0, window_bounds = array<i64: 8, 128>}, {transform_indices = @transform_1, window_bounds = array<i64: 8, 128>}, {pipeline_mode = #tpu.pipeline_mode<synchronous>, transform_indices = @transform_2, window_bounds = array<i64: 512, 1024>}, {pipeline_mode = #tpu.pipeline_mode<synchronous>, transform_indices = @transform_3, window_bounds = array<i64: 1, 1024>}, {pipeline_mode = #tpu.pipeline_mode<synchronous>, transform_indices = @transform_4, window_bounds = array<i64: 1024, 1024>}, {pipeline_mode = #tpu.pipeline_mode<synchronous>, transform_indices = @transform_5, window_bounds = array<i64: 1, 1024>}, {pipeline_mode = #tpu.pipeline_mode<synchronous>, transform_indices = @transform_6, window_bounds = array<i64: 1, 1024>}, {pipeline_mode = #tpu.pipeline_mode<synchronous>, transform_indices = @transform_7, window_bounds = array<i64: 1, 1>}, {transform_indices = @transform_8, window_bounds = array<i64: 8, 1>}]} {
    %c0 = arith.constant 0 : index
    %c0_0 = arith.constant 0 : index
    %0 = vector.load %arg1[%c0, %c0_0] : memref<8x128xf32, #tpu.memory_space<vmem>>, vector<8x128xf32>
    %cst = arith.constant 0.000000e+00 : f32
    %1 = vector.broadcast %cst : f32 to vector<8x1024xf32>
    %c0_1 = arith.constant 0 : index
    %c0_2 = arith.constant 0 : index
    %2 = vector.load %arg3[%c0_1, %c0_2] : memref<512x1024xf32, #tpu.memory_space<vmem>>, vector<128x1024xf32>
    %cst_3 = arith.constant dense<0.000000e+00> : vector<8x1024xf32>
    %3 = tpu.matmul %0, %2, %cst_3 {dimension_numbers = #tpu.dot_dimension_numbers<[1], [0], [0], [1], [0, 0, 1, 1], [], []>} : vector<8x128xf32>, vector<128x1024xf32>, vector<8x1024xf32> -> vector<8x1024xf32>
    %c0_4 = arith.constant 0 : index
    %c0_5 = arith.constant 0 : index
    %4 = vector.load %arg2[%c0_4, %c0_5] : memref<8x128xf32, #tpu.memory_space<vmem>>, vector<8x1xf32>
    %5 = vector.broadcast %4 : vector<8x1xf32> to vector<8x1024xf32>
    %6 = arith.mulf %5, %3 : vector<8x1024xf32>
    %7 = arith.addf %1, %6 : vector<8x1024xf32>
    %c128 = arith.constant 128 : index
    %c0_6 = arith.constant 0 : index
    %8 = vector.load %arg3[%c128, %c0_6] : memref<512x1024xf32, #tpu.memory_space<vmem>>, vector<128x1024xf32>
    %cst_7 = arith.constant dense<0.000000e+00> : vector<8x1024xf32>
    %9 = tpu.matmul %0, %8, %cst_7 {dimension_numbers = #tpu.dot_dimension_numbers<[1], [0], [0], [1], [0, 0, 1, 1], [], []>} : vector<8x128xf32>, vector<128x1024xf32>, vector<8x1024xf32> -> vector<8x1024xf32>
    %c0_8 = arith.constant 0 : index
    %c1 = arith.constant 1 : index
    %10 = vector.load %arg2[%c0_8, %c1] : memref<8x128xf32, #tpu.memory_space<vmem>>, vector<8x1xf32>
    %11 = vector.broadcast %10 : vector<8x1xf32> to vector<8x1024xf32>
    %12 = arith.mulf %11, %9 : vector<8x1024xf32>
    %13 = arith.addf %7, %12 : vector<8x1024xf32>
    %c256 = arith.constant 256 : index
    %c0_9 = arith.constant 0 : index
    %14 = vector.load %arg3[%c256, %c0_9] : memref<512x1024xf32, #tpu.memory_space<vmem>>, vector<128x1024xf32>
    %cst_10 = arith.constant dense<0.000000e+00> : vector<8x1024xf32>
    %15 = tpu.matmul %0, %14, %cst_10 {dimension_numbers = #tpu.dot_dimension_numbers<[1], [0], [0], [1], [0, 0, 1, 1], [], []>} : vector<8x128xf32>, vector<128x1024xf32>, vector<8x1024xf32> -> vector<8x1024xf32>
    %c0_11 = arith.constant 0 : index
    %c2 = arith.constant 2 : index
    %16 = vector.load %arg2[%c0_11, %c2] : memref<8x128xf32, #tpu.memory_space<vmem>>, vector<8x1xf32>
    %17 = vector.broadcast %16 : vector<8x1xf32> to vector<8x1024xf32>
    %18 = arith.mulf %17, %15 : vector<8x1024xf32>
    %19 = arith.addf %13, %18 : vector<8x1024xf32>
    %c384 = arith.constant 384 : index
    %c0_12 = arith.constant 0 : index
    %20 = vector.load %arg3[%c384, %c0_12] : memref<512x1024xf32, #tpu.memory_space<vmem>>, vector<128x1024xf32>
    %cst_13 = arith.constant dense<0.000000e+00> : vector<8x1024xf32>
    %21 = tpu.matmul %0, %20, %cst_13 {dimension_numbers = #tpu.dot_dimension_numbers<[1], [0], [0], [1], [0, 0, 1, 1], [], []>} : vector<8x128xf32>, vector<128x1024xf32>, vector<8x1024xf32> -> vector<8x1024xf32>
    %c0_14 = arith.constant 0 : index
    %c3 = arith.constant 3 : index
    %22 = vector.load %arg2[%c0_14, %c3] : memref<8x128xf32, #tpu.memory_space<vmem>>, vector<8x1xf32>
    %23 = vector.broadcast %22 : vector<8x1xf32> to vector<8x1024xf32>
    %24 = arith.mulf %23, %21 : vector<8x1024xf32>
    %25 = arith.addf %19, %24 : vector<8x1024xf32>
    %c0_15 = arith.constant 0 : index
    %c0_16 = arith.constant 0 : index
    %26 = vector.load %arg4[%c0_15, %c0_16] : memref<1x1024xf32, #tpu.memory_space<vmem>>, vector<1x1024xf32>
    %27 = vector.broadcast %26 : vector<1x1024xf32> to vector<8x1024xf32>
    %28 = arith.addf %25, %27 : vector<8x1024xf32>
    %cst_17 = arith.constant 0.000000e+00 : f32
    %29 = vector.broadcast %cst_17 : f32 to vector<8x1024xf32>
    %30 = arith.maximumf %28, %29 : vector<8x1024xf32>
    %c0_18 = arith.constant 0 : index
    %c0_19 = arith.constant 0 : index
    %31 = vector.load %arg5[%c0_18, %c0_19] : memref<1024x1024xf32, #tpu.memory_space<vmem>>, vector<1024x1024xf32>
    %cst_20 = arith.constant dense<0.000000e+00> : vector<8x1024xf32>
    %32 = tpu.matmul %30, %31, %cst_20 {dimension_numbers = #tpu.dot_dimension_numbers<[1], [0], [0], [1], [0, 0, 1, 1], [], []>} : vector<8x1024xf32>, vector<1024x1024xf32>, vector<8x1024xf32> -> vector<8x1024xf32>
    %c0_21 = arith.constant 0 : index
    %c0_22 = arith.constant 0 : index
    %33 = vector.load %arg6[%c0_21, %c0_22] : memref<1x1024xf32, #tpu.memory_space<vmem>>, vector<1x1024xf32>
    %34 = vector.broadcast %33 : vector<1x1024xf32> to vector<8x1024xf32>
    %35 = arith.addf %32, %34 : vector<8x1024xf32>
    %cst_23 = arith.constant 0.000000e+00 : f32
    %36 = vector.broadcast %cst_23 : f32 to vector<8x1024xf32>
    %37 = arith.maximumf %35, %36 : vector<8x1024xf32>
    %c0_24 = arith.constant 0 : index
    %c0_25 = arith.constant 0 : index
    %38 = vector.load %arg7[%c0_24, %c0_25] : memref<1x1024xf32, #tpu.memory_space<vmem>>, vector<1x1024xf32>
    %39 = vector.broadcast %38 : vector<1x1024xf32> to vector<8x1024xf32>
    %40 = arith.mulf %37, %39 : vector<8x1024xf32>
    %cst_26 = arith.constant dense<0.000000e+00> : vector<8xf32>
    %41 = vector.multi_reduction <add>, %40, %cst_26 [1] : vector<8x1024xf32> to vector<8xf32>
    %42 = vector.shape_cast %41 : vector<8xf32> to vector<8x1xf32>
    %c0_27 = arith.constant 0 : index
    %c0_28 = arith.constant 0 : index
    %43 = vector.load %arg8[%c0_27, %c0_28] : memref<1x1xf32, #tpu.memory_space<vmem>>, vector<1x1xf32>
    %44 = vector.broadcast %43 : vector<1x1xf32> to vector<8x1xf32>
    %45 = arith.addf %42, %44 : vector<8x1xf32>
    %c0_29 = arith.constant 0 : index
    %c0_30 = arith.constant 0 : index
    %46 = vector.load %arg9[%c0_29, %c0_30] : memref<8x1xf32, #tpu.memory_space<vmem>>, vector<8x1xf32>
    tpu.vector_store %arg9[%c0_29, %c0_30], %45 {strides = array<i32>} : memref<8x1xf32, #tpu.memory_space<vmem>>, vector<8x1xf32>,
    return
  }
  func.func @transform_0(%arg0: i32) -> (i32, i32) {
    %c0_i32 = arith.constant 0 : i32
    %c0_i32_0 = arith.constant 0 : i32
    return %arg0, %c0_i32 : i32, i32
  }
  func.func @transform_1(%arg0: i32) -> (i32, i32) {
    %c0_i32 = arith.constant 0 : i32
    %c0_i32_0 = arith.constant 0 : i32
    return %arg0, %c0_i32 : i32, i32
  }
  func.func @transform_2(%arg0: i32) -> (i32, i32) {
    %c0_i32 = arith.constant 0 : i32
    %c0_i32_0 = arith.constant 0 : i32
    %c0_i32_1 = arith.constant 0 : i32
    return %c0_i32, %c0_i32_0 : i32, i32
  }
  func.func @transform_3(%arg0: i32) -> (i32, i32) {
    %c0_i32 = arith.constant 0 : i32
    %c0_i32_0 = arith.constant 0 : i32
    %c0_i32_1 = arith.constant 0 : i32
    return %c0_i32, %c0_i32_0 : i32, i32
  }
  func.func @transform_4(%arg0: i32) -> (i32, i32) {
    %c0_i32 = arith.constant 0 : i32
    %c0_i32_0 = arith.constant 0 : i32
    %c0_i32_1 = arith.constant 0 : i32
    return %c0_i32, %c0_i32_0 : i32, i32
  }
  func.func @transform_5(%arg0: i32) -> (i32, i32) {
    %c0_i32 = arith.constant 0 : i32
    %c0_i32_0 = arith.constant 0 : i32
    %c0_i32_1 = arith.constant 0 : i32
    return %c0_i32, %c0_i32_0 : i32, i32
  }
  func.func @transform_6(%arg0: i32) -> (i32, i32) {
    %c0_i32 = arith.constant 0 : i32
    %c0_i32_0 = arith.constant 0 : i32
    %c0_i32_1 = arith.constant 0 : i32
    return %c0_i32, %c0_i32_0 : i32, i32
  }
  func.func @transform_7(%arg0: i32) -> (i32, i32) {
    %c0_i32 = arith.constant 0 : i32
    %c0_i32_0 = arith.constant 0 : i32
    %c0_i32_1 = arith.constant 0 : i32
    return %c0_i32, %c0_i32_0 : i32, i32
  }
  func.func @transform_8(%arg0: i32) -> (i32, i32) {
    %c0_i32 = arith.constant 0 : i32
    %c0_i32_0 = arith.constant 0 : i32
    return %arg0, %c0_i32 : i32, i32
  }
}

</mosaic_0001>

<bundles_post_ra>
// kernel: discriminator_forward.1
= control target key start
LH: loop header
LB: loop body
LE: loop exit
PB: predicated region body
PF: predicated region fallthrough
CT: control target
= control target key end

     0   :  { %s6260_s0 = inlined_call_operand.vmem [shape: f32[8,128], index: 0, kind: input, shape index: {}]   ;;  %s6261_s1 = inlined_call_operand.vmem [shape: f32[8,128], index: 1, kind: input, shape index: {}]   ;;  %s6262_s2 = inlined_call_operand.hbm [shape: f32[512,1024], index: 2, kind: input, shape index: {}]   ;;  %s6263_s3 = inlined_call_operand.hbm [shape: f32[1,1024], index: 3, kind: input, shape index: {}]   ;;  %s6264_s4 = inlined_call_operand.hbm [shape: f32[1024,1024], index: 4, kind: input, shape index: {}]   ;;  %s6265_s5 = inlined_call_operand.hbm [shape: f32[1,1024], index: 5, kind: input, shape index: {}]   ;;  %s6266_s6 = inlined_call_operand.hbm [shape: f32[1,1024], index: 6, kind: input, shape index: {}]   ;;  %s6267_s7 = inlined_call_operand.<no memory space> [shape: f32[1,1], index: 7, kind: input, shape index: {}]   ;;  %s6268_s8 = inlined_call_operand.vmem [shape: f32[8,1], index: 8, kind: output, shape index: {}]  }
   0x1   :  { %v13_v0 = vstv %s6267_s7 }
   0x2   :  { %14 = vst [vmem:[#allocation2] sm:$0x1] %v13_v0 }
   0x3   :  { %15 = vsyncpa [#allocation4], 0 }
   0x4   :  { %16 = vsyncpa [#allocation6], 0 }
   0x5   :  { %17 = vsyncpa [#allocation9], 0  ;;  %s5871_s29 = smov [#allocation5]   ;;  %s5872_s9 = smov [#allocation8]  }
   0x6   :  { %s40_s30 = sshll.u32 %s5871_s29, 4  ;;  %s62_s10 = sshll.u32 %s5872_s9, 4  ;;  %s41_s30 = int_to_ptr.vmem [resolvable:$true] %s40_s30  ;;  %s63_s10 = int_to_ptr.vmem [resolvable:$true] %s62_s10 }
   0x7   :  { %s5755_s13 = scalar_lea.hbm %s6263_s3, 128 }
   0x8   :  { %p5756_p0 = scmp.ne.s32.totalorder %s6263_s3, %s5755_s13  ;;  %p5759_p1 = scmp.lt.u32.totalorder %s5755_s13, %s6263_s3 }
   0xa   :  { %p5761_p2 = pnand %p5759_p1, %p5756_p0 }
   0xc   :  { %5764 = shalt.err (!%p5761_p2)
}
   0xd   :  { %s5765_s17 = scalar_lea.vmem %s41_s30, 128  ;;  %p5770_p4 = scmp.lt.s32.totalorder %s41_s30, %s41_s30 }
   0xe   :  { %p5766_p3 = scmp.ne.s32.totalorder %s41_s30, %s5765_s17  ;;  %p5771_p5 = scmp.lt.s32.totalorder %s5765_s17, %s5765_s17 }
  0x10   :  { %p5772_p6 = por %p5771_p5, %p5770_p4 }
  0x12   :  { %p5773_p7 = pnand %p5772_p6, %p5766_p3 }
  0x14   :  { %5776 = shalt.err (!%p5773_p7)
}
  0x15   :  { %43 = dma.hbm_to_vmem [thread:$0]  %s6263_s3, 128, %s41_s30, [#allocation6]  }
  0x16   :  { %s5777_s22 = scalar_lea.hbm %s6265_s5, 128 }
  0x17   :  { %p5778_p8 = scmp.ne.s32.totalorder %s6265_s5, %s5777_s22  ;;  %p5781_p9 = scmp.lt.u32.totalorder %s5777_s22, %s6265_s5 }
  0x19   :  { %p5783_p10 = pnand %p5781_p9, %p5778_p8 }
  0x1b   :  { %5786 = shalt.err (!%p5783_p10)
}
  0x1c   :  { %s5787_s27 = scalar_lea.vmem %s63_s10, 128  ;;  %p5792_p12 = scmp.lt.s32.totalorder %s63_s10, %s63_s10 }
  0x1d   :  { %p5788_p11 = scmp.ne.s32.totalorder %s63_s10, %s5787_s27  ;;  %p5793_p13 = scmp.lt.s32.totalorder %s5787_s27, %s5787_s27 }
  0x1f   :  { %p5794_p0 = por %p5793_p13, %p5792_p12 }
  0x21   :  { %p5795_p1 = pnand %p5794_p0, %p5788_p11 }
  0x23   :  { %5798 = shalt.err (!%p5795_p1)
}
  0x24   :  { %65 = dma.hbm_to_vmem [thread:$0]  %s6265_s5, 128, %s63_s10, [#allocation9]  }
  0x25   :  { %s5873_s29 = smov [#allocation3]   ;;  %s5799_s12 = scalar_lea.hbm %s6262_s2, 65536 }
  0x26   :  { %s27_s30 = sshll.u32 %s5873_s29, 4  ;;  %p5800_p2 = scmp.ne.s32.totalorder %s6262_s2, %s5799_s12  ;;  %s28_s30 = int_to_ptr.vmem [resolvable:$true] %s27_s30 }
  0x27   :  { %p5803_p3 = scmp.lt.u32.totalorder %s5799_s12, %s6262_s2 }
  0x29   :  { %p5805_p4 = pnand %p5803_p3, %p5800_p2 }
  0x2b   :  { %5808 = shalt.err (!%p5805_p4)
}
  0x2c   :  { %s5809_s7 = scalar_lea.vmem %s28_s30, 65536  ;;  %p5814_p6 = scmp.lt.s32.totalorder %s28_s30, %s28_s30 }
  0x2d   :  { %p5810_p5 = scmp.ne.s32.totalorder %s28_s30, %s5809_s7  ;;  %p5815_p7 = scmp.lt.s32.totalorder %s5809_s7, %s5809_s7 }
  0x2f   :  { %p5816_p8 = por %p5815_p7, %p5814_p6 }
  0x31   :  { %p5817_p9 = pnand %p5816_p8, %p5810_p5 }
  0x33   :  { %5820 = shalt.err (!%p5817_p9)
}
  0x34   :  { %s5874_s5 = smov 1024   ;;  %s5875_s10 = smov 64  }
  0x35   :  { %33 = dma.hbm_to_vmem [thread:$0]  %s6262_s2, 65536, %s28_s30, [#allocation4], %s5874_s5, %s5874_s5, %s5875_s10  }
  0x36   :  { %s5876_s19 = smov [#allocation7]   ;;  %s5877_s21 = smov [#allocation10]  }
  0x37   :  { %s49_s20 = sshll.u32 %s5876_s19, 4  ;;  %s72_s22 = sshll.u32 %s5877_s21, 4  ;;  %s50_s20 = int_to_ptr.vmem [resolvable:$true] %s49_s20  ;;  %s73_s22 = int_to_ptr.vmem [resolvable:$true] %s72_s22 }
  0x38   :  { %s5821_s25 = scalar_lea.hbm %s6264_s4, 131072 }
  0x39   :  { %p5822_p10 = scmp.ne.s32.totalorder %s6264_s4, %s5821_s25  ;;  %p5825_p11 = scmp.lt.u32.totalorder %s5821_s25, %s6264_s4 }
  0x3b   :  { %p5827_p12 = pnand %p5825_p11, %p5822_p10 }
  0x3d   :  { %5830 = shalt.err (!%p5827_p12)
}
  0x3e   :  { %s5831_s2 = scalar_lea.vmem %s50_s20, 131072  ;;  %p5836_p0 = scmp.lt.s32.totalorder %s50_s20, %s50_s20 }
  0x3f   :  { %p5832_p13 = scmp.ne.s32.totalorder %s50_s20, %s5831_s2  ;;  %p5837_p1 = scmp.lt.s32.totalorder %s5831_s2, %s5831_s2 }
  0x41   :  { %p5838_p2 = por %p5837_p1, %p5836_p0 }
  0x43   :  { %p5839_p3 = pnand %p5838_p2, %p5832_p13 }
  0x45   :  { %5842 = shalt.err (!%p5839_p3)
}
  0x46   :  { %55 = dma.hbm_to_vmem [thread:$0]  %s6264_s4, 131072, %s50_s20, [#allocation6], %s5874_s5, %s5874_s5, %s5875_s10  }
  0x47   :  { %s5843_s12 = scalar_lea.hbm %s6266_s6, 128 }
  0x48   :  { %p5844_p4 = scmp.ne.s32.totalorder %s6266_s6, %s5843_s12  ;;  %p5847_p5 = scmp.lt.u32.totalorder %s5843_s12, %s6266_s6 }
  0x4a   :  { %p5849_p6 = pnand %p5847_p5, %p5844_p4 }
  0x4c   :  { %5852 = shalt.err (!%p5849_p6)
}
  0x4d   :  { %s5853_s7 = scalar_lea.vmem %s73_s22, 128  ;;  %p5858_p8 = scmp.lt.s32.totalorder %s73_s22, %s73_s22 }
  0x4e   :  { %p5854_p7 = scmp.ne.s32.totalorder %s73_s22, %s5853_s7  ;;  %p5859_p9 = scmp.lt.s32.totalorder %s5853_s7, %s5853_s7 }
  0x50   :  { %p5860_p10 = por %p5859_p9, %p5858_p8 }
  0x52   :  { %p5861_p11 = pnand %p5860_p10, %p5854_p7 }
  0x54   :  { %5864 = shalt.err (!%p5861_p11)
}
  0x55   :  { %75 = dma.hbm_to_vmem [thread:$0]  %s6266_s6, 128, %s73_s22, [#allocation9]  }
  0x56   :  { %5865 = dma.done.wait [#allocation4], 65536  }
  0x57   :  { %5866 = vsyncadd [#allocation4], 4294901760 }
  0x58   :  { %5867 = dma.done.wait [#allocation6], 131200  }
  0x59   :  { %5868 = vsyncadd [#allocation6], 4294836096 }
  0x5a   :  { %5869 = dma.done.wait [#allocation9], 256  }
  0x5b   :  { %5870 = vsyncadd [#allocation9], 4294967040  ;;  %v5878_v1 = vmov 0.0   ;;  %v5879_v2 = vmov 0   ;;  %v95_v3 = vld [vmem:[#allocation3 + $0x8] sm:$0xff]  ;;  %v97_v5 = vld [vmem:[#allocation3 + $0x18] sm:$0xff] }
  0x5c   :  { %286 = vmatprep.mubr.f32.mxu0 %v5878_v1  ;;  %357 = vmatprep.mubr.f32.mxu1 %v5878_v1  ;;  %v103_v4 = vld [vmem:[#allocation3 + $0x48] sm:$0xff]  ;;  %v105_v7 = vld [vmem:[#allocation3 + $0x58] sm:$0xff]  ;;  %v94_v8 = vld [vmem:[#allocation3] sm:$0xff]  ;;  %vm4159_vm0 = vcmask 7168  }
  0x5d   :  { %5749 = vset.pattern.permute.xlu0 %v5879_v2  ;;  %v4169_v6 = vpack.c.bf16 %v103_v4, %v95_v3  ;;  %v102_v9 = vld [vmem:[#allocation3 + $0x40] sm:$0xff]  ;;  %v4201_v10 = vpack.c.bf16 %v105_v7, %v97_v5  ;;  %v96_v12 = vld [vmem:[#allocation3 + $0x10] sm:$0xff]  ;;  %v111_v14 = vld [vmem:[#allocation3 + $0x88] sm:$0xff] }
  0x5e   :  { %v4171_v11 = vpack.c.bf16 %v102_v9, %v94_v8  ;;  %v104_v13 = vld [vmem:[#allocation3 + $0x50] sm:$0xff]  ;;  %v119_v16 = vld [vmem:[#allocation3 + $0xc8] sm:$0xff]  ;;  %v113_v17 = vld [vmem:[#allocation3 + $0x98] sm:$0xff] }
  0x5f   :  { %4170 = vmatprep.subr.bf16.mxu0 %v4169_v6  ;;  %v4203_v15 = vpack.c.bf16 %v104_v13, %v96_v12  ;;  %v121_v18 = vld [vmem:[#allocation3 + $0xd8] sm:$0xff]  ;;  %4202 = vmatprep.subr.bf16.mxu1 %v4201_v10  ;;  %v4173_v19 = vpack.c.bf16 %v119_v16, %v111_v14  ;;  %v110_v21 = vld [vmem:[#allocation3 + $0x80] sm:$0xff]  ;;  %v112_v23 = vld [vmem:[#allocation3 + $0x90] sm:$0xff] }
  0x60   :  { %4172 = vmatpush1.bf16.msra.mxu0 %v4171_v11  ;;  %v4205_v20 = vpack.c.bf16 %v121_v18, %v113_v17  ;;  %v118_v22 = vld [vmem:[#allocation3 + $0xc0] sm:$0xff]  ;;  %v120_v25 = vld [vmem:[#allocation3 + $0xd0] sm:$0xff]  ;;  %v127_v26 = vld [vmem:[#allocation3 + $0x108] sm:$0xff] }
  0x61   :  { %4204 = vmatpush1.bf16.msra.mxu1 %v4203_v15  ;;  %v4175_v24 = vpack.c.bf16 %v118_v22, %v110_v21  ;;  %v135_v27 = vld [vmem:[#allocation3 + $0x148] sm:$0xff]  ;;  %4174 = vmatprep.subr.bf16.mxu0 %v4173_v19  ;;  %v4207_v28 = vpack.c.bf16 %v120_v25, %v112_v23  ;;  %v129_v30 = vld [vmem:[#allocation3 + $0x118] sm:$0xff]  ;;  %v126_v32 = vld [vmem:[#allocation3 + $0x100] sm:$0xff] }
  0x62   :  { %4206 = vmatprep.subr.bf16.mxu1 %v4205_v20  ;;  %v4177_v29 = vpack.c.bf16 %v135_v27, %v127_v26  ;;  %v137_v31 = vld [vmem:[#allocation3 + $0x158] sm:$0xff]  ;;  %v134_v34 = vld [vmem:[#allocation3 + $0x140] sm:$0xff]  ;;  %v128_v35 = vld [vmem:[#allocation3 + $0x110] sm:$0xff] }
  0x63   :  { %v4209_v33 = vpack.c.bf16 %v137_v31, %v129_v30  ;;  %v136_v36 = vld [vmem:[#allocation3 + $0x150] sm:$0xff]  ;;  %v4179_v37 = vpack.c.bf16 %v134_v34, %v126_v32  ;;  %v143_v38 = vld [vmem:[#allocation3 + $0x188] sm:$0xff]  ;;  %v145_v40 = vld [vmem:[#allocation3 + $0x198] sm:$0xff] }
  0x64   :  { %4176 = vmatpush1.bf16.msra.mxu0 %v4175_v24  ;;  %v151_v39 = vld [vmem:[#allocation3 + $0x1c8] sm:$0xff]  ;;  %v4211_v41 = vpack.c.bf16 %v136_v36, %v128_v35  ;;  %v153_v43 = vld [vmem:[#allocation3 + $0x1d8] sm:$0xff]  ;;  %v142_v44 = vld [vmem:[#allocation3 + $0x180] sm:$0xff] }
  0x65   :  { %4208 = vmatpush1.bf16.msra.mxu1 %v4207_v28  ;;  %4178 = vmatprep.subr.bf16.mxu0 %v4177_v29  ;;  %v4181_v42 = vpack.c.bf16 %v151_v39, %v143_v38  ;;  %v150_v45 = vld [vmem:[#allocation3 + $0x1c0] sm:$0xff]  ;;  %v4213_v46 = vpack.c.bf16 %v153_v43, %v145_v40  ;;  %v144_v47 = vld [vmem:[#allocation3 + $0x190] sm:$0xff]  ;;  %v159_v49 = vld [vmem:[#allocation3 + $0x208] sm:$0xff] }
  0x66   :  { %4210 = vmatprep.subr.bf16.mxu1 %v4209_v33  ;;  %v152_v48 = vld [vmem:[#allocation3 + $0x1d0] sm:$0xff]  ;;  %v167_v50 = vld [vmem:[#allocation3 + $0x248] sm:$0xff]  ;;  %v161_v51 = vld [vmem:[#allocation3 + $0x218] sm:$0xff]  ;;  %v4183_v53 = vpack.c.bf16 %v150_v45, %v142_v44 }
  0x67   :  { %v169_v52 = vld [vmem:[#allocation3 + $0x258] sm:$0xff]  ;;  %v4215_v54 = vpack.c.bf16 %v152_v48, %v144_v47  ;;  %v4185_v55 = vpack.c.bf16 %v167_v50, %v159_v49  ;;  %v158_v56 = vld [vmem:[#allocation3 + $0x200] sm:$0xff]  ;;  %v160_v58 = vld [vmem:[#allocation3 + $0x210] sm:$0xff] }
  0x68   :  { %4180 = vmatpush1.bf16.msra.mxu0 %v4179_v37  ;;  %v166_v57 = vld [vmem:[#allocation3 + $0x240] sm:$0xff]  ;;  %v4217_v59 = vpack.c.bf16 %v169_v52, %v161_v51  ;;  %v168_v60 = vld [vmem:[#allocation3 + $0x250] sm:$0xff]  ;;  %v175_v61 = vld [vmem:[#allocation3 + $0x288] sm:$0xff] }
  0x69   :  { %4212 = vmatpush1.bf16.msra.mxu1 %v4211_v41  ;;  %4182 = vmatprep.subr.bf16.mxu0 %v4181_v42  ;;  %v183_v62 = vld [vmem:[#allocation3 + $0x2c8] sm:$0xff]  ;;  %v177_v63 = vld [vmem:[#allocation3 + $0x298] sm:$0xff]  ;;  %v4187_v2 = vpack.c.bf16 %v166_v57, %v158_v56  ;;  %v4219_v3 = vpack.c.bf16 %v168_v60, %v160_v58  ;;  %v174_v5 = vld [vmem:[#allocation3 + $0x280] sm:$0xff] }
  0x6a   :  { %4214 = vmatprep.subr.bf16.mxu1 %v4213_v46  ;;  %v185_v0 = vld [vmem:[#allocation3 + $0x2d8] sm:$0xff]  ;;  %v4189_v4 = vpack.c.bf16 %v183_v62, %v175_v61  ;;  %v182_v6 = vld [vmem:[#allocation3 + $0x2c0] sm:$0xff]  ;;  %v176_v7 = vld [vmem:[#allocation3 + $0x290] sm:$0xff] }
  0x6b   :  { %v4221_v8 = vpack.c.bf16 %v185_v0, %v177_v63  ;;  %v184_v9 = vld [vmem:[#allocation3 + $0x2d0] sm:$0xff]  ;;  %v191_v10 = vld [vmem:[#allocation3 + $0x308] sm:$0xff]  ;;  %v193_v12 = vld [vmem:[#allocation3 + $0x318] sm:$0xff]  ;;  %v4191_v14 = vpack.c.bf16 %v182_v6, %v174_v5 }
  0x6c   :  { %4184 = vmatpush1.bf16.msra.mxu0 %v4183_v53  ;;  %v199_v11 = vld [vmem:[#allocation3 + $0x348] sm:$0xff]  ;;  %v201_v13 = vld [vmem:[#allocation3 + $0x358] sm:$0xff]  ;;  %v4223_v15 = vpack.c.bf16 %v184_v9, %v176_v7  ;;  %v190_v17 = vld [vmem:[#allocation3 + $0x300] sm:$0xff] }
  0x6d   :  { %4216 = vmatpush1.bf16.msra.mxu1 %v4215_v54  ;;  %4186 = vmatprep.subr.bf16.mxu0 %v4185_v55  ;;  %v4193_v16 = vpack.c.bf16 %v199_v11, %v191_v10  ;;  %v198_v18 = vld [vmem:[#allocation3 + $0x340] sm:$0xff]  ;;  %v192_v19 = vld [vmem:[#allocation3 + $0x310] sm:$0xff]  ;;  %v4225_v20 = vpack.c.bf16 %v201_v13, %v193_v12  ;;  %v207_v22 = vld [vmem:[#allocation3 + $0x388] sm:$0xff] }
  0x6e   :  { %4218 = vmatprep.subr.bf16.mxu1 %v4217_v59  ;;  %v200_v21 = vld [vmem:[#allocation3 + $0x350] sm:$0xff]  ;;  %v215_v23 = vld [vmem:[#allocation3 + $0x3c8] sm:$0xff]  ;;  %v209_v24 = vld [vmem:[#allocation3 + $0x398] sm:$0xff]  ;;  %v4195_v26 = vpack.c.bf16 %v198_v18, %v190_v17 }
  0x6f   :  { %v217_v25 = vld [vmem:[#allocation3 + $0x3d8] sm:$0xff]  ;;  %v4227_v27 = vpack.c.bf16 %v200_v21, %v192_v19  ;;  %v4197_v28 = vpack.c.bf16 %v215_v23, %v207_v22  ;;  %v206_v29 = vld [vmem:[#allocation3 + $0x380] sm:$0xff]  ;;  %v208_v31 = vld [vmem:[#allocation3 + $0x390] sm:$0xff] }
  0x70   :  { %4188 = vmatpush1.bf16.msra.mxu0 %v4187_v2  ;;  %v214_v30 = vld [vmem:[#allocation3 + $0x3c0] sm:$0xff]  ;;  %v4229_v32 = vpack.c.bf16 %v217_v25, %v209_v24  ;;  %v216_v33 = vld [vmem:[#allocation3 + $0x3d0] sm:$0xff]  ;;  %v99_v34 = vld [vmem:[#allocation3 + $0x28] sm:$0xff] }
  0x71   :  { %4220 = vmatpush1.bf16.msra.mxu1 %v4219_v3  ;;  %4190 = vmatprep.subr.bf16.mxu0 %v4189_v4  ;;  %v107_v35 = vld [vmem:[#allocation3 + $0x68] sm:$0xff]  ;;  %v101_v36 = vld [vmem:[#allocation3 + $0x38] sm:$0xff]  ;;  %v4199_v38 = vpack.c.bf16 %v214_v30, %v206_v29  ;;  %v4231_v39 = vpack.c.bf16 %v216_v33, %v208_v31  ;;  %v98_v41 = vld [vmem:[#allocation3 + $0x20] sm:$0xff] }
  0x72   :  { %4222 = vmatprep.subr.bf16.mxu1 %v4221_v8  ;;  %v109_v37 = vld [vmem:[#allocation3 + $0x78] sm:$0xff]  ;;  %v4233_v40 = vpack.c.bf16 %v107_v35, %v99_v34  ;;  %v106_v42 = vld [vmem:[#allocation3 + $0x60] sm:$0xff]  ;;  %v100_v43 = vld [vmem:[#allocation3 + $0x30] sm:$0xff] }
  0x73   :  { %v4265_v44 = vpack.c.bf16 %v109_v37, %v101_v36  ;;  %v108_v45 = vld [vmem:[#allocation3 + $0x70] sm:$0xff]  ;;  %v115_v46 = vld [vmem:[#allocation3 + $0xa8] sm:$0xff]  ;;  %v117_v48 = vld [vmem:[#allocation3 + $0xb8] sm:$0xff]  ;;  %v4235_v51 = vpack.c.bf16 %v106_v42, %v98_v41 }
  0x74   :  { %4192 = vmatpush1.bf16.msra.mxu0 %v4191_v14  ;;  %v123_v47 = vld [vmem:[#allocation3 + $0xe8] sm:$0xff]  ;;  %v125_v49 = vld [vmem:[#allocation3 + $0xf8] sm:$0xff]  ;;  %v4267_v52 = vpack.c.bf16 %v108_v45, %v100_v43  ;;  %v114_v54 = vld [vmem:[#allocation3 + $0xa0] sm:$0xff] }
  0x75   :  { %4224 = vmatpush1.bf16.msra.mxu1 %v4223_v15  ;;  %4194 = vmatprep.subr.bf16.mxu0 %v4193_v16  ;;  %v5996_v50 = vld [vmem:[%s6260_s0] sm:$0xff]  ;;  %v4237_v53 = vpack.c.bf16 %v123_v47, %v115_v46  ;;  %v116_v56 = vld [vmem:[#allocation3 + $0xb0] sm:$0xff]  ;;  %v4269_v57 = vpack.c.bf16 %v125_v49, %v117_v48  ;;  %v131_v59 = vld [vmem:[#allocation3 + $0x128] sm:$0xff] }
  0x76   :  { %4226 = vmatprep.subr.bf16.mxu1 %v4225_v20  ;;  %v122_v55 = vld [vmem:[#allocation3 + $0xe0] sm:$0xff]  ;;  %v124_v58 = vld [vmem:[#allocation3 + $0xf0] sm:$0xff]  ;;  %v139_v60 = vld [vmem:[#allocation3 + $0x168] sm:$0xff] }
  0x77   :  { %v133_v61 = vld [vmem:[#allocation3 + $0x138] sm:$0xff]  ;;  %v4239_v63 = vpack.c.bf16 %v122_v55, %v114_v54  ;;  %v4271_v0 = vpack.c.bf16 %v124_v58, %v116_v56  ;;  %v4241_v2 = vpack.c.bf16 %v139_v60, %v131_v59  ;;  %v130_v3 = vld [vmem:[#allocation3 + $0x120] sm:$0xff]  ;;  %v132_v5 = vld [vmem:[#allocation3 + $0x130] sm:$0xff] }
  0x78   :  { %4196 = vmatpush1.bf16.msra.mxu0 %v4195_v26  ;;  %v141_v62 = vld [vmem:[#allocation3 + $0x178] sm:$0xff]  ;;  %v138_v4 = vld [vmem:[#allocation3 + $0x160] sm:$0xff]  ;;  %v140_v7 = vld [vmem:[#allocation3 + $0x170] sm:$0xff] }
  0x79   :  { %4228 = vmatpush1.bf16.msra.mxu1 %v4227_v27  ;;  %4198 = vmatprep.subr.bf16.mxu0 %v4197_v28  ;;  %v4273_v6 = vpack.c.bf16 %v141_v62, %v133_v61  ;;  %v147_v8 = vld [vmem:[#allocation3 + $0x1a8] sm:$0xff]  ;;  %v149_v10 = vld [vmem:[#allocation3 + $0x1b8] sm:$0xff]  ;;  %v4243_v12 = vpack.c.bf16 %v138_v4, %v130_v3  ;;  %v4275_v13 = vpack.c.bf16 %v140_v7, %v132_v5  ;;  %v146_v15 = vld [vmem:[#allocation3 + $0x1a0] sm:$0xff] }
  0x7a   :  { %4230 = vmatprep.subr.bf16.mxu1 %v4229_v32  ;;  %v155_v9 = vld [vmem:[#allocation3 + $0x1e8] sm:$0xff]  ;;  %v157_v11 = vld [vmem:[#allocation3 + $0x1f8] sm:$0xff]  ;;  %v154_v16 = vld [vmem:[#allocation3 + $0x1e0] sm:$0xff] }
  0x7b   :  { %v4245_v14 = vpack.c.bf16 %v155_v9, %v147_v8  ;;  %v148_v17 = vld [vmem:[#allocation3 + $0x1b0] sm:$0xff]  ;;  %v4277_v18 = vpack.c.bf16 %v157_v11, %v149_v10  ;;  %v163_v20 = vld [vmem:[#allocation3 + $0x228] sm:$0xff]  ;;  %v165_v22 = vld [vmem:[#allocation3 + $0x238] sm:$0xff]  ;;  %v4247_v24 = vpack.c.bf16 %v154_v16, %v146_v15 }
  0x7c   :  { %4200 = vmatpush1.bf16.msra.mxu0 %v4199_v38  ;;  %v156_v19 = vld [vmem:[#allocation3 + $0x1f0] sm:$0xff]  ;;  %v171_v21 = vld [vmem:[#allocation3 + $0x268] sm:$0xff]  ;;  %v173_v23 = vld [vmem:[#allocation3 + $0x278] sm:$0xff] }
  0x7d   :  { %4232 = vmatpush1.bf16.msra.mxu1 %v4231_v39  ;;  %4234 = vmatprep.subr.bf16.mxu0 %v4233_v40  ;;  %v4279_v25 = vpack.c.bf16 %v156_v19, %v148_v17  ;;  %v4249_v26 = vpack.c.bf16 %v171_v21, %v163_v20  ;;  %v162_v27 = vld [vmem:[#allocation3 + $0x220] sm:$0xff]  ;;  %v164_v29 = vld [vmem:[#allocation3 + $0x230] sm:$0xff]  ;;  %v4281_v30 = vpack.c.bf16 %v173_v23, %v165_v22  ;;  %v179_v32 = vld [vmem:[#allocation3 + $0x2a8] sm:$0xff] }
  0x7e   :  { %4266 = vmatprep.subr.bf16.mxu1 %v4265_v44  ;;  %v170_v28 = vld [vmem:[#allocation3 + $0x260] sm:$0xff]  ;;  %v172_v31 = vld [vmem:[#allocation3 + $0x270] sm:$0xff]  ;;  %v187_v33 = vld [vmem:[#allocation3 + $0x2e8] sm:$0xff] }
  0x7f   :  { %287 = vmatmul.mubr.f32.vlgmr.msra.gmra.mrb[0].mxu0 %v5996_v50  ;;  %v181_v34 = vld [vmem:[#allocation3 + $0x2b8] sm:$0xff]  ;;  %v4251_v36 = vpack.c.bf16 %v170_v28, %v162_v27  ;;  %v4283_v37 = vpack.c.bf16 %v172_v31, %v164_v29  ;;  %v4253_v38 = vpack.c.bf16 %v187_v33, %v179_v32  ;;  %v178_v39 = vld [vmem:[#allocation3 + $0x2a0] sm:$0xff]  ;;  %v180_v41 = vld [vmem:[#allocation3 + $0x2b0] sm:$0xff] }
  0x80   :  { %358 = vmatmul.mubr.f32.vlgmr.msra.gmra.mrb[0].mxu1 %v5996_v50  ;;  %4236 = vmatpush1.bf16.msra.mxu0 %v4235_v51  ;;  %v189_v35 = vld [vmem:[#allocation3 + $0x2f8] sm:$0xff]  ;;  %v186_v40 = vld [vmem:[#allocation3 + $0x2e0] sm:$0xff]  ;;  %v188_v43 = vld [vmem:[#allocation3 + $0x2f0] sm:$0xff] }
  0x81   :  { %4268 = vmatpush1.bf16.msra.mxu1 %v4267_v52  ;;  %4238 = vmatprep.subr.bf16.mxu0 %v4237_v53  ;;  %v4285_v42 = vpack.c.bf16 %v189_v35, %v181_v34  ;;  %v195_v44 = vld [vmem:[#allocation3 + $0x328] sm:$0xff]  ;;  %v197_v46 = vld [vmem:[#allocation3 + $0x338] sm:$0xff]  ;;  %v4255_v48 = vpack.c.bf16 %v186_v40, %v178_v39  ;;  %v4287_v49 = vpack.c.bf16 %v188_v43, %v180_v41  ;;  %v194_v52 = vld [vmem:[#allocation3 + $0x320] sm:$0xff] }
  0x82   :  { %4270 = vmatprep.subr.bf16.mxu1 %v4269_v57  ;;  %428 = vmatprep.mubr.f32.mxu0 %v5878_v1  ;;  %v203_v45 = vld [vmem:[#allocation3 + $0x368] sm:$0xff]  ;;  %v205_v47 = vld [vmem:[#allocation3 + $0x378] sm:$0xff]  ;;  %v202_v53 = vld [vmem:[#allocation3 + $0x360] sm:$0xff] }
  0x83   :  { %499 = vmatprep.mubr.f32.mxu1 %v5878_v1  ;;  %v4257_v51 = vpack.c.bf16 %v203_v45, %v195_v44  ;;  %v196_v54 = vld [vmem:[#allocation3 + $0x330] sm:$0xff]  ;;  %v4289_v55 = vpack.c.bf16 %v205_v47, %v197_v46  ;;  %v211_v57 = vld [vmem:[#allocation3 + $0x3a8] sm:$0xff]  ;;  %v213_v59 = vld [vmem:[#allocation3 + $0x3b8] sm:$0xff]  ;;  %v4259_v61 = vpack.c.bf16 %v202_v53, %v194_v52 }
  0x84   :  { %4240 = vmatpush1.bf16.msra.mxu0 %v4239_v63  ;;  %v204_v56 = vld [vmem:[#allocation3 + $0x370] sm:$0xff]  ;;  %v219_v58 = vld [vmem:[#allocation3 + $0x3e8] sm:$0xff]  ;;  %v221_v60 = vld [vmem:[#allocation3 + $0x3f8] sm:$0xff] }
  0x85   :  { %4272 = vmatpush1.bf16.msra.mxu1 %v4271_v0  ;;  %4242 = vmatprep.subr.bf16.mxu0 %v4241_v2  ;;  %v4291_v62 = vpack.c.bf16 %v204_v56, %v196_v54  ;;  %v4261_v63 = vpack.c.bf16 %v219_v58, %v211_v57  ;;  %v210_v0 = vld [vmem:[#allocation3 + $0x3a0] sm:$0xff]  ;;  %v212_v3 = vld [vmem:[#allocation3 + $0x3b0] sm:$0xff]  ;;  %v4293_v4 = vpack.c.bf16 %v221_v60, %v213_v59  ;;  %v537_v7 = vld [vmem:[#allocation3 + $0x448] sm:$0xff] }
  0x86   :  { %4274 = vmatprep.subr.bf16.mxu1 %v4273_v6  ;;  %v218_v2 = vld [vmem:[#allocation3 + $0x3e0] sm:$0xff]  ;;  %v220_v5 = vld [vmem:[#allocation3 + $0x3f0] sm:$0xff]  ;;  %v529_v6 = vld [vmem:[#allocation3 + $0x408] sm:$0xff] }
  0x87   :  { %v531_v8 = vld [vmem:[#allocation3 + $0x418] sm:$0xff]  ;;  %v4263_v10 = vpack.c.bf16 %v218_v2, %v210_v0  ;;  %v4295_v11 = vpack.c.bf16 %v220_v5, %v212_v3  ;;  %v530_v15 = vld [vmem:[#allocation3 + $0x410] sm:$0xff]  ;;  %v553_v19 = vld [vmem:[#allocation3 + $0x4c8] sm:$0xff] }
  0x88   :  { %4244 = vmatpush1.bf16.msra.mxu0 %v4243_v12  ;;  %v539_v9 = vld [vmem:[#allocation3 + $0x458] sm:$0xff]  ;;  %v4297_v12 = vpack.c.bf16 %v537_v7, %v529_v6  ;;  %v538_v17 = vld [vmem:[#allocation3 + $0x450] sm:$0xff]  ;;  %v569_v31 = vld [vmem:[#allocation3 + $0x548] sm:$0xff] }
  0x89   :  { %4276 = vmatpush1.bf16.msra.mxu1 %v4275_v13  ;;  %4246 = vmatprep.subr.bf16.mxu0 %v4245_v14  ;;  %v528_v13 = vld [vmem:[#allocation3 + $0x400] sm:$0xff]  ;;  %v4329_v16 = vpack.c.bf16 %v539_v9, %v531_v8  ;;  %v547_v20 = vld [vmem:[#allocation3 + $0x498] sm:$0xff]  ;;  %v4331_v23 = vpack.c.bf16 %v538_v17, %v530_v15  ;;  %v546_v27 = vld [vmem:[#allocation3 + $0x490] sm:$0xff] }
  0x8a   :  { %4278 = vmatprep.subr.bf16.mxu1 %v4277_v18  ;;  %v536_v14 = vld [vmem:[#allocation3 + $0x440] sm:$0xff]  ;;  %v545_v18 = vld [vmem:[#allocation3 + $0x488] sm:$0xff]  ;;  %v555_v21 = vld [vmem:[#allocation3 + $0x4d8] sm:$0xff] }
  0x8b   :  { %v4299_v22 = vpack.c.bf16 %v536_v14, %v528_v13  ;;  %v4333_v28 = vpack.c.bf16 %v555_v21, %v547_v20  ;;  %v554_v29 = vld [vmem:[#allocation3 + $0x4d0] sm:$0xff]  ;;  %v563_v32 = vld [vmem:[#allocation3 + $0x518] sm:$0xff]  ;;  %v585_v43 = vld [vmem:[#allocation3 + $0x5c8] sm:$0xff] }
  0x8c   :  { %4248 = vmatpush1.bf16.msra.mxu0 %v4247_v24  ;;  %v4301_v24 = vpack.c.bf16 %v553_v19, %v545_v18  ;;  %v571_v33 = vld [vmem:[#allocation3 + $0x558] sm:$0xff]  ;;  %v4335_v35 = vpack.c.bf16 %v554_v29, %v546_v27  ;;  %v562_v39 = vld [vmem:[#allocation3 + $0x510] sm:$0xff]  ;;  %v601_v56 = vld [vmem:[#allocation3 + $0x648] sm:$0xff] }
  0x8d   :  { %4280 = vmatpush1.bf16.msra.mxu1 %v4279_v25  ;;  %4250 = vmatprep.subr.bf16.mxu0 %v4249_v26  ;;  %v544_v25 = vld [vmem:[#allocation3 + $0x480] sm:$0xff]  ;;  %v4337_v40 = vpack.c.bf16 %v571_v33, %v563_v32  ;;  %v570_v41 = vld [vmem:[#allocation3 + $0x550] sm:$0xff]  ;;  %v579_v44 = vld [vmem:[#allocation3 + $0x598] sm:$0xff] }
  0x8e   :  { %4282 = vmatprep.subr.bf16.mxu1 %v4281_v30  ;;  %v552_v26 = vld [vmem:[#allocation3 + $0x4c0] sm:$0xff]  ;;  %v561_v30 = vld [vmem:[#allocation3 + $0x508] sm:$0xff]  ;;  %v587_v45 = vld [vmem:[#allocation3 + $0x5d8] sm:$0xff]  ;;  %v4339_v47 = vpack.c.bf16 %v570_v41, %v562_v39 }
  0x8f   :  { %v4303_v34 = vpack.c.bf16 %v552_v26, %v544_v25  ;;  %v578_v52 = vld [vmem:[#allocation3 + $0x590] sm:$0xff]  ;;  %v4341_v53 = vpack.c.bf16 %v587_v45, %v579_v44  ;;  %v595_v57 = vld [vmem:[#allocation3 + $0x618] sm:$0xff]  ;;  %v617_v5 = vld [vmem:[#allocation3 + $0x6c8] sm:$0xff] }
  0x90   :  { %4252 = vmatpush1.bf16.msra.mxu0 %v4251_v36  ;;  %v4305_v36 = vpack.c.bf16 %v569_v31, %v561_v30  ;;  %v586_v54 = vld [vmem:[#allocation3 + $0x5d0] sm:$0xff]  ;;  %v603_v58 = vld [vmem:[#allocation3 + $0x658] sm:$0xff]  ;;  %v616_v13 = vld [vmem:[#allocation3 + $0x6c0] sm:$0xff] }
  0x91   :  { %4284 = vmatpush1.bf16.msra.mxu1 %v4283_v37  ;;  %4254 = vmatprep.subr.bf16.mxu0 %v4253_v38  ;;  %v560_v37 = vld [vmem:[#allocation3 + $0x500] sm:$0xff]  ;;  %v4343_v60 = vpack.c.bf16 %v586_v54, %v578_v52  ;;  %v594_v0 = vld [vmem:[#allocation3 + $0x610] sm:$0xff]  ;;  %v4345_v2 = vpack.c.bf16 %v603_v58, %v595_v57  ;;  %v611_v6 = vld [vmem:[#allocation3 + $0x698] sm:$0xff] }
  0x92   :  { %4286 = vmatprep.subr.bf16.mxu1 %v4285_v42  ;;  %v568_v38 = vld [vmem:[#allocation3 + $0x540] sm:$0xff]  ;;  %v577_v42 = vld [vmem:[#allocation3 + $0x588] sm:$0xff]  ;;  %v602_v3 = vld [vmem:[#allocation3 + $0x650] sm:$0xff] }
  0x93   :  { %v4307_v46 = vpack.c.bf16 %v568_v38, %v560_v37  ;;  %v619_v7 = vld [vmem:[#allocation3 + $0x6d8] sm:$0xff]  ;;  %v610_v14 = vld [vmem:[#allocation3 + $0x690] sm:$0xff]  ;;  %v625_v17 = vld [vmem:[#allocation3 + $0x708] sm:$0xff] }
  0x94   :  { %4256 = vmatpush1.bf16.msra.mxu0 %v4255_v48  ;;  %v4309_v48 = vpack.c.bf16 %v585_v43, %v577_v42  ;;  %v6009_v8 = vld [vmem:[%s6261_s1] sm:$0xff]  ;;  %v4349_v15 = vpack.c.bf16 %v619_v7, %v611_v6  ;;  %v633_v18 = vld [vmem:[#allocation3 + $0x748] sm:$0xff]  ;;  %v626_v27 = vld [vmem:[#allocation3 + $0x710] sm:$0xff] }
  0x95   :  { %4288 = vmatpush1.bf16.msra.mxu1 %v4287_v49  ;;  %4258 = vmatprep.subr.bf16.mxu0 %v4257_v51  ;;  %v576_v49 = vld [vmem:[#allocation3 + $0x580] sm:$0xff]  ;;  %v627_v19 = vld [vmem:[#allocation3 + $0x718] sm:$0xff]  ;;  %v634_v29 = vld [vmem:[#allocation3 + $0x750] sm:$0xff] }
  0x96   :  { %4290 = vmatprep.subr.bf16.mxu1 %v4289_v55  ;;  %v584_v51 = vld [vmem:[#allocation3 + $0x5c0] sm:$0xff]  ;;  %v593_v55 = vld [vmem:[#allocation3 + $0x608] sm:$0xff]  ;;  %509 = vperm.xlu0 %5749, %v6009_v8   ;;  %v635_v20 = vld [vmem:[#allocation3 + $0x758] sm:$0xff] }
  0x97   :  { %v4311_v59 = vpack.c.bf16 %v584_v51, %v576_v49  ;;  %v624_v25 = vld [vmem:[#allocation3 + $0x700] sm:$0xff]  ;;  %v641_v30 = vld [vmem:[#allocation3 + $0x788] sm:$0xff]  ;;  %v643_v32 = vld [vmem:[#allocation3 + $0x798] sm:$0xff] }
  0x98   :  { %4260 = vmatpush1.bf16.msra.mxu0 %v4259_v61  ;;  %v4313_v61 = vpack.c.bf16 %v601_v56, %v593_v55  ;;  %v632_v26 = vld [vmem:[#allocation3 + $0x740] sm:$0xff]  ;;  %v649_v31 = vld [vmem:[#allocation3 + $0x7c8] sm:$0xff]  ;;  %v651_v33 = vld [vmem:[#allocation3 + $0x7d8] sm:$0xff] }
  0x99   :  { %4292 = vmatpush1.bf16.msra.mxu1 %v4291_v62  ;;  %4262 = vmatprep.subr.bf16.mxu0 %v4261_v63  ;;  %v592_v62 = vld [vmem:[#allocation3 + $0x600] sm:$0xff]  ;;  %v642_v39 = vld [vmem:[#allocation3 + $0x790] sm:$0xff]  ;;  %v533_v42 = vld [vmem:[#allocation3 + $0x428] sm:$0xff] }
  0x9a   :  { %4294 = vmatprep.subr.bf16.mxu1 %v4293_v4  ;;  %v600_v63 = vld [vmem:[#allocation3 + $0x640] sm:$0xff]  ;;  %v609_v4 = vld [vmem:[#allocation3 + $0x688] sm:$0xff]  ;;  %v650_v41 = vld [vmem:[#allocation3 + $0x7d0] sm:$0xff] }
  0x9b   :  { %v4315_v9 = vpack.c.bf16 %v600_v63, %v592_v62  ;;  %v640_v37 = vld [vmem:[#allocation3 + $0x780] sm:$0xff]  ;;  %v541_v43 = vld [vmem:[#allocation3 + $0x468] sm:$0xff]  ;;  %v535_v44 = vld [vmem:[#allocation3 + $0x438] sm:$0xff] }
  0x9c   :  { %4264 = vmatpush1.bf16.msra.mxu0 %v4263_v10  ;;  %v4347_v10 = vpack.c.bf16 %v602_v3, %v594_v0  ;;  %v648_v38 = vld [vmem:[#allocation3 + $0x7c0] sm:$0xff]  ;;  %v543_v45 = vld [vmem:[#allocation3 + $0x478] sm:$0xff]  ;;  %v534_v52 = vld [vmem:[#allocation3 + $0x430] sm:$0xff] }
  0x9d   :  { %4296 = vmatpush1.bf16.msra.mxu1 %v4295_v11  ;;  %4298 = vmatprep.subr.bf16.mxu0 %v4297_v12  ;;  %v4317_v11 = vpack.c.bf16 %v617_v5, %v609_v4  ;;  %v608_v12 = vld [vmem:[#allocation3 + $0x680] sm:$0xff]  ;;  %v542_v54 = vld [vmem:[#allocation3 + $0x470] sm:$0xff]  ;;  %v549_v55 = vld [vmem:[#allocation3 + $0x4a8] sm:$0xff] }
  0x9e   :  { %4330 = vmatprep.subr.bf16.mxu1 %v4329_v16  ;;  %v618_v16 = vld [vmem:[#allocation3 + $0x6d0] sm:$0xff]  ;;  %v4319_v21 = vpack.c.bf16 %v616_v13, %v608_v12  ;;  %v532_v49 = vld [vmem:[#allocation3 + $0x420] sm:$0xff]  ;;  %v557_v56 = vld [vmem:[#allocation3 + $0x4e8] sm:$0xff] }
  0x9f   :  { %429 = vmatmul.mubr.f32.vlgmr.msra.gmra.mrb[2].mxu0 %v5996_v50  ;;  %v540_v51 = vld [vmem:[#allocation3 + $0x460] sm:$0xff]  ;;  %v551_v57 = vld [vmem:[#allocation3 + $0x4b8] sm:$0xff]  ;;  %v550_v0 = vld [vmem:[#allocation3 + $0x4b0] sm:$0xff] }
  0xa0   :  { %500 = vmatmul.mubr.f32.vlgmr.msra.gmra.mrb[2].mxu1 %v5996_v50  ;;  %4300 = vmatpush1.bf16.msra.mxu0 %v4299_v22  ;;  %v5880_v22 = vmov 1   ;;  %v559_v58 = vld [vmem:[#allocation3 + $0x4f8] sm:$0xff]  ;;  %v548_v62 = vld [vmem:[#allocation3 + $0x4a0] sm:$0xff]  ;;  %v558_v3 = vld [vmem:[#allocation3 + $0x4f0] sm:$0xff] }
  0xa1   :  { %4332 = vmatpush1.bf16.msra.mxu1 %v4331_v23  ;;  %4302 = vmatprep.subr.bf16.mxu0 %v4301_v24  ;;  %v4351_v23 = vpack.c.bf16 %v618_v16, %v610_v14  ;;  %v4321_v24 = vpack.c.bf16 %v633_v18, %v625_v17  ;;  %v556_v63 = vld [vmem:[#allocation3 + $0x4e0] sm:$0xff]  ;;  %v565_v4 = vld [vmem:[#allocation3 + $0x528] sm:$0xff]  ;;  %v567_v6 = vld [vmem:[#allocation3 + $0x538] sm:$0xff] }
  0xa2   :  { %4334 = vmatprep.subr.bf16.mxu1 %v4333_v28  ;;  %720 = vmatprep.mubr.f32.mxu0 %v5878_v1  ;;  %v4353_v28 = vpack.c.bf16 %v635_v20, %v627_v19  ;;  %v573_v5 = vld [vmem:[#allocation3 + $0x568] sm:$0xff]  ;;  %v575_v7 = vld [vmem:[#allocation3 + $0x578] sm:$0xff]  ;;  %v564_v12 = vld [vmem:[#allocation3 + $0x520] sm:$0xff] }
  0xa3   :  { %791 = vmatprep.mubr.f32.mxu1 %v5878_v1  ;;  %5750 = vset.pattern.permute.xlu0 %v5880_v22  ;;  %v572_v13 = vld [vmem:[#allocation3 + $0x560] sm:$0xff]  ;;  %v566_v14 = vld [vmem:[#allocation3 + $0x530] sm:$0xff]  ;;  %v581_v17 = vld [vmem:[#allocation3 + $0x5a8] sm:$0xff] }
  0xa4   :  { %4304 = vmatpush1.bf16.msra.mxu0 %v4303_v34  ;;  %941 = vperm.xlu0 %5750, %v6009_v8   ;;  %v4323_v34 = vpack.c.bf16 %v632_v26, %v624_v25  ;;  %v574_v16 = vld [vmem:[#allocation3 + $0x570] sm:$0xff]  ;;  %v589_v18 = vld [vmem:[#allocation3 + $0x5e8] sm:$0xff]  ;;  %v583_v19 = vld [vmem:[#allocation3 + $0x5b8] sm:$0xff] }
  0xa5   :  { %4336 = vmatpush1.bf16.msra.mxu1 %v4335_v35  ;;  %4306 = vmatprep.subr.bf16.mxu0 %v4305_v36  ;;  %v4355_v35 = vpack.c.bf16 %v634_v29, %v626_v27  ;;  %v4325_v36 = vpack.c.bf16 %v649_v31, %v641_v30  ;;  %v591_v20 = vld [vmem:[#allocation3 + $0x5f8] sm:$0xff]  ;;  %v4403_v22 = vpack.c.bf16 %v574_v16, %v566_v14  ;;  %v588_v25 = vld [vmem:[#allocation3 + $0x5e0] sm:$0xff]  ;;  %v582_v26 = vld [vmem:[#allocation3 + $0x5b0] sm:$0xff] }
  0xa6   :  { %4338 = vmatprep.subr.bf16.mxu1 %v4337_v40  ;;  %v4357_v40 = vpack.c.bf16 %v651_v33, %v643_v32  ;;  %v4405_v27 = vpack.c.bf16 %v591_v20, %v583_v19  ;;  %v597_v29 = vld [vmem:[#allocation3 + $0x628] sm:$0xff]  ;;  %v599_v31 = vld [vmem:[#allocation3 + $0x638] sm:$0xff]  ;;  %v646_v14 = vld [vmem:[#allocation3 + $0x7b0] sm:$0xff] }
  0xa7   :  { %v605_v30 = vld [vmem:[#allocation3 + $0x668] sm:$0xff]  ;;  %v607_v32 = vld [vmem:[#allocation3 + $0x678] sm:$0xff]  ;;  %v654_v16 = vld [vmem:[#allocation3 + $0x7f0] sm:$0xff] }
  0xa8   :  { %4308 = vmatpush1.bf16.msra.mxu0 %v4307_v46  ;;  %v4327_v46 = vpack.c.bf16 %v648_v38, %v640_v37  ;;  %v604_v37 = vld [vmem:[#allocation3 + $0x660] sm:$0xff]  ;;  %v598_v38 = vld [vmem:[#allocation3 + $0x630] sm:$0xff]  ;;  %v963_v19 = vld [vmem:[#allocation3 + $0x818] sm:$0xff] }
  0xa9   :  { %4340 = vmatpush1.bf16.msra.mxu1 %v4339_v47  ;;  %4310 = vmatprep.subr.bf16.mxu0 %v4309_v48  ;;  %v4359_v47 = vpack.c.bf16 %v650_v41, %v642_v39  ;;  %v4361_v48 = vpack.c.bf16 %v541_v43, %v533_v42  ;;  %v4409_v39 = vpack.c.bf16 %v607_v32, %v599_v31  ;;  %v613_v41 = vld [vmem:[#allocation3 + $0x6a8] sm:$0xff]  ;;  %v615_v43 = vld [vmem:[#allocation3 + $0x6b8] sm:$0xff] }
  0xaa   :  { %4342 = vmatprep.subr.bf16.mxu1 %v4341_v53  ;;  %v4393_v53 = vpack.c.bf16 %v543_v45, %v535_v44  ;;  %v621_v42 = vld [vmem:[#allocation3 + $0x6e8] sm:$0xff]  ;;  %v623_v44 = vld [vmem:[#allocation3 + $0x6f8] sm:$0xff] }
  0xab   :  { %v971_v20 = vld [vmem:[#allocation3 + $0x858] sm:$0xff] }
  0xac   :  { %4312 = vmatpush1.bf16.msra.mxu0 %v4311_v59  ;;  %v4363_v59 = vpack.c.bf16 %v540_v51, %v532_v49  ;;  %v620_v49 = vld [vmem:[#allocation3 + $0x6e0] sm:$0xff]  ;;  %v614_v51 = vld [vmem:[#allocation3 + $0x6b0] sm:$0xff]  ;;  %v979_v31 = vld [vmem:[#allocation3 + $0x898] sm:$0xff] }
  0xad   :  { %4344 = vmatpush1.bf16.msra.mxu1 %v4343_v60  ;;  %4314 = vmatprep.subr.bf16.mxu0 %v4313_v61  ;;  %v4395_v60 = vpack.c.bf16 %v542_v54, %v534_v52  ;;  %v4365_v61 = vpack.c.bf16 %v557_v56, %v549_v55  ;;  %v4413_v52 = vpack.c.bf16 %v623_v44, %v615_v43  ;;  %v629_v54 = vld [vmem:[#allocation3 + $0x728] sm:$0xff]  ;;  %v631_v56 = vld [vmem:[#allocation3 + $0x738] sm:$0xff] }
  0xae   :  { %4346 = vmatprep.subr.bf16.mxu1 %v4345_v2  ;;  %v4397_v2 = vpack.c.bf16 %v559_v58, %v551_v57  ;;  %v637_v55 = vld [vmem:[#allocation3 + $0x768] sm:$0xff]  ;;  %v639_v57 = vld [vmem:[#allocation3 + $0x778] sm:$0xff] }
  0xaf   :  { %v987_v32 = vld [vmem:[#allocation3 + $0x8d8] sm:$0xff] }
  0xb0   :  { %4316 = vmatpush1.bf16.msra.mxu0 %v4315_v9  ;;  %v4367_v9 = vpack.c.bf16 %v556_v63, %v548_v62  ;;  %v636_v62 = vld [vmem:[#allocation3 + $0x760] sm:$0xff]  ;;  %v630_v63 = vld [vmem:[#allocation3 + $0x730] sm:$0xff]  ;;  %v995_v43 = vld [vmem:[#allocation3 + $0x918] sm:$0xff] }
  0xb1   :  { %4348 = vmatpush1.bf16.msra.mxu1 %v4347_v10  ;;  %4318 = vmatprep.subr.bf16.mxu0 %v4317_v11  ;;  %v4399_v10 = vpack.c.bf16 %v558_v3, %v550_v0  ;;  %v4369_v11 = vpack.c.bf16 %v573_v5, %v565_v4  ;;  %v4417_v0 = vpack.c.bf16 %v639_v57, %v631_v56  ;;  %v645_v3 = vld [vmem:[#allocation3 + $0x7a8] sm:$0xff]  ;;  %v5881_v5 = vmov 2   ;;  %v1003_v44 = vld [vmem:[#allocation3 + $0x958] sm:$0xff] }
  0xb2   :  { %4350 = vmatprep.subr.bf16.mxu1 %v4349_v15  ;;  %v4401_v15 = vpack.c.bf16 %v575_v7, %v567_v6  ;;  %v653_v4 = vld [vmem:[#allocation3 + $0x7e8] sm:$0xff]  ;;  %5751 = vset.pattern.permute.xlu1 %v5881_v5  ;;  %v647_v6 = vld [vmem:[#allocation3 + $0x7b8] sm:$0xff] }
  0xb3   :  { %v655_v7 = vld [vmem:[#allocation3 + $0x7f8] sm:$0xff]  ;;  %1373 = vperm.xlu1 %5751, %v6009_v8  }
  0xb4   :  { %4320 = vmatpush1.bf16.msra.mxu0 %v4319_v21  ;;  %v4371_v21 = vpack.c.bf16 %v572_v13, %v564_v12  ;;  %v644_v12 = vld [vmem:[#allocation3 + $0x7a0] sm:$0xff]  ;;  %v1011_v56 = vld [vmem:[#allocation3 + $0x998] sm:$0xff] }
  0xb5   :  { %4352 = vmatpush1.bf16.msra.mxu1 %v4351_v23  ;;  %4322 = vmatprep.subr.bf16.mxu0 %v4321_v24  ;;  %v4373_v23 = vpack.c.bf16 %v589_v18, %v581_v17  ;;  %v580_v24 = vld [vmem:[#allocation3 + $0x5a0] sm:$0xff]  ;;  %v961_v17 = vld [vmem:[#allocation3 + $0x808] sm:$0xff]  ;;  %v1019_v57 = vld [vmem:[#allocation3 + $0x9d8] sm:$0xff] }
  0xb6   :  { %4354 = vmatprep.subr.bf16.mxu1 %v4353_v28  ;;  %v590_v28 = vld [vmem:[#allocation3 + $0x5f0] sm:$0xff]  ;;  %v4375_v33 = vpack.c.bf16 %v588_v25, %v580_v24  ;;  %v652_v13 = vld [vmem:[#allocation3 + $0x7e0] sm:$0xff]  ;;  %v969_v18 = vld [vmem:[#allocation3 + $0x848] sm:$0xff] }
  0xb7   :  { %v960_v24 = vld [vmem:[#allocation3 + $0x800] sm:$0xff]  ;;  %v1035_v5 = vld [vmem:[#allocation3 + $0xa58] sm:$0xff] }
  0xb8   :  { %4324 = vmatpush1.bf16.msra.mxu0 %v4323_v34  ;;  %v4407_v34 = vpack.c.bf16 %v590_v28, %v582_v26  ;;  %v968_v25 = vld [vmem:[#allocation3 + $0x840] sm:$0xff]  ;;  %v962_v26 = vld [vmem:[#allocation3 + $0x810] sm:$0xff] }
  0xb9   :  { %4356 = vmatpush1.bf16.msra.mxu1 %v4355_v35  ;;  %4326 = vmatprep.subr.bf16.mxu0 %v4325_v36  ;;  %v4377_v35 = vpack.c.bf16 %v605_v30, %v597_v29  ;;  %v596_v36 = vld [vmem:[#allocation3 + $0x620] sm:$0xff]  ;;  %v970_v28 = vld [vmem:[#allocation3 + $0x850] sm:$0xff]  ;;  %v977_v29 = vld [vmem:[#allocation3 + $0x888] sm:$0xff] }
  0xba   :  { %4358 = vmatprep.subr.bf16.mxu1 %v4357_v40  ;;  %v606_v40 = vld [vmem:[#allocation3 + $0x670] sm:$0xff]  ;;  %v4379_v45 = vpack.c.bf16 %v604_v37, %v596_v36  ;;  %v985_v30 = vld [vmem:[#allocation3 + $0x8c8] sm:$0xff]  ;;  %v976_v36 = vld [vmem:[#allocation3 + $0x880] sm:$0xff] }
  0xbb   :  { %v984_v37 = vld [vmem:[#allocation3 + $0x8c0] sm:$0xff] }
  0xbc   :  { %4328 = vmatpush1.bf16.msra.mxu0 %v4327_v46  ;;  %v4411_v46 = vpack.c.bf16 %v606_v40, %v598_v38  ;;  %v978_v38 = vld [vmem:[#allocation3 + $0x890] sm:$0xff] }
  0xbd   :  { %4360 = vmatpush1.bf16.msra.mxu1 %v4359_v47  ;;  %4362 = vmatprep.subr.bf16.mxu0 %v4361_v48  ;;  %v4381_v47 = vpack.c.bf16 %v621_v42, %v613_v41  ;;  %v612_v48 = vld [vmem:[#allocation3 + $0x6a0] sm:$0xff]  ;;  %v986_v40 = vld [vmem:[#allocation3 + $0x8d0] sm:$0xff]  ;;  %v993_v41 = vld [vmem:[#allocation3 + $0x908] sm:$0xff] }
  0xbe   :  { %4394 = vmatprep.subr.bf16.mxu1 %v4393_v53  ;;  %v622_v53 = vld [vmem:[#allocation3 + $0x6f0] sm:$0xff]  ;;  %v4383_v58 = vpack.c.bf16 %v620_v49, %v612_v48  ;;  %v1001_v42 = vld [vmem:[#allocation3 + $0x948] sm:$0xff]  ;;  %v992_v48 = vld [vmem:[#allocation3 + $0x900] sm:$0xff] }
  0xbf   :  { %721 = vmatmul.mubr.f32.vlgmr.msra.gmra.mrb[4].mxu0 %v5996_v50  ;;  %v1000_v49 = vld [vmem:[#allocation3 + $0x940] sm:$0xff] }
  0xc0   :  { %792 = vmatmul.mubr.f32.vlgmr.msra.gmra.mrb[4].mxu1 %v5996_v50  ;;  %4364 = vmatpush1.bf16.msra.mxu0 %v4363_v59  ;;  %v4415_v59 = vpack.c.bf16 %v622_v53, %v614_v51  ;;  %v994_v51 = vld [vmem:[#allocation3 + $0x910] sm:$0xff] }
  0xc1   :  { %4396 = vmatpush1.bf16.msra.mxu1 %v4395_v60  ;;  %4366 = vmatprep.subr.bf16.mxu0 %v4365_v61  ;;  %v4385_v60 = vpack.c.bf16 %v637_v55, %v629_v54  ;;  %v628_v61 = vld [vmem:[#allocation3 + $0x720] sm:$0xff]  ;;  %v1002_v53 = vld [vmem:[#allocation3 + $0x950] sm:$0xff]  ;;  %v1009_v54 = vld [vmem:[#allocation3 + $0x988] sm:$0xff] }
  0xc2   :  { %4398 = vmatprep.subr.bf16.mxu1 %v4397_v2  ;;  %862 = vmatprep.mubr.f32.mxu0 %v5878_v1  ;;  %v638_v2 = vld [vmem:[#allocation3 + $0x770] sm:$0xff]  ;;  %v1017_v55 = vld [vmem:[#allocation3 + $0x9c8] sm:$0xff] }
  0xc3   :  { %933 = vmatprep.mubr.f32.mxu1 %v5878_v1 }
  0xc4   :  { %4368 = vmatpush1.bf16.msra.mxu0 %v4367_v9  ;;  %v4387_v9 = vpack.c.bf16 %v636_v62, %v628_v61  ;;  %v1016_v61 = vld [vmem:[#allocation3 + $0x9c0] sm:$0xff]  ;;  %v1010_v62 = vld [vmem:[#allocation3 + $0x990] sm:$0xff] }
  0xc5   :  { %4400 = vmatpush1.bf16.msra.mxu1 %v4399_v10  ;;  %4370 = vmatprep.subr.bf16.mxu0 %v4369_v11  ;;  %v4419_v10 = vpack.c.bf16 %v638_v2, %v630_v63  ;;  %v4389_v11 = vpack.c.bf16 %v653_v4, %v645_v3  ;;  %v4469_v63 = vpack.c.bf16 %v1019_v57, %v1011_v56  ;;  %v1025_v2 = vld [vmem:[#allocation3 + $0xa08] sm:$0xff]  ;;  %v1027_v4 = vld [vmem:[#allocation3 + $0xa18] sm:$0xff] }
  0xc6   :  { %4402 = vmatprep.subr.bf16.mxu1 %v4401_v15  ;;  %v4421_v15 = vpack.c.bf16 %v655_v7, %v647_v6  ;;  %v1033_v3 = vld [vmem:[#allocation3 + $0xa48] sm:$0xff]  ;;  %v975_v56 = vld [vmem:[#allocation3 + $0x878] sm:$0xff] }
  0xc8   :  { %4372 = vmatpush1.bf16.msra.mxu0 %v4371_v21  ;;  %v4391_v21 = vpack.c.bf16 %v652_v13, %v644_v12  ;;  %v1026_v12 = vld [vmem:[#allocation3 + $0xa10] sm:$0xff]  ;;  %v4473_v13 = vpack.c.bf16 %v1035_v5, %v1027_v4  ;;  %v991_v4 = vld [vmem:[#allocation3 + $0x8f8] sm:$0xff] }
  0xc9   :  { %4404 = vmatpush1.bf16.msra.mxu1 %v4403_v22  ;;  %4374 = vmatprep.subr.bf16.mxu0 %v4373_v23  ;;  %v4423_v22 = vpack.c.bf16 %v654_v16, %v646_v14  ;;  %v4425_v23 = vpack.c.bf16 %v969_v18, %v961_v17  ;;  %v1034_v14 = vld [vmem:[#allocation3 + $0xa50] sm:$0xff]  ;;  %v1049_v16 = vld [vmem:[#allocation3 + $0xac8] sm:$0xff]  ;;  %v1043_v17 = vld [vmem:[#allocation3 + $0xa98] sm:$0xff] }
  0xca   :  { %4406 = vmatprep.subr.bf16.mxu1 %v4405_v27  ;;  %v4457_v27 = vpack.c.bf16 %v971_v20, %v963_v19  ;;  %v1051_v18 = vld [vmem:[#allocation3 + $0xad8] sm:$0xff]  ;;  %v4475_v20 = vpack.c.bf16 %v1034_v14, %v1026_v12  ;;  %v990_v12 = vld [vmem:[#allocation3 + $0x8f0] sm:$0xff]  ;;  %v1005_v14 = vld [vmem:[#allocation3 + $0x968] sm:$0xff] }
  0xcc   :  { %4376 = vmatpush1.bf16.msra.mxu0 %v4375_v33  ;;  %v4427_v33 = vpack.c.bf16 %v968_v25, %v960_v24  ;;  %v1042_v24 = vld [vmem:[#allocation3 + $0xa90] sm:$0xff]  ;;  %v4477_v25 = vpack.c.bf16 %v1051_v18, %v1043_v17  ;;  %v1007_v17 = vld [vmem:[#allocation3 + $0x978] sm:$0xff] }
  0xcd   :  { %4408 = vmatpush1.bf16.msra.mxu1 %v4407_v34  ;;  %4378 = vmatprep.subr.bf16.mxu0 %v4377_v35  ;;  %v4459_v34 = vpack.c.bf16 %v970_v28, %v962_v26  ;;  %v4429_v35 = vpack.c.bf16 %v985_v30, %v977_v29  ;;  %v1050_v26 = vld [vmem:[#allocation3 + $0xad0] sm:$0xff]  ;;  %v1065_v28 = vld [vmem:[#allocation3 + $0xb48] sm:$0xff]  ;;  %v1059_v29 = vld [vmem:[#allocation3 + $0xb18] sm:$0xff] }
  0xce   :  { %4410 = vmatprep.subr.bf16.mxu1 %v4409_v39  ;;  %v4461_v39 = vpack.c.bf16 %v987_v32, %v979_v31  ;;  %v1067_v30 = vld [vmem:[#allocation3 + $0xb58] sm:$0xff]  ;;  %v4479_v32 = vpack.c.bf16 %v1050_v26, %v1042_v24  ;;  %v1013_v26 = vld [vmem:[#allocation3 + $0x9a8] sm:$0xff] }
  0xd0   :  { %4380 = vmatpush1.bf16.msra.mxu0 %v4379_v45  ;;  %v4431_v45 = vpack.c.bf16 %v984_v37, %v976_v36  ;;  %v1058_v36 = vld [vmem:[#allocation3 + $0xb10] sm:$0xff]  ;;  %v4481_v37 = vpack.c.bf16 %v1067_v30, %v1059_v29  ;;  %v1023_v29 = vld [vmem:[#allocation3 + $0x9f8] sm:$0xff] }
  0xd1   :  { %4412 = vmatpush1.bf16.msra.mxu1 %v4411_v46  ;;  %4382 = vmatprep.subr.bf16.mxu0 %v4381_v47  ;;  %v4463_v46 = vpack.c.bf16 %v986_v40, %v978_v38  ;;  %v4433_v47 = vpack.c.bf16 %v1001_v42, %v993_v41  ;;  %v1066_v38 = vld [vmem:[#allocation3 + $0xb50] sm:$0xff]  ;;  %v1081_v40 = vld [vmem:[#allocation3 + $0xbc8] sm:$0xff]  ;;  %v1075_v41 = vld [vmem:[#allocation3 + $0xb98] sm:$0xff] }
  0xd2   :  { %4414 = vmatprep.subr.bf16.mxu1 %v4413_v52  ;;  %v4465_v52 = vpack.c.bf16 %v1003_v44, %v995_v43  ;;  %v1083_v42 = vld [vmem:[#allocation3 + $0xbd8] sm:$0xff]  ;;  %v4483_v44 = vpack.c.bf16 %v1066_v38, %v1058_v36  ;;  %v1029_v38 = vld [vmem:[#allocation3 + $0xa28] sm:$0xff] }
  0xd4   :  { %4384 = vmatpush1.bf16.msra.mxu0 %v4383_v58  ;;  %v4467_v58 = vpack.c.bf16 %v1002_v53, %v994_v51  ;;  %v1082_v51 = vld [vmem:[#allocation3 + $0xbd0] sm:$0xff]  ;;  %v973_v53 = vld [vmem:[#allocation3 + $0x868] sm:$0xff] }
  0xd5   :  { %4416 = vmatpush1.bf16.msra.mxu1 %v4415_v59  ;;  %4386 = vmatprep.subr.bf16.mxu0 %v4385_v60  ;;  %v4437_v59 = vpack.c.bf16 %v1017_v55, %v1009_v54  ;;  %v1008_v60 = vld [vmem:[#allocation3 + $0x980] sm:$0xff]  ;;  %v5882_v54 = vmov 3   ;;  %v967_v55 = vld [vmem:[#allocation3 + $0x838] sm:$0xff] }
  0xd6   :  { %4418 = vmatprep.subr.bf16.mxu1 %v4417_v0  ;;  %v1018_v0 = vld [vmem:[#allocation3 + $0x9d0] sm:$0xff]  ;;  %v4439_v6 = vpack.c.bf16 %v1016_v61, %v1008_v60  ;;  %5752 = vset.pattern.permute.xlu1 %v5882_v54  ;;  %v972_v60 = vld [vmem:[#allocation3 + $0x860] sm:$0xff] }
  0xd7   :  { %v4471_v7 = vpack.c.bf16 %v1018_v0, %v1010_v62  ;;  %1805 = vperm.xlu1 %5752, %v6009_v8   ;;  %5753 = vset.pattern.permute.xlu0 %v5882_v54  ;;  %v966_v61 = vld [vmem:[#allocation3 + $0x830] sm:$0xff]  ;;  %v4521_v62 = vpack.c.bf16 %v975_v56, %v967_v55  ;;  %v981_v0 = vld [vmem:[#allocation3 + $0x8a8] sm:$0xff]  ;;  %v1055_v54 = vld [vmem:[#allocation3 + $0xaf8] sm:$0xff] }
  0xd8   :  { %4388 = vmatpush1.bf16.msra.mxu0 %v4387_v9  ;;  %v4441_v9 = vpack.c.bf16 %v1033_v3, %v1025_v2  ;;  %v989_v2 = vld [vmem:[#allocation3 + $0x8e8] sm:$0xff]  ;;  %v983_v3 = vld [vmem:[#allocation3 + $0x8b8] sm:$0xff] }
  0xd9   :  { %4420 = vmatpush1.bf16.msra.mxu1 %v4419_v10  ;;  %4390 = vmatprep.subr.bf16.mxu0 %v4389_v11  ;;  %v1024_v10 = vld [vmem:[#allocation3 + $0xa00] sm:$0xff] }
  0xda   :  { %4422 = vmatprep.subr.bf16.mxu1 %v4421_v15  ;;  %v1032_v11 = vld [vmem:[#allocation3 + $0xa40] sm:$0xff]  ;;  %v1041_v15 = vld [vmem:[#allocation3 + $0xa88] sm:$0xff] }
  0xdb   :  { %v4443_v19 = vpack.c.bf16 %v1032_v11, %v1024_v10  ;;  %v982_v10 = vld [vmem:[#allocation3 + $0x8b0] sm:$0xff]  ;;  %v4525_v11 = vpack.c.bf16 %v991_v4, %v983_v3 }
  0xdc   :  { %4392 = vmatpush1.bf16.msra.mxu0 %v4391_v21  ;;  %v4445_v21 = vpack.c.bf16 %v1049_v16, %v1041_v15  ;;  %v6026_v15 = vld [vmem:[%s6260_s0] sm:$0xff] }
  0xdd   :  { %4424 = vmatpush1.bf16.msra.mxu1 %v4423_v22  ;;  %4426 = vmatprep.subr.bf16.mxu0 %v4425_v23  ;;  %v1040_v22 = vld [vmem:[#allocation3 + $0xa80] sm:$0xff]  ;;  %v999_v16 = vld [vmem:[#allocation3 + $0x938] sm:$0xff] }
  0xde   :  { %4458 = vmatprep.subr.bf16.mxu1 %v4457_v27  ;;  %v1048_v23 = vld [vmem:[#allocation3 + $0xac0] sm:$0xff]  ;;  %v1057_v27 = vld [vmem:[#allocation3 + $0xb08] sm:$0xff]  ;;  %v4529_v24 = vpack.c.bf16 %v1007_v17, %v999_v16 }
  0xdf   :  { %863 = vmatmul.mubr.f32.vlgmr.msra.gmra.mrb[6].mxu0 %v5996_v50  ;;  %v4447_v31 = vpack.c.bf16 %v1048_v23, %v1040_v22  ;;  %v1004_v22 = vld [vmem:[#allocation3 + $0x960] sm:$0xff]  ;;  %v998_v23 = vld [vmem:[#allocation3 + $0x930] sm:$0xff] }
  0xe0   :  { %934 = vmatmul.mubr.f32.vlgmr.msra.gmra.mrb[6].mxu1 %v5996_v50  ;;  %4428 = vmatpush1.bf16.msra.mxu0 %v4427_v33  ;;  %v4435_v50 = vpack.c.bf16 %v1000_v49, %v992_v48  ;;  %v4449_v33 = vpack.c.bf16 %v1065_v28, %v1057_v27  ;;  %v1074_v48 = vld [vmem:[#allocation3 + $0xb90] sm:$0xff]  ;;  %v4485_v49 = vpack.c.bf16 %v1083_v42, %v1075_v41  ;;  %v1021_v27 = vld [vmem:[#allocation3 + $0x9e8] sm:$0xff]  ;;  %v1015_v28 = vld [vmem:[#allocation3 + $0x9b8] sm:$0xff] }
  0xe1   :  { %4460 = vmatpush1.bf16.msra.mxu1 %v4459_v34  ;;  %4430 = vmatprep.subr.bf16.mxu0 %v4429_v35  ;;  %v1056_v34 = vld [vmem:[#allocation3 + $0xb00] sm:$0xff]  ;;  %v4533_v36 = vpack.c.bf16 %v1023_v29, %v1015_v28  ;;  %v1039_v41 = vld [vmem:[#allocation3 + $0xa78] sm:$0xff] }
  0xe2   :  { %4462 = vmatprep.subr.bf16.mxu1 %v4461_v39  ;;  %1152 = vmatprep.mubr.f32.mxu0 %v5878_v1  ;;  %v1064_v35 = vld [vmem:[#allocation3 + $0xb40] sm:$0xff]  ;;  %v1073_v39 = vld [vmem:[#allocation3 + $0xb88] sm:$0xff] }
  0xe3   :  { %1223 = vmatprep.mubr.f32.mxu1 %v5878_v1  ;;  %v4451_v43 = vpack.c.bf16 %v1064_v35, %v1056_v34  ;;  %v1020_v34 = vld [vmem:[#allocation3 + $0x9e0] sm:$0xff]  ;;  %v1014_v35 = vld [vmem:[#allocation3 + $0x9b0] sm:$0xff] }
  0xe4   :  { %4432 = vmatpush1.bf16.msra.mxu0 %v4431_v45  ;;  %v4453_v45 = vpack.c.bf16 %v1081_v40, %v1073_v39  ;;  %v1037_v39 = vld [vmem:[#allocation3 + $0xa68] sm:$0xff]  ;;  %v1031_v40 = vld [vmem:[#allocation3 + $0xa38] sm:$0xff] }
  0xe5   :  { %4464 = vmatpush1.bf16.msra.mxu1 %v4463_v46  ;;  %4434 = vmatprep.subr.bf16.mxu0 %v4433_v47  ;;  %v1072_v46 = vld [vmem:[#allocation3 + $0xb80] sm:$0xff] }
  0xe6   :  { %4466 = vmatprep.subr.bf16.mxu1 %v4465_v52  ;;  %v1080_v47 = vld [vmem:[#allocation3 + $0xbc0] sm:$0xff]  ;;  %v965_v52 = vld [vmem:[#allocation3 + $0x828] sm:$0xff] }
  0xe7   :  { %v4455_v57 = vpack.c.bf16 %v1080_v47, %v1072_v46  ;;  %v1036_v46 = vld [vmem:[#allocation3 + $0xa60] sm:$0xff]  ;;  %v1030_v47 = vld [vmem:[#allocation3 + $0xa30] sm:$0xff] }
  0xe8   :  { %4436 = vmatpush1.bf16.msra.mxu0 %v4435_v50  ;;  %v4487_v50 = vpack.c.bf16 %v1082_v51, %v1074_v48  ;;  %v4537_v48 = vpack.c.bf16 %v1039_v41, %v1031_v40  ;;  %v1045_v51 = vld [vmem:[#allocation3 + $0xaa8] sm:$0xff] }
  0xe9   :  { %4468 = vmatpush1.bf16.msra.mxu1 %v4467_v58  ;;  %4438 = vmatprep.subr.bf16.mxu0 %v4437_v59  ;;  %v4489_v58 = vpack.c.bf16 %v973_v53, %v965_v52  ;;  %v964_v59 = vld [vmem:[#allocation3 + $0x820] sm:$0xff]  ;;  %v1053_v52 = vld [vmem:[#allocation3 + $0xae8] sm:$0xff]  ;;  %v1047_v53 = vld [vmem:[#allocation3 + $0xab8] sm:$0xff] }
  0xea   :  { %4470 = vmatprep.subr.bf16.mxu1 %v4469_v63  ;;  %v974_v63 = vld [vmem:[#allocation3 + $0x870] sm:$0xff]  ;;  %v4491_v5 = vpack.c.bf16 %v972_v60, %v964_v59  ;;  %v4541_v60 = vpack.c.bf16 %v1055_v54, %v1047_v53 }
  0xeb   :  { %v4523_v8 = vpack.c.bf16 %v974_v63, %v966_v61  ;;  %v1046_v59 = vld [vmem:[#allocation3 + $0xab0] sm:$0xff]  ;;  %v1069_v63 = vld [vmem:[#allocation3 + $0xb68] sm:$0xff] }
  0xec   :  { %4440 = vmatpush1.bf16.msra.mxu0 %v4439_v6  ;;  %v4493_v6 = vpack.c.bf16 %v989_v2, %v981_v0  ;;  %v1054_v61 = vld [vmem:[#allocation3 + $0xaf0] sm:$0xff]  ;;  %v1063_v0 = vld [vmem:[#allocation3 + $0xb38] sm:$0xff] }
  0xed   :  { %4472 = vmatpush1.bf16.msra.mxu1 %v4471_v7  ;;  %4442 = vmatprep.subr.bf16.mxu0 %v4441_v9  ;;  %v980_v7 = vld [vmem:[#allocation3 + $0x8a0] sm:$0xff]  ;;  %v1071_v2 = vld [vmem:[#allocation3 + $0xb78] sm:$0xff]  ;;  %v4543_v4 = vpack.c.bf16 %v1054_v61, %v1046_v59  ;;  %v1434_v59 = vld [vmem:[#allocation3 + $0xd50] sm:$0xff] }
  0xee   :  { %4474 = vmatprep.subr.bf16.mxu1 %v4473_v13  ;;  %v988_v9 = vld [vmem:[#allocation3 + $0x8e0] sm:$0xff]  ;;  %v997_v13 = vld [vmem:[#allocation3 + $0x928] sm:$0xff] }
  0xef   :  { %v4495_v18 = vpack.c.bf16 %v988_v9, %v980_v7  ;;  %v1062_v7 = vld [vmem:[#allocation3 + $0xb30] sm:$0xff]  ;;  %v4545_v9 = vpack.c.bf16 %v1071_v2, %v1063_v0  ;;  %v1449_v61 = vld [vmem:[#allocation3 + $0xdc8] sm:$0xff] }
  0xf0   :  { %4444 = vmatpush1.bf16.msra.mxu0 %v4443_v19  ;;  %v4527_v19 = vpack.c.bf16 %v990_v12, %v982_v10  ;;  %v1070_v10 = vld [vmem:[#allocation3 + $0xb70] sm:$0xff]  ;;  %v1085_v12 = vld [vmem:[#allocation3 + $0xbe8] sm:$0xff] }
  0xf1   :  { %4476 = vmatpush1.bf16.msra.mxu1 %v4475_v20  ;;  %4446 = vmatprep.subr.bf16.mxu0 %v4445_v21  ;;  %v4497_v20 = vpack.c.bf16 %v1005_v14, %v997_v13  ;;  %v996_v21 = vld [vmem:[#allocation3 + $0x920] sm:$0xff]  ;;  %v1079_v13 = vld [vmem:[#allocation3 + $0xbb8] sm:$0xff]  ;;  %v4547_v17 = vpack.c.bf16 %v1070_v10, %v1062_v7  ;;  %v1450_v7 = vld [vmem:[#allocation3 + $0xdd0] sm:$0xff] }
  0xf2   :  { %4478 = vmatprep.subr.bf16.mxu1 %v4477_v25  ;;  %v1006_v25 = vld [vmem:[#allocation3 + $0x970] sm:$0xff]  ;;  %v4499_v30 = vpack.c.bf16 %v1004_v22, %v996_v21  ;;  %v1087_v14 = vld [vmem:[#allocation3 + $0xbf8] sm:$0xff]  ;;  %v1465_v10 = vld [vmem:[#allocation3 + $0xe48] sm:$0xff] }
  0xf3   :  { %v1078_v21 = vld [vmem:[#allocation3 + $0xbb0] sm:$0xff]  ;;  %v4549_v22 = vpack.c.bf16 %v1087_v14, %v1079_v13 }
  0xf4   :  { %4448 = vmatpush1.bf16.msra.mxu0 %v4447_v31  ;;  %v4531_v31 = vpack.c.bf16 %v1006_v25, %v998_v23  ;;  %v1086_v23 = vld [vmem:[#allocation3 + $0xbf0] sm:$0xff]  ;;  %v1401_v25 = vld [vmem:[#allocation3 + $0xc48] sm:$0xff] }
  0xf5   :  { %4480 = vmatpush1.bf16.msra.mxu1 %v4479_v32  ;;  %4450 = vmatprep.subr.bf16.mxu0 %v4449_v33  ;;  %v4501_v32 = vpack.c.bf16 %v1021_v27, %v1013_v26  ;;  %v1012_v33 = vld [vmem:[#allocation3 + $0x9a0] sm:$0xff]  ;;  %v1395_v26 = vld [vmem:[#allocation3 + $0xc18] sm:$0xff]  ;;  %v4551_v29 = vpack.c.bf16 %v1086_v23, %v1078_v21  ;;  %v1466_v21 = vld [vmem:[#allocation3 + $0xe50] sm:$0xff] }
  0xf6   :  { %4482 = vmatprep.subr.bf16.mxu1 %v4481_v37  ;;  %v1022_v37 = vld [vmem:[#allocation3 + $0x9f0] sm:$0xff]  ;;  %v4503_v42 = vpack.c.bf16 %v1020_v34, %v1012_v33  ;;  %v1403_v27 = vld [vmem:[#allocation3 + $0xc58] sm:$0xff]  ;;  %v1481_v23 = vld [vmem:[#allocation3 + $0xec8] sm:$0xff] }
  0xf7   :  { %v1394_v33 = vld [vmem:[#allocation3 + $0xc10] sm:$0xff]  ;;  %v4585_v34 = vpack.c.bf16 %v1403_v27, %v1395_v26 }
  0xf8   :  { %4452 = vmatpush1.bf16.msra.mxu0 %v4451_v43  ;;  %v4535_v43 = vpack.c.bf16 %v1022_v37, %v1014_v35  ;;  %v1402_v35 = vld [vmem:[#allocation3 + $0xc50] sm:$0xff]  ;;  %v1417_v37 = vld [vmem:[#allocation3 + $0xcc8] sm:$0xff] }
  0xf9   :  { %4484 = vmatpush1.bf16.msra.mxu1 %v4483_v44  ;;  %4454 = vmatprep.subr.bf16.mxu0 %v4453_v45  ;;  %v4505_v44 = vpack.c.bf16 %v1037_v39, %v1029_v38  ;;  %v1028_v45 = vld [vmem:[#allocation3 + $0xa20] sm:$0xff]  ;;  %v1411_v38 = vld [vmem:[#allocation3 + $0xc98] sm:$0xff]  ;;  %v4587_v41 = vpack.c.bf16 %v1402_v35, %v1394_v33  ;;  %v1482_v33 = vld [vmem:[#allocation3 + $0xed0] sm:$0xff] }
  0xfa   :  { %4486 = vmatprep.subr.bf16.mxu1 %v4485_v49  ;;  %v1038_v49 = vld [vmem:[#allocation3 + $0xa70] sm:$0xff]  ;;  %v4507_v55 = vpack.c.bf16 %v1036_v46, %v1028_v45  ;;  %v1419_v39 = vld [vmem:[#allocation3 + $0xcd8] sm:$0xff]  ;;  %v1497_v35 = vld [vmem:[#allocation3 + $0xf48] sm:$0xff] }
  0xfb   :  { %v4539_v56 = vpack.c.bf16 %v1038_v49, %v1030_v47  ;;  %v1410_v45 = vld [vmem:[#allocation3 + $0xc90] sm:$0xff]  ;;  %v4589_v46 = vpack.c.bf16 %v1419_v39, %v1411_v38  ;;  %v1433_v49 = vld [vmem:[#allocation3 + $0xd48] sm:$0xff] }
  0xfc   :  { %4456 = vmatpush1.bf16.msra.mxu0 %v4455_v57  ;;  %v4509_v57 = vpack.c.bf16 %v1053_v52, %v1045_v51  ;;  %v1418_v47 = vld [vmem:[#allocation3 + $0xcd0] sm:$0xff]  ;;  %v1427_v51 = vld [vmem:[#allocation3 + $0xd18] sm:$0xff] }
  0xfd   :  { %4488 = vmatpush1.bf16.msra.mxu1 %v4487_v50  ;;  %4490 = vmatprep.subr.bf16.mxu0 %v4489_v58  ;;  %v1044_v50 = vld [vmem:[#allocation3 + $0xaa0] sm:$0xff]  ;;  %v1435_v52 = vld [vmem:[#allocation3 + $0xd58] sm:$0xff]  ;;  %v4591_v54 = vpack.c.bf16 %v1418_v47, %v1410_v45  ;;  %v1498_v45 = vld [vmem:[#allocation3 + $0xf50] sm:$0xff] }
  0xfe   :  { %4522 = vmatprep.subr.bf16.mxu1 %v4521_v62  ;;  %v1052_v58 = vld [vmem:[#allocation3 + $0xae0] sm:$0xff]  ;;  %v1061_v62 = vld [vmem:[#allocation3 + $0xb28] sm:$0xff] }
  0xff   :  { %1153 = vmatmul.mubr.f32.vlgmr.msra.gmra.mrb[8].mxu0 %v6026_v15  ;;  %v4511_v3 = vpack.c.bf16 %v1052_v58, %v1044_v50  ;;  %v1426_v50 = vld [vmem:[#allocation3 + $0xd10] sm:$0xff]  ;;  %v4593_v58 = vpack.c.bf16 %v1435_v52, %v1427_v51  ;;  %v1513_v47 = vld [vmem:[#allocation3 + $0xfc8] sm:$0xff] }
 0x100   :  { %1224 = vmatmul.mubr.f32.vlgmr.msra.gmra.mrb[8].mxu1 %v6026_v15  ;;  %4492 = vmatpush1.bf16.msra.mxu0 %v4491_v5  ;;  %v4513_v5 = vpack.c.bf16 %v1069_v63, %v1061_v62  ;;  %v1443_v62 = vld [vmem:[#allocation3 + $0xd98] sm:$0xff]  ;;  %v4595_v2 = vpack.c.bf16 %v1434_v59, %v1426_v50  ;;  %v1514_v50 = vld [vmem:[#allocation3 + $0xfd0] sm:$0xff]  ;;  %v1405_v59 = vld [vmem:[#allocation3 + $0xc68] sm:$0xff] }
 0x101   :  { %4524 = vmatpush1.bf16.msra.mxu1 %v4523_v8  ;;  %4494 = vmatprep.subr.bf16.mxu0 %v4493_v6  ;;  %v1060_v8 = vld [vmem:[#allocation3 + $0xb20] sm:$0xff]  ;;  %v1451_v63 = vld [vmem:[#allocation3 + $0xdd8] sm:$0xff] }
 0x102   :  { %4526 = vmatprep.subr.bf16.mxu1 %v4525_v11  ;;  %1294 = vmatprep.mubr.f32.mxu0 %v5878_v1  ;;  %v1068_v6 = vld [vmem:[#allocation3 + $0xb60] sm:$0xff]  ;;  %v1077_v11 = vld [vmem:[#allocation3 + $0xba8] sm:$0xff] }
 0x103   :  { %1365 = vmatprep.mubr.f32.mxu1 %v5878_v1  ;;  %v4515_v16 = vpack.c.bf16 %v1068_v6, %v1060_v8  ;;  %v1442_v8 = vld [vmem:[#allocation3 + $0xd90] sm:$0xff]  ;;  %v4597_v6 = vpack.c.bf16 %v1451_v63, %v1443_v62 }
 0x104   :  { %4496 = vmatpush1.bf16.msra.mxu0 %v4495_v18  ;;  %v4517_v18 = vpack.c.bf16 %v1085_v12, %v1077_v11  ;;  %v1459_v11 = vld [vmem:[#allocation3 + $0xe18] sm:$0xff]  ;;  %v4599_v14 = vpack.c.bf16 %v1450_v7, %v1442_v8  ;;  %v1406_v8 = vld [vmem:[#allocation3 + $0xc70] sm:$0xff]  ;;  %v1421_v7 = vld [vmem:[#allocation3 + $0xce8] sm:$0xff] }
 0x105   :  { %4528 = vmatpush1.bf16.msra.mxu1 %v4527_v19  ;;  %4498 = vmatprep.subr.bf16.mxu0 %v4497_v20  ;;  %v1076_v19 = vld [vmem:[#allocation3 + $0xba0] sm:$0xff]  ;;  %v1467_v12 = vld [vmem:[#allocation3 + $0xe58] sm:$0xff] }
 0x106   :  { %4530 = vmatprep.subr.bf16.mxu1 %v4529_v24  ;;  %v1084_v20 = vld [vmem:[#allocation3 + $0xbe0] sm:$0xff]  ;;  %v1393_v24 = vld [vmem:[#allocation3 + $0xc08] sm:$0xff] }
 0x107   :  { %v4519_v28 = vpack.c.bf16 %v1084_v20, %v1076_v19  ;;  %v1458_v19 = vld [vmem:[#allocation3 + $0xe10] sm:$0xff]  ;;  %v4601_v20 = vpack.c.bf16 %v1467_v12, %v1459_v11 }
 0x108   :  { %4500 = vmatpush1.bf16.msra.mxu0 %v4499_v30  ;;  %v4553_v30 = vpack.c.bf16 %v1401_v25, %v1393_v24  ;;  %v1475_v24 = vld [vmem:[#allocation3 + $0xe98] sm:$0xff]  ;;  %v4603_v27 = vpack.c.bf16 %v1466_v21, %v1458_v19  ;;  %v1422_v19 = vld [vmem:[#allocation3 + $0xcf0] sm:$0xff]  ;;  %v1437_v21 = vld [vmem:[#allocation3 + $0xd68] sm:$0xff] }
 0x109   :  { %4532 = vmatpush1.bf16.msra.mxu1 %v4531_v31  ;;  %4502 = vmatprep.subr.bf16.mxu0 %v4501_v32  ;;  %v1392_v31 = vld [vmem:[#allocation3 + $0xc00] sm:$0xff]  ;;  %v1483_v25 = vld [vmem:[#allocation3 + $0xed8] sm:$0xff] }
 0x10a   :  { %4534 = vmatprep.subr.bf16.mxu1 %v4533_v36  ;;  %v1400_v32 = vld [vmem:[#allocation3 + $0xc40] sm:$0xff]  ;;  %v1409_v36 = vld [vmem:[#allocation3 + $0xc88] sm:$0xff] }
 0x10b   :  { %v4555_v40 = vpack.c.bf16 %v1400_v32, %v1392_v31  ;;  %v1474_v31 = vld [vmem:[#allocation3 + $0xe90] sm:$0xff]  ;;  %v4605_v32 = vpack.c.bf16 %v1483_v25, %v1475_v24 }
 0x10c   :  { %4504 = vmatpush1.bf16.msra.mxu0 %v4503_v42  ;;  %v4557_v42 = vpack.c.bf16 %v1417_v37, %v1409_v36  ;;  %v1491_v36 = vld [vmem:[#allocation3 + $0xf18] sm:$0xff]  ;;  %v4607_v39 = vpack.c.bf16 %v1482_v33, %v1474_v31  ;;  %v1438_v31 = vld [vmem:[#allocation3 + $0xd70] sm:$0xff]  ;;  %v1453_v33 = vld [vmem:[#allocation3 + $0xde8] sm:$0xff] }
 0x10d   :  { %4536 = vmatpush1.bf16.msra.mxu1 %v4535_v43  ;;  %4506 = vmatprep.subr.bf16.mxu0 %v4505_v44  ;;  %v1408_v43 = vld [vmem:[#allocation3 + $0xc80] sm:$0xff]  ;;  %v1499_v37 = vld [vmem:[#allocation3 + $0xf58] sm:$0xff] }
 0x10e   :  { %4538 = vmatprep.subr.bf16.mxu1 %v4537_v48  ;;  %v1416_v44 = vld [vmem:[#allocation3 + $0xcc0] sm:$0xff]  ;;  %v1425_v48 = vld [vmem:[#allocation3 + $0xd08] sm:$0xff] }
 0x10f   :  { %v4559_v53 = vpack.c.bf16 %v1416_v44, %v1408_v43  ;;  %v1490_v43 = vld [vmem:[#allocation3 + $0xf10] sm:$0xff]  ;;  %v4609_v44 = vpack.c.bf16 %v1499_v37, %v1491_v36 }
 0x110   :  { %4508 = vmatpush1.bf16.msra.mxu0 %v4507_v55  ;;  %v4561_v55 = vpack.c.bf16 %v1433_v49, %v1425_v48  ;;  %v1507_v48 = vld [vmem:[#allocation3 + $0xf98] sm:$0xff]  ;;  %v4611_v52 = vpack.c.bf16 %v1498_v45, %v1490_v43  ;;  %v1454_v43 = vld [vmem:[#allocation3 + $0xdf0] sm:$0xff]  ;;  %v1469_v45 = vld [vmem:[#allocation3 + $0xe68] sm:$0xff] }
 0x111   :  { %4540 = vmatpush1.bf16.msra.mxu1 %v4539_v56  ;;  %4510 = vmatprep.subr.bf16.mxu0 %v4509_v57  ;;  %v1424_v56 = vld [vmem:[#allocation3 + $0xd00] sm:$0xff]  ;;  %v1515_v49 = vld [vmem:[#allocation3 + $0xfd8] sm:$0xff] }
 0x112   :  { %4542 = vmatprep.subr.bf16.mxu1 %v4541_v60  ;;  %v1432_v57 = vld [vmem:[#allocation3 + $0xd40] sm:$0xff]  ;;  %v1441_v60 = vld [vmem:[#allocation3 + $0xd88] sm:$0xff] }
 0x113   :  { %v4563_v0 = vpack.c.bf16 %v1432_v57, %v1424_v56  ;;  %v1506_v56 = vld [vmem:[#allocation3 + $0xf90] sm:$0xff]  ;;  %v4613_v57 = vpack.c.bf16 %v1515_v49, %v1507_v48 }
 0x114   :  { %4512 = vmatpush1.bf16.msra.mxu0 %v4511_v3  ;;  %v4565_v3 = vpack.c.bf16 %v1449_v61, %v1441_v60  ;;  %v1399_v60 = vld [vmem:[#allocation3 + $0xc38] sm:$0xff]  ;;  %v4615_v63 = vpack.c.bf16 %v1514_v50, %v1506_v56  ;;  %v1477_v56 = vld [vmem:[#allocation3 + $0xea8] sm:$0xff] }
 0x115   :  { %4544 = vmatpush1.bf16.msra.mxu1 %v4543_v4  ;;  %4514 = vmatprep.subr.bf16.mxu0 %v4513_v5  ;;  %v1440_v4 = vld [vmem:[#allocation3 + $0xd80] sm:$0xff]  ;;  %v1407_v61 = vld [vmem:[#allocation3 + $0xc78] sm:$0xff] }
 0x116   :  { %4546 = vmatprep.subr.bf16.mxu1 %v4545_v9  ;;  %v1448_v5 = vld [vmem:[#allocation3 + $0xdc0] sm:$0xff]  ;;  %v1457_v9 = vld [vmem:[#allocation3 + $0xe08] sm:$0xff]  ;;  %v1479_v50 = vld [vmem:[#allocation3 + $0xeb8] sm:$0xff] }
 0x117   :  { %v4567_v13 = vpack.c.bf16 %v1448_v5, %v1440_v4  ;;  %v1398_v4 = vld [vmem:[#allocation3 + $0xc30] sm:$0xff]  ;;  %v4649_v5 = vpack.c.bf16 %v1407_v61, %v1399_v60 }
 0x118   :  { %4516 = vmatpush1.bf16.msra.mxu0 %v4515_v16  ;;  %v4569_v16 = vpack.c.bf16 %v1465_v10, %v1457_v9  ;;  %v1415_v9 = vld [vmem:[#allocation3 + $0xcb8] sm:$0xff]  ;;  %v4651_v12 = vpack.c.bf16 %v1406_v8, %v1398_v4  ;;  %v1493_v4 = vld [vmem:[#allocation3 + $0xf28] sm:$0xff] }
 0x119   :  { %4548 = vmatpush1.bf16.msra.mxu1 %v4547_v17  ;;  %4518 = vmatprep.subr.bf16.mxu0 %v4517_v18  ;;  %v1456_v17 = vld [vmem:[#allocation3 + $0xe00] sm:$0xff]  ;;  %v1423_v10 = vld [vmem:[#allocation3 + $0xcf8] sm:$0xff] }
 0x11a   :  { %4550 = vmatprep.subr.bf16.mxu1 %v4549_v22  ;;  %v1464_v18 = vld [vmem:[#allocation3 + $0xe40] sm:$0xff]  ;;  %v1473_v22 = vld [vmem:[#allocation3 + $0xe88] sm:$0xff]  ;;  %v1495_v8 = vld [vmem:[#allocation3 + $0xf38] sm:$0xff] }
 0x11b   :  { %v4571_v26 = vpack.c.bf16 %v1464_v18, %v1456_v17  ;;  %v1414_v17 = vld [vmem:[#allocation3 + $0xcb0] sm:$0xff]  ;;  %v4653_v18 = vpack.c.bf16 %v1423_v10, %v1415_v9 }
 0x11c   :  { %4520 = vmatpush1.bf16.msra.mxu0 %v4519_v28  ;;  %v4573_v28 = vpack.c.bf16 %v1481_v23, %v1473_v22  ;;  %v1431_v22 = vld [vmem:[#allocation3 + $0xd38] sm:$0xff]  ;;  %v4655_v25 = vpack.c.bf16 %v1422_v19, %v1414_v17  ;;  %v1502_v17 = vld [vmem:[#allocation3 + $0xf70] sm:$0xff]  ;;  %v1517_v19 = vld [vmem:[#allocation3 + $0xfe8] sm:$0xff] }
 0x11d   :  { %4552 = vmatpush1.bf16.msra.mxu1 %v4551_v29  ;;  %4554 = vmatprep.subr.bf16.mxu0 %v4553_v30  ;;  %v1472_v29 = vld [vmem:[#allocation3 + $0xe80] sm:$0xff]  ;;  %v1439_v23 = vld [vmem:[#allocation3 + $0xd78] sm:$0xff] }
 0x11e   :  { %4586 = vmatprep.subr.bf16.mxu1 %v4585_v34  ;;  %v1480_v30 = vld [vmem:[#allocation3 + $0xec0] sm:$0xff]  ;;  %v1489_v34 = vld [vmem:[#allocation3 + $0xf08] sm:$0xff] }
 0x11f   :  { %1295 = vmatmul.mubr.f32.vlgmr.msra.gmra.mrb[10].mxu0 %v6026_v15  ;;  %v4575_v38 = vpack.c.bf16 %v1480_v30, %v1472_v29  ;;  %v1430_v29 = vld [vmem:[#allocation3 + $0xd30] sm:$0xff]  ;;  %v4657_v30 = vpack.c.bf16 %v1439_v23, %v1431_v22  ;;  %v1519_v22 = vld [vmem:[#allocation3 + $0xff8] sm:$0xff] }
 0x120   :  { %1366 = vmatmul.mubr.f32.vlgmr.msra.gmra.mrb[10].mxu1 %v6026_v15  ;;  %4556 = vmatpush1.bf16.msra.mxu0 %v4555_v40  ;;  %v4577_v40 = vpack.c.bf16 %v1497_v35, %v1489_v34  ;;  %v1447_v34 = vld [vmem:[#allocation3 + $0xdb8] sm:$0xff]  ;;  %v4659_v37 = vpack.c.bf16 %v1438_v31, %v1430_v29  ;;  %v1516_v29 = vld [vmem:[#allocation3 + $0xfe0] sm:$0xff]  ;;  %v1510_v31 = vld [vmem:[#allocation3 + $0xfb0] sm:$0xff] }
 0x121   :  { %4588 = vmatpush1.bf16.msra.mxu1 %v4587_v41  ;;  %4558 = vmatprep.subr.bf16.mxu0 %v4557_v42  ;;  %v1488_v41 = vld [vmem:[#allocation3 + $0xf00] sm:$0xff]  ;;  %v1455_v35 = vld [vmem:[#allocation3 + $0xdf8] sm:$0xff] }
 0x122   :  { %4590 = vmatprep.subr.bf16.mxu1 %v4589_v46  ;;  %1584 = vmatprep.mubr.f32.mxu0 %v5878_v1  ;;  %v1496_v42 = vld [vmem:[#allocation3 + $0xf40] sm:$0xff]  ;;  %v1505_v46 = vld [vmem:[#allocation3 + $0xf88] sm:$0xff] }
 0x123   :  { %1655 = vmatprep.mubr.f32.mxu1 %v5878_v1  ;;  %v4579_v51 = vpack.c.bf16 %v1496_v42, %v1488_v41  ;;  %v1446_v41 = vld [vmem:[#allocation3 + $0xdb0] sm:$0xff]  ;;  %v4661_v42 = vpack.c.bf16 %v1455_v35, %v1447_v34  ;;  %v1885_v35 = vld [vmem:[#allocation7 + $0x18] sm:$0xff] }
 0x124   :  { %4560 = vmatpush1.bf16.msra.mxu0 %v4559_v53  ;;  %v4581_v53 = vpack.c.bf16 %v1513_v47, %v1505_v46  ;;  %v1463_v46 = vld [vmem:[#allocation3 + $0xe38] sm:$0xff]  ;;  %v1891_v34 = vld [vmem:[#allocation7 + $0x48] sm:$0xff] }
 0x125   :  { %4592 = vmatpush1.bf16.msra.mxu1 %v4591_v54  ;;  %4562 = vmatprep.subr.bf16.mxu0 %v4561_v55  ;;  %v1504_v54 = vld [vmem:[#allocation3 + $0xf80] sm:$0xff]  ;;  %v1471_v47 = vld [vmem:[#allocation3 + $0xe78] sm:$0xff] }
 0x126   :  { %4594 = vmatprep.subr.bf16.mxu1 %v4593_v58  ;;  %v1512_v55 = vld [vmem:[#allocation3 + $0xfc0] sm:$0xff]  ;;  %v1397_v58 = vld [vmem:[#allocation3 + $0xc28] sm:$0xff] }
 0x127   :  { %v4583_v62 = vpack.c.bf16 %v1512_v55, %v1504_v54  ;;  %v4665_v54 = vpack.c.bf16 %v1471_v47, %v1463_v46  ;;  %v1470_v55 = vld [vmem:[#allocation3 + $0xe70] sm:$0xff]  ;;  %v1901_v47 = vld [vmem:[#allocation7 + $0x98] sm:$0xff] }
 0x128   :  { %4564 = vmatpush1.bf16.msra.mxu0 %v4563_v0  ;;  %v4617_v0 = vpack.c.bf16 %v1405_v59, %v1397_v58  ;;  %v1487_v58 = vld [vmem:[#allocation3 + $0xef8] sm:$0xff]  ;;  %v1907_v46 = vld [vmem:[#allocation7 + $0xc8] sm:$0xff] }
 0x129   :  { %4596 = vmatpush1.bf16.msra.mxu1 %v4595_v2  ;;  %4566 = vmatprep.subr.bf16.mxu0 %v4565_v3  ;;  %v1396_v2 = vld [vmem:[#allocation3 + $0xc20] sm:$0xff] }
 0x12a   :  { %4598 = vmatprep.subr.bf16.mxu1 %v4597_v6  ;;  %v1404_v3 = vld [vmem:[#allocation3 + $0xc60] sm:$0xff]  ;;  %v1413_v6 = vld [vmem:[#allocation3 + $0xca8] sm:$0xff] }
 0x12b   :  { %v4619_v11 = vpack.c.bf16 %v1404_v3, %v1396_v2  ;;  %v4669_v2 = vpack.c.bf16 %v1487_v58, %v1479_v50  ;;  %v1486_v3 = vld [vmem:[#allocation3 + $0xef0] sm:$0xff]  ;;  %v1917_v58 = vld [vmem:[#allocation7 + $0x118] sm:$0xff] }
 0x12c   :  { %4568 = vmatpush1.bf16.msra.mxu0 %v4567_v13  ;;  %v4621_v13 = vpack.c.bf16 %v1421_v7, %v1413_v6  ;;  %v1503_v6 = vld [vmem:[#allocation3 + $0xf78] sm:$0xff]  ;;  %v1923_v50 = vld [vmem:[#allocation7 + $0x148] sm:$0xff] }
 0x12d   :  { %4600 = vmatpush1.bf16.msra.mxu1 %v4599_v14  ;;  %4570 = vmatprep.subr.bf16.mxu0 %v4569_v16  ;;  %v1412_v14 = vld [vmem:[#allocation3 + $0xca0] sm:$0xff] }
 0x12e   :  { %4602 = vmatprep.subr.bf16.mxu1 %v4601_v20  ;;  %v1420_v16 = vld [vmem:[#allocation3 + $0xce0] sm:$0xff]  ;;  %v1429_v20 = vld [vmem:[#allocation3 + $0xd28] sm:$0xff] }
 0x12f   :  { %v4623_v24 = vpack.c.bf16 %v1420_v16, %v1412_v14  ;;  %v4673_v16 = vpack.c.bf16 %v1503_v6, %v1495_v8  ;;  %v1939_v8 = vld [vmem:[#allocation7 + $0x1c8] sm:$0xff]  ;;  %v1933_v6 = vld [vmem:[#allocation7 + $0x198] sm:$0xff] }
 0x130   :  { %4572 = vmatpush1.bf16.msra.mxu0 %v4571_v26  ;;  %v4625_v26 = vpack.c.bf16 %v1437_v21, %v1429_v20  ;;  %v1511_v21 = vld [vmem:[#allocation3 + $0xfb8] sm:$0xff] }
 0x131   :  { %4604 = vmatpush1.bf16.msra.mxu1 %v4603_v27  ;;  %4574 = vmatprep.subr.bf16.mxu0 %v4573_v28  ;;  %v1428_v27 = vld [vmem:[#allocation3 + $0xd20] sm:$0xff] }
 0x132   :  { %4606 = vmatprep.subr.bf16.mxu1 %v4605_v32  ;;  %v1436_v28 = vld [vmem:[#allocation3 + $0xd60] sm:$0xff]  ;;  %v1445_v32 = vld [vmem:[#allocation3 + $0xda8] sm:$0xff] }
 0x133   :  { %v4627_v36 = vpack.c.bf16 %v1436_v28, %v1428_v27  ;;  %v1508_v28 = vld [vmem:[#allocation3 + $0xfa0] sm:$0xff] }
 0x134   :  { %4576 = vmatpush1.bf16.msra.mxu0 %v4575_v38  ;;  %v4629_v38 = vpack.c.bf16 %v1453_v33, %v1445_v32  ;;  %v1518_v32 = vld [vmem:[#allocation3 + $0xff0] sm:$0xff] }
 0x135   :  { %4608 = vmatpush1.bf16.msra.mxu1 %v4607_v39  ;;  %4578 = vmatprep.subr.bf16.mxu0 %v4577_v40  ;;  %v1444_v39 = vld [vmem:[#allocation3 + $0xda0] sm:$0xff]  ;;  %v1883_v33 = vld [vmem:[#allocation7 + $0x8] sm:$0xff] }
 0x136   :  { %4610 = vmatprep.subr.bf16.mxu1 %v4609_v44  ;;  %v1452_v40 = vld [vmem:[#allocation3 + $0xde0] sm:$0xff]  ;;  %v1461_v44 = vld [vmem:[#allocation3 + $0xe28] sm:$0xff] }
 0x137   :  { %v4631_v48 = vpack.c.bf16 %v1452_v40, %v1444_v39  ;;  %v4633_v49 = vpack.c.bf16 %v1469_v45, %v1461_v44  ;;  %v4681_v39 = vpack.c.bf16 %v1891_v34, %v1883_v33  ;;  %v1882_v40 = vld [vmem:[#allocation7] sm:$0xff]  ;;  %v1892_v44 = vld [vmem:[#allocation7 + $0x50] sm:$0xff]  ;;  %v1899_v45 = vld [vmem:[#allocation7 + $0x88] sm:$0xff] }
 0x138   :  { %4580 = vmatpush1.bf16.msra.mxu0 %v4579_v51  ;;  %v1460_v51 = vld [vmem:[#allocation3 + $0xe20] sm:$0xff]  ;;  %v1963_v33 = vld [vmem:[#allocation7 + $0x288] sm:$0xff] }
 0x139   :  { %4612 = vmatpush1.bf16.msra.mxu1 %v4611_v52  ;;  %4582 = vmatprep.subr.bf16.mxu0 %v4581_v53  ;;  %v1468_v52 = vld [vmem:[#allocation3 + $0xe60] sm:$0xff]  ;;  %v1462_v53 = vld [vmem:[#allocation3 + $0xe30] sm:$0xff] }
 0x13a   :  { %4614 = vmatprep.subr.bf16.mxu1 %v4613_v57  ;;  %v1485_v57 = vld [vmem:[#allocation3 + $0xee8] sm:$0xff]  ;;  %v4635_v59 = vpack.c.bf16 %v1468_v52, %v1460_v51  ;;  %v4667_v60 = vpack.c.bf16 %v1470_v55, %v1462_v53  ;;  %v4685_v51 = vpack.c.bf16 %v1907_v46, %v1899_v45  ;;  %v1971_v34 = vld [vmem:[#allocation7 + $0x2c8] sm:$0xff] }
 0x13b   :  { %v4637_v61 = vpack.c.bf16 %v1485_v57, %v1477_v56  ;;  %v1898_v52 = vld [vmem:[#allocation7 + $0x80] sm:$0xff]  ;;  %v1908_v56 = vld [vmem:[#allocation7 + $0xd0] sm:$0xff]  ;;  %v1915_v57 = vld [vmem:[#allocation7 + $0x108] sm:$0xff] }
 0x13c   :  { %4584 = vmatpush1.bf16.msra.mxu0 %v4583_v62  ;;  %v1476_v62 = vld [vmem:[#allocation3 + $0xea0] sm:$0xff]  ;;  %v1906_v53 = vld [vmem:[#allocation7 + $0xc0] sm:$0xff] }
 0x13d   :  { %4616 = vmatpush1.bf16.msra.mxu1 %v4615_v63  ;;  %4618 = vmatprep.subr.bf16.mxu0 %v4617_v0  ;;  %v1484_v63 = vld [vmem:[#allocation3 + $0xee0] sm:$0xff]  ;;  %v1478_v0 = vld [vmem:[#allocation3 + $0xeb0] sm:$0xff] }
 0x13e   :  { %4650 = vmatprep.subr.bf16.mxu1 %v4649_v5  ;;  %v1501_v5 = vld [vmem:[#allocation3 + $0xf68] sm:$0xff]  ;;  %v4639_v7 = vpack.c.bf16 %v1484_v63, %v1476_v62  ;;  %v4671_v9 = vpack.c.bf16 %v1486_v3, %v1478_v0  ;;  %v4689_v62 = vpack.c.bf16 %v1923_v50, %v1915_v57 }
 0x13f   :  { %1585 = vmatmul.mubr.f32.vlgmr.msra.gmra.mrb[12].mxu0 %v6026_v15  ;;  %v4641_v10 = vpack.c.bf16 %v1501_v5, %v1493_v4  ;;  %v1914_v63 = vld [vmem:[#allocation7 + $0x100] sm:$0xff]  ;;  %v1924_v4 = vld [vmem:[#allocation7 + $0x150] sm:$0xff]  ;;  %v1931_v5 = vld [vmem:[#allocation7 + $0x188] sm:$0xff] }
 0x140   :  { %1656 = vmatmul.mubr.f32.vlgmr.msra.gmra.mrb[12].mxu1 %v6026_v15  ;;  %4620 = vmatpush1.bf16.msra.mxu0 %v4619_v11  ;;  %v1492_v11 = vld [vmem:[#allocation3 + $0xf20] sm:$0xff]  ;;  %v1922_v0 = vld [vmem:[#allocation7 + $0x140] sm:$0xff] }
 0x141   :  { %4652 = vmatpush1.bf16.msra.mxu1 %v4651_v12  ;;  %4622 = vmatprep.subr.bf16.mxu0 %v4621_v13  ;;  %v1500_v12 = vld [vmem:[#allocation3 + $0xf60] sm:$0xff]  ;;  %v1494_v13 = vld [vmem:[#allocation3 + $0xf30] sm:$0xff] }
 0x142   :  { %4654 = vmatprep.subr.bf16.mxu1 %v4653_v18  ;;  %1726 = vmatprep.mubr.f32.mxu0 %v5878_v1  ;;  %v1509_v18 = vld [vmem:[#allocation3 + $0xfa8] sm:$0xff] }
 0x143   :  { %1797 = vmatprep.mubr.f32.mxu1 %v5878_v1  ;;  %v4663_v1 = vpack.c.bf16 %v1454_v43, %v1446_v41  ;;  %v4645_v27 = vpack.c.bf16 %v1517_v19, %v1509_v18  ;;  %v1890_v41 = vld [vmem:[#allocation7 + $0x40] sm:$0xff]  ;;  %v1947_v18 = vld [vmem:[#allocation7 + $0x208] sm:$0xff] }
 0x144   :  { %4624 = vmatpush1.bf16.msra.mxu0 %v4623_v24  ;;  %v4643_v24 = vpack.c.bf16 %v1500_v12, %v1492_v11  ;;  %v1930_v11 = vld [vmem:[#allocation7 + $0x180] sm:$0xff]  ;;  %v1955_v19 = vld [vmem:[#allocation7 + $0x248] sm:$0xff] }
 0x145   :  { %4656 = vmatpush1.bf16.msra.mxu1 %v4655_v25  ;;  %4626 = vmatprep.subr.bf16.mxu0 %v4625_v26  ;;  %v4675_v26 = vpack.c.bf16 %v1502_v17, %v1494_v13  ;;  %v1938_v12 = vld [vmem:[#allocation7 + $0x1c0] sm:$0xff]  ;;  %v1932_v13 = vld [vmem:[#allocation7 + $0x190] sm:$0xff] }
 0x146   :  { %4658 = vmatprep.subr.bf16.mxu1 %v4657_v30  ;;  %v4677_v30 = vpack.c.bf16 %v1519_v22, %v1511_v21  ;;  %v1940_v17 = vld [vmem:[#allocation7 + $0x1d0] sm:$0xff]  ;;  %v1949_v21 = vld [vmem:[#allocation7 + $0x218] sm:$0xff] }
 0x147   :  { %v1957_v22 = vld [vmem:[#allocation7 + $0x258] sm:$0xff] }
 0x148   :  { %4628 = vmatpush1.bf16.msra.mxu0 %v4627_v36  ;;  %v4647_v36 = vpack.c.bf16 %v1516_v29, %v1508_v28  ;;  %v1946_v28 = vld [vmem:[#allocation7 + $0x200] sm:$0xff] }
 0x149   :  { %4660 = vmatpush1.bf16.msra.mxu1 %v4659_v37  ;;  %4630 = vmatprep.subr.bf16.mxu0 %v4629_v38  ;;  %v1893_v37 = vld [vmem:[#allocation7 + $0x58] sm:$0xff]  ;;  %v4679_v38 = vpack.c.bf16 %v1518_v32, %v1510_v31  ;;  %v1954_v29 = vld [vmem:[#allocation7 + $0x240] sm:$0xff]  ;;  %v4953_v31 = vpack.c.bf16 %v1957_v22, %v1949_v21  ;;  %v1956_v32 = vld [vmem:[#allocation7 + $0x250] sm:$0xff] }
 0x14a   :  { %4662 = vmatprep.subr.bf16.mxu1 %v4661_v42  ;;  %v1884_v42 = vld [vmem:[#allocation7 + $0x10] sm:$0xff]  ;;  %v4937_v43 = vpack.c.bf16 %v1893_v37, %v1885_v35  ;;  %v1965_v35 = vld [vmem:[#allocation7 + $0x298] sm:$0xff]  ;;  %v4699_v37 = vpack.c.bf16 %v1954_v29, %v1946_v28 }
 0x14b   :  { %v2012_v21 = vld [vmem:[#allocation7 + $0x410] sm:$0xff]  ;;  %v2029_v28 = vld [vmem:[#allocation7 + $0x498] sm:$0xff] }
 0x14c   :  { %4632 = vmatpush1.bf16.msra.mxu0 %v4631_v48  ;;  %v1909_v48 = vld [vmem:[#allocation7 + $0xd8] sm:$0xff]  ;;  %v2020_v22 = vld [vmem:[#allocation7 + $0x450] sm:$0xff] }
 0x14d   :  { %4664 = vmatpush1.bf16.msra.mxu1 %v4663_v1  ;;  %4634 = vmatprep.subr.bf16.mxu0 %v4633_v49  ;;  %v4683_v1 = vpack.c.bf16 %v1890_v41, %v1882_v40  ;;  %v4939_v49 = vpack.c.bf16 %v1892_v44, %v1884_v42  ;;  %v4941_v55 = vpack.c.bf16 %v1909_v48, %v1901_v47  ;;  %v1962_v40 = vld [vmem:[#allocation7 + $0x280] sm:$0xff]  ;;  %v1972_v44 = vld [vmem:[#allocation7 + $0x2d0] sm:$0xff]  ;;  %v1979_v48 = vld [vmem:[#allocation7 + $0x308] sm:$0xff] }
 0x14e   :  { %4666 = vmatprep.subr.bf16.mxu1 %v4665_v54  ;;  %v1900_v54 = vld [vmem:[#allocation7 + $0x90] sm:$0xff]  ;;  %v1970_v41 = vld [vmem:[#allocation7 + $0x2c0] sm:$0xff]  ;;  %v2037_v29 = vld [vmem:[#allocation7 + $0x4d8] sm:$0xff] }
 0x14f   :  { %v4703_v45 = vpack.c.bf16 %v1970_v41, %v1962_v40  ;;  %v2053_v40 = vld [vmem:[#allocation7 + $0x558] sm:$0xff] }
 0x150   :  { %4636 = vmatpush1.bf16.msra.mxu0 %v4635_v59  ;;  %v1925_v59 = vld [vmem:[#allocation7 + $0x158] sm:$0xff] }
 0x151   :  { %4668 = vmatpush1.bf16.msra.mxu1 %v4667_v60  ;;  %4638 = vmatprep.subr.bf16.mxu0 %v4637_v61  ;;  %v4687_v60 = vpack.c.bf16 %v1906_v53, %v1898_v52  ;;  %v4943_v61 = vpack.c.bf16 %v1908_v56, %v1900_v54  ;;  %v4945_v3 = vpack.c.bf16 %v1925_v59, %v1917_v58  ;;  %v1989_v54 = vld [vmem:[#allocation7 + $0x358] sm:$0xff]  ;;  %v1986_v56 = vld [vmem:[#allocation7 + $0x340] sm:$0xff]  ;;  %v1980_v59 = vld [vmem:[#allocation7 + $0x310] sm:$0xff] }
 0x152   :  { %v6040_v14 = vpop.f32.mrb[0].mxu0  ;;  %4670 = vmatprep.subr.bf16.mxu1 %v4669_v2  ;;  %v1916_v2 = vld [vmem:[#allocation7 + $0x110] sm:$0xff] }
 0x153   :  { %v6042_v20 = vpop.f32.mrb[1].mxu0  ;;  %v6044_v23 = vpop.f32.mrb[0].mxu1 }
 0x154   :  { %4640 = vmatpush1.bf16.msra.mxu0 %v4639_v7  ;;  %v6046_v25 = vpop.f32.mrb[1].mxu1  ;;  %v1941_v7 = vld [vmem:[#allocation7 + $0x1d8] sm:$0xff] }
 0x155   :  { %4672 = vmatpush1.bf16.msra.mxu1 %v4671_v9  ;;  %4642 = vmatprep.subr.bf16.mxu0 %v4641_v10  ;;  %v4691_v9 = vpack.c.bf16 %v1922_v0, %v1914_v63  ;;  %v4693_v10 = vpack.c.bf16 %v1939_v8, %v1931_v5  ;;  %v2003_v63 = vld [vmem:[#allocation7 + $0x3c8] sm:$0xff]  ;;  %v1997_v0 = vld [vmem:[#allocation7 + $0x398] sm:$0xff]  ;;  %v2002_v5 = vld [vmem:[#allocation7 + $0x3c0] sm:$0xff] }
 0x156   :  { %4674 = vmatprep.subr.bf16.mxu1 %v4673_v16  ;;  %v4949_v16 = vpack.c.bf16 %v1941_v7, %v1933_v6  ;;  %v1996_v7 = vld [vmem:[#allocation7 + $0x390] sm:$0xff] }
 0x158   :  { %4644 = vmatpush1.bf16.msra.mxu0 %v4643_v24  ;;  %v4695_v24 = vpack.c.bf16 %v1938_v12, %v1930_v11  ;;  %v2019_v11 = vld [vmem:[#allocation7 + $0x448] sm:$0xff]  ;;  %v2013_v12 = vld [vmem:[#allocation7 + $0x418] sm:$0xff] }
 0x159   :  { %4676 = vmatpush1.bf16.msra.mxu1 %v4675_v26  ;;  %4646 = vmatprep.subr.bf16.mxu0 %v4645_v27  ;;  %v4951_v26 = vpack.c.bf16 %v1940_v17, %v1932_v13  ;;  %v4697_v27 = vpack.c.bf16 %v1955_v19, %v1947_v18  ;;  %v2021_v13 = vld [vmem:[#allocation7 + $0x458] sm:$0xff]  ;;  %v2010_v18 = vld [vmem:[#allocation7 + $0x400] sm:$0xff] }
 0x15a   :  { %4678 = vmatprep.subr.bf16.mxu1 %v4677_v30  ;;  %v1948_v30 = vld [vmem:[#allocation7 + $0x210] sm:$0xff]  ;;  %v4969_v17 = vpack.c.bf16 %v2021_v13, %v2013_v12  ;;  %v2018_v19 = vld [vmem:[#allocation7 + $0x440] sm:$0xff]  ;;  %v2091_v12 = vld [vmem:[#allocation7 + $0x688] sm:$0xff] }
 0x15b   :  { %v2099_v13 = vld [vmem:[#allocation7 + $0x6c8] sm:$0xff] }
 0x15c   :  { %4648 = vmatpush1.bf16.msra.mxu0 %v4647_v36  ;;  %v1973_v36 = vld [vmem:[#allocation7 + $0x2d8] sm:$0xff] }
 0x15d   :  { %4680 = vmatpush1.bf16.msra.mxu1 %v4679_v38  ;;  %4682 = vmatprep.subr.bf16.mxu0 %v4681_v39  ;;  %v4955_v38 = vpack.c.bf16 %v1956_v32, %v1948_v30  ;;  %v4701_v39 = vpack.c.bf16 %v1971_v34, %v1963_v33  ;;  %v4957_v42 = vpack.c.bf16 %v1973_v36, %v1965_v35  ;;  %v2026_v32 = vld [vmem:[#allocation7 + $0x480] sm:$0xff]  ;;  %v2028_v34 = vld [vmem:[#allocation7 + $0x490] sm:$0xff] }
 0x15e   :  { %4938 = vmatprep.subr.bf16.mxu1 %v4937_v43  ;;  %v1964_v43 = vld [vmem:[#allocation7 + $0x290] sm:$0xff]  ;;  %v4971_v30 = vpack.c.bf16 %v2020_v22, %v2012_v21  ;;  %v2034_v33 = vld [vmem:[#allocation7 + $0x4c0] sm:$0xff]  ;;  %v4973_v35 = vpack.c.bf16 %v2037_v29, %v2029_v28  ;;  %v4733_v22 = vpack.c.bf16 %v2099_v13, %v2091_v12  ;;  %v2149_v12 = vld [vmem:[#allocation7 + $0x858] sm:$0xff] }
 0x15f   :  { %1727 = vmatmul.mubr.f32.vlgmr.msra.gmra.mrb[14].mxu0 %v6026_v15  ;;  %v4959_v46 = vpack.c.bf16 %v1972_v44, %v1964_v43  ;;  %v2036_v36 = vld [vmem:[#allocation7 + $0x4d0] sm:$0xff]  ;;  %v4719_v41 = vpack.c.bf16 %v2034_v33, %v2026_v32  ;;  %v2042_v44 = vld [vmem:[#allocation7 + $0x500] sm:$0xff] }
 0x160   :  { %1798 = vmatmul.mubr.f32.vlgmr.msra.gmra.mrb[14].mxu1 %v6026_v15  ;;  %4684 = vmatpush1.bf16.msra.mxu0 %v4683_v1  ;;  %v4947_v15 = vpack.c.bf16 %v1924_v4, %v1916_v2  ;;  %v1987_v1 = vld [vmem:[#allocation7 + $0x348] sm:$0xff]  ;;  %v1994_v4 = vld [vmem:[#allocation7 + $0x380] sm:$0xff]  ;;  %v2092_v28 = vld [vmem:[#allocation7 + $0x690] sm:$0xff] }
 0x161   :  { %4940 = vmatpush1.bf16.msra.mxu1 %v4939_v49  ;;  %4686 = vmatprep.subr.bf16.mxu0 %v4685_v51  ;;  %v1981_v49 = vld [vmem:[#allocation7 + $0x318] sm:$0xff]  ;;  %v4705_v53 = vpack.c.bf16 %v1987_v1, %v1979_v48  ;;  %v4711_v6 = vpack.c.bf16 %v2002_v5, %v1994_v4  ;;  %v2052_v1 = vld [vmem:[#allocation7 + $0x550] sm:$0xff] }
 0x162   :  { %4942 = vmatprep.subr.bf16.mxu1 %v4941_v55  ;;  %v1978_v55 = vld [vmem:[#allocation7 + $0x300] sm:$0xff]  ;;  %v4961_v50 = vpack.c.bf16 %v1989_v54, %v1981_v49  ;;  %v2059_v49 = vld [vmem:[#allocation7 + $0x588] sm:$0xff]  ;;  %v2061_v54 = vld [vmem:[#allocation7 + $0x598] sm:$0xff] }
 0x163   :  { %v4707_v58 = vpack.c.bf16 %v1986_v56, %v1978_v55  ;;  %v2069_v55 = vld [vmem:[#allocation7 + $0x5d8] sm:$0xff]  ;;  %v2100_v29 = vld [vmem:[#allocation7 + $0x6d0] sm:$0xff] }
 0x164   :  { %4688 = vmatpush1.bf16.msra.mxu0 %v4687_v60  ;;  %v1988_v60 = vld [vmem:[#allocation7 + $0x350] sm:$0xff]  ;;  %v2085_v4 = vld [vmem:[#allocation7 + $0x658] sm:$0xff]  ;;  %v4991_v32 = vpack.c.bf16 %v2100_v29, %v2092_v28 }
 0x165   :  { %4944 = vmatpush1.bf16.msra.mxu1 %v4943_v61  ;;  %4690 = vmatprep.subr.bf16.mxu0 %v4689_v62  ;;  %v4963_v61 = vpack.c.bf16 %v1988_v60, %v1980_v59  ;;  %v1995_v62 = vld [vmem:[#allocation7 + $0x388] sm:$0xff]  ;;  %v2058_v59 = vld [vmem:[#allocation7 + $0x580] sm:$0xff] }
 0x166   :  { %4946 = vmatprep.subr.bf16.mxu1 %v4945_v3  ;;  %v4709_v2 = vpack.c.bf16 %v2003_v63, %v1995_v62  ;;  %v2005_v3 = vld [vmem:[#allocation7 + $0x3d8] sm:$0xff]  ;;  %v2066_v60 = vld [vmem:[#allocation7 + $0x5c0] sm:$0xff]  ;;  %v4981_v62 = vpack.c.bf16 %v2069_v55, %v2061_v54  ;;  %v2068_v63 = vld [vmem:[#allocation7 + $0x5d0] sm:$0xff] }
 0x167   :  { %v4965_v8 = vpack.c.bf16 %v2005_v3, %v1997_v0  ;;  %v2075_v0 = vld [vmem:[#allocation7 + $0x608] sm:$0xff]  ;;  %v2077_v3 = vld [vmem:[#allocation7 + $0x618] sm:$0xff]  ;;  %v4727_v5 = vpack.c.bf16 %v2066_v60, %v2058_v59  ;;  %v2116_v54 = vld [vmem:[#allocation7 + $0x750] sm:$0xff] }
 0x168   :  { %4692 = vmatpush1.bf16.msra.mxu0 %v4691_v9  ;;  %v2004_v9 = vld [vmem:[#allocation7 + $0x3d0] sm:$0xff] }
 0x169   :  { %4948 = vmatpush1.bf16.msra.mxu1 %v4947_v15  ;;  %4694 = vmatprep.subr.bf16.mxu0 %v4693_v10  ;;  %v2011_v15 = vld [vmem:[#allocation7 + $0x408] sm:$0xff]  ;;  %v4967_v10 = vpack.c.bf16 %v2004_v9, %v1996_v7  ;;  %v2074_v7 = vld [vmem:[#allocation7 + $0x600] sm:$0xff] }
 0x16a   :  { %4950 = vmatprep.subr.bf16.mxu1 %v4949_v16  ;;  %v4713_v16 = vpack.c.bf16 %v2019_v11, %v2011_v15  ;;  %v2082_v9 = vld [vmem:[#allocation7 + $0x640] sm:$0xff]  ;;  %v2076_v15 = vld [vmem:[#allocation7 + $0x610] sm:$0xff] }
 0x16b   :  { %v2084_v11 = vld [vmem:[#allocation7 + $0x650] sm:$0xff] }
 0x16c   :  { %4696 = vmatpush1.bf16.msra.mxu0 %v4695_v24  ;;  %v2027_v24 = vld [vmem:[#allocation7 + $0x488] sm:$0xff]  ;;  %v4987_v21 = vpack.c.bf16 %v2084_v11, %v2076_v15 }
 0x16d   :  { %4952 = vmatpush1.bf16.msra.mxu1 %v4951_v26  ;;  %4698 = vmatprep.subr.bf16.mxu0 %v4697_v27  ;;  %v2035_v26 = vld [vmem:[#allocation7 + $0x4c8] sm:$0xff]  ;;  %v4715_v27 = vpack.c.bf16 %v2018_v19, %v2010_v18  ;;  %v6058_v18 = vpop.permute.xlu0 %509  ;;  %v4731_v19 = vpack.c.bf16 %v2082_v9, %v2074_v7 }
 0x16e   :  { %4954 = vmatprep.subr.bf16.mxu1 %v4953_v31  ;;  %v4717_v31 = vpack.c.bf16 %v2035_v26, %v2027_v24  ;;  %v2090_v24 = vld [vmem:[#allocation7 + $0x680] sm:$0xff]  ;;  %v514_v33 = vmul.f32 %v6058_v18, %v6044_v23  ;;  %v2139_v9 = vld [vmem:[#allocation7 + $0x808] sm:$0xff] }
 0x16f   :  { %v2098_v26 = vld [vmem:[#allocation7 + $0x6c0] sm:$0xff]  ;;  %v2147_v15 = vld [vmem:[#allocation7 + $0x848] sm:$0xff] }
 0x170   :  { %4700 = vmatpush1.bf16.msra.mxu0 %v4699_v37  ;;  %v2043_v37 = vld [vmem:[#allocation7 + $0x508] sm:$0xff]  ;;  %v4745_v11 = vpack.c.bf16 %v2147_v15, %v2139_v9 }
 0x171   :  { %4956 = vmatpush1.bf16.msra.mxu1 %v4955_v38  ;;  %4702 = vmatprep.subr.bf16.mxu0 %v4701_v39  ;;  %v2051_v38 = vld [vmem:[#allocation7 + $0x548] sm:$0xff]  ;;  %v2045_v39 = vld [vmem:[#allocation7 + $0x518] sm:$0xff] }
 0x172   :  { %v6050_v47 = vpop.f32.mrb[2].mxu0  ;;  %4958 = vmatprep.subr.bf16.mxu1 %v4957_v42  ;;  %v4975_v42 = vpack.c.bf16 %v2036_v36, %v2028_v34  ;;  %v4721_v43 = vpack.c.bf16 %v2051_v38, %v2043_v37  ;;  %v4977_v48 = vpack.c.bf16 %v2053_v40, %v2045_v39  ;;  %v2115_v36 = vld [vmem:[#allocation7 + $0x748] sm:$0xff]  ;;  %v515_v37 = vmul.f32 %v6058_v18, %v6046_v25  ;;  %v2106_v25 = vld [vmem:[#allocation7 + $0x700] sm:$0xff] }
 0x173   :  { %v6052_v51 = vpop.f32.mrb[3].mxu0  ;;  %v6054_v52 = vpop.f32.mrb[2].mxu1  ;;  %v512_v38 = vmul.f32 %v6058_v18, %v6040_v14 }
 0x174   :  { %v6056_v57 = vpop.f32.mrb[3].mxu1  ;;  %4704 = vmatpush1.bf16.msra.mxu0 %v4703_v45  ;;  %v2050_v45 = vld [vmem:[#allocation7 + $0x540] sm:$0xff] }
 0x175   :  { %4960 = vmatpush1.bf16.msra.mxu1 %v4959_v46  ;;  %4706 = vmatprep.subr.bf16.mxu0 %v4705_v53  ;;  %v2044_v46 = vld [vmem:[#allocation7 + $0x510] sm:$0xff]  ;;  %v2067_v53 = vld [vmem:[#allocation7 + $0x5c8] sm:$0xff]  ;;  %v4723_v56 = vpack.c.bf16 %v2050_v45, %v2042_v44 }
 0x176   :  { %4962 = vmatprep.subr.bf16.mxu1 %v4961_v50  ;;  %v4979_v50 = vpack.c.bf16 %v2052_v1, %v2044_v46  ;;  %v2109_v46 = vld [vmem:[#allocation7 + $0x718] sm:$0xff] }
 0x178   :  { %4708 = vmatpush1.bf16.msra.mxu0 %v4707_v58  ;;  %v4725_v58 = vpack.c.bf16 %v2067_v53, %v2059_v49  ;;  %v2114_v49 = vld [vmem:[#allocation7 + $0x740] sm:$0xff]  ;;  %v2108_v53 = vld [vmem:[#allocation7 + $0x710] sm:$0xff] }
 0x179   :  { %4964 = vmatpush1.bf16.msra.mxu1 %v4963_v61  ;;  %4710 = vmatprep.subr.bf16.mxu0 %v4709_v2  ;;  %v2060_v61 = vld [vmem:[#allocation7 + $0x590] sm:$0xff]  ;;  %v2083_v2 = vld [vmem:[#allocation7 + $0x648] sm:$0xff] }
 0x17a   :  { %4966 = vmatprep.subr.bf16.mxu1 %v4965_v8  ;;  %v4983_v8 = vpack.c.bf16 %v2068_v63, %v2060_v61  ;;  %v2133_v61 = vld [vmem:[#allocation7 + $0x7d8] sm:$0xff]  ;;  %v2130_v63 = vld [vmem:[#allocation7 + $0x7c0] sm:$0xff] }
 0x17c   :  { %4712 = vmatpush1.bf16.msra.mxu0 %v4711_v6  ;;  %v4729_v6 = vpack.c.bf16 %v2083_v2, %v2075_v0  ;;  %v4739_v0 = vpack.c.bf16 %v2114_v49, %v2106_v25  ;;  %v4995_v2 = vpack.c.bf16 %v2116_v54, %v2108_v53 }
 0x17d   :  { %4968 = vmatpush1.bf16.msra.mxu1 %v4967_v10  ;;  %4714 = vmatprep.subr.bf16.mxu0 %v4713_v16  ;;  %v4985_v10 = vpack.c.bf16 %v2085_v4, %v2077_v3  ;;  %v2093_v16 = vld [vmem:[#allocation7 + $0x698] sm:$0xff] }
 0x17e   :  { %4970 = vmatprep.subr.bf16.mxu1 %v4969_v17  ;;  %v2101_v17 = vld [vmem:[#allocation7 + $0x6d8] sm:$0xff] }
 0x180   :  { %4716 = vmatpush1.bf16.msra.mxu0 %v4715_v27  ;;  %v4989_v27 = vpack.c.bf16 %v2101_v17, %v2093_v16  ;;  %v518_v16 = vmul.f32 %v6058_v18, %v6054_v52 }
 0x181   :  { %4972 = vmatpush1.bf16.msra.mxu1 %v4971_v30  ;;  %4718 = vmatprep.subr.bf16.mxu0 %v4717_v31  ;;  %v6060_v30 = vpop.permute.xlu0 %941  ;;  %v4735_v31 = vpack.c.bf16 %v2098_v26, %v2090_v24 }
 0x182   :  { %4974 = vmatprep.subr.bf16.mxu1 %v4973_v35  ;;  %v2107_v35 = vld [vmem:[#allocation7 + $0x708] sm:$0xff] }
 0x184   :  { %4720 = vmatpush1.bf16.msra.mxu0 %v4719_v41 }
 0x185   :  { %4976 = vmatpush1.bf16.msra.mxu1 %v4975_v42  ;;  %4722 = vmatprep.subr.bf16.mxu0 %v4721_v43  ;;  %v4737_v42 = vpack.c.bf16 %v2115_v36, %v2107_v35  ;;  %v513_v43 = vmul.f32 %v6058_v18, %v6042_v20  ;;  %v1374_v35 = vpop.permute.xlu1 %1373 }
 0x186   :  { %4978 = vmatprep.subr.bf16.mxu1 %v4977_v48  ;;  %v2117_v48 = vld [vmem:[#allocation7 + $0x758] sm:$0xff] }
 0x187   :  { %v4993_v60 = vpack.c.bf16 %v2117_v48, %v2109_v46 }
 0x188   :  { %4724 = vmatpush1.bf16.msra.mxu0 %v4723_v56  ;;  %v2123_v56 = vld [vmem:[#allocation7 + $0x788] sm:$0xff] }
 0x189   :  { %4980 = vmatpush1.bf16.msra.mxu1 %v4979_v50  ;;  %4726 = vmatprep.subr.bf16.mxu0 %v4725_v58  ;;  %v2131_v50 = vld [vmem:[#allocation7 + $0x7c8] sm:$0xff]  ;;  %v2125_v58 = vld [vmem:[#allocation7 + $0x798] sm:$0xff] }
 0x18a   :  { %4982 = vmatprep.subr.bf16.mxu1 %v4981_v62  ;;  %v2122_v62 = vld [vmem:[#allocation7 + $0x780] sm:$0xff]  ;;  %v4741_v3 = vpack.c.bf16 %v2131_v50, %v2123_v56  ;;  %v4997_v4 = vpack.c.bf16 %v2133_v61, %v2125_v58  ;;  %v6102_v58 = vpop.permute.xlu1 %1805 }
 0x18c   :  { %4728 = vmatpush1.bf16.msra.mxu0 %v4727_v5  ;;  %v2124_v5 = vld [vmem:[#allocation7 + $0x790] sm:$0xff] }
 0x18d   :  { %4984 = vmatpush1.bf16.msra.mxu1 %v4983_v8  ;;  %4730 = vmatprep.subr.bf16.mxu0 %v4729_v6  ;;  %v2132_v8 = vld [vmem:[#allocation7 + $0x7d0] sm:$0xff]  ;;  %v4743_v6 = vpack.c.bf16 %v2130_v63, %v2122_v62 }
 0x18e   :  { %4986 = vmatprep.subr.bf16.mxu1 %v4985_v10  ;;  %v4999_v7 = vpack.c.bf16 %v2132_v8, %v2124_v5  ;;  %v2141_v10 = vld [vmem:[#allocation7 + $0x818] sm:$0xff] }
 0x18f   :  { %v5001_v13 = vpack.c.bf16 %v2149_v12, %v2141_v10 }
 0x190   :  { %4732 = vmatpush1.bf16.msra.mxu0 %v4731_v19  ;;  %v516_v19 = vmul.f32 %v6058_v18, %v6050_v47 }
 0x191   :  { %4988 = vmatpush1.bf16.msra.mxu1 %v4987_v21  ;;  %4734 = vmatprep.subr.bf16.mxu0 %v4733_v22  ;;  %v519_v21 = vmul.f32 %v6058_v18, %v6056_v57 }
 0x192   :  { %v722_v34 = vpop.f32.mrb[4].mxu0  ;;  %4990 = vmatprep.subr.bf16.mxu1 %v4989_v27  ;;  %v517_v27 = vmul.f32 %v6058_v18, %v6052_v51 }
 0x193   :  { %v944_v39 = vmul.f32 %v6060_v30, %v722_v34  ;;  %v793_v40 = vpop.f32.mrb[4].mxu1  ;;  %v724_v41 = vpop.f32.mrb[5].mxu0 }
 0x194   :  { %v946_v23 = vmul.f32 %v6060_v30, %v793_v40  ;;  %v945_v44 = vmul.f32 %v6060_v30, %v724_v41  ;;  %v795_v45 = vpop.f32.mrb[5].mxu1  ;;  %4736 = vmatpush1.bf16.msra.mxu0 %v4735_v31 }
 0x195   :  { %v6073_v1 = vadd.f32 %v944_v39, %v512_v38  ;;  %v947_v14 = vmul.f32 %v6060_v30, %v795_v45  ;;  %4992 = vmatpush1.bf16.msra.mxu1 %v4991_v32  ;;  %4738 = vmatprep.subr.bf16.mxu0 %v4737_v42 }
 0x196   :  { %v954_v55 = vadd.f32 %v946_v23, %v514_v33  ;;  %v953_v20 = vadd.f32 %v945_v44, %v513_v43  ;;  %4994 = vmatprep.subr.bf16.mxu1 %v4993_v60 }
 0x197   :  { %v955_v59 = vadd.f32 %v947_v14, %v515_v37 }
 0x198   :  { %4740 = vmatpush1.bf16.msra.mxu0 %v4739_v0 }
 0x199   :  { %4996 = vmatpush1.bf16.msra.mxu1 %v4995_v2  ;;  %4742 = vmatprep.subr.bf16.mxu0 %v4741_v3 }
 0x19a   :  { %4998 = vmatprep.subr.bf16.mxu1 %v4997_v4 }
 0x19c   :  { %4744 = vmatpush1.bf16.msra.mxu0 %v4743_v6 }
 0x19d   :  { %5000 = vmatpush1.bf16.msra.mxu1 %v4999_v7  ;;  %4746 = vmatprep.subr.bf16.mxu0 %v4745_v11 }
 0x19e   :  { %5002 = vmatprep.subr.bf16.mxu1 %v5001_v13 }
 0x1b2   :  { %v864_v17 = vpop.f32.mrb[6].mxu0 }
 0x1b3   :  { %v948_v22 = vmul.f32 %v6060_v30, %v864_v17  ;;  %v935_v24 = vpop.f32.mrb[6].mxu1  ;;  %v866_v26 = vpop.f32.mrb[7].mxu0 }
 0x1b4   :  { %v950_v28 = vmul.f32 %v6060_v30, %v935_v24  ;;  %v949_v29 = vmul.f32 %v6060_v30, %v866_v26  ;;  %v937_v31 = vpop.f32.mrb[7].mxu1  ;;  %v2148_v24 = vld [vmem:[#allocation7 + $0x850] sm:$0xff] }
 0x1b5   :  { %v956_v52 = vadd.f32 %v948_v22, %v516_v19  ;;  %v951_v32 = vmul.f32 %v6060_v30, %v937_v31  ;;  %v2140_v22 = vld [vmem:[#allocation7 + $0x810] sm:$0xff]  ;;  %v2163_v31 = vld [vmem:[#allocation7 + $0x8c8] sm:$0xff] }
 0x1b6   :  { %v958_v33 = vadd.f32 %v950_v28, %v518_v16  ;;  %v957_v47 = vadd.f32 %v949_v29, %v517_v27  ;;  %v2138_v16 = vld [vmem:[#allocation7 + $0x800] sm:$0xff]  ;;  %v2155_v28 = vld [vmem:[#allocation7 + $0x888] sm:$0xff] }
 0x1b7   :  { %v959_v34 = vadd.f32 %v951_v32, %v519_v21  ;;  %v2146_v21 = vld [vmem:[#allocation7 + $0x840] sm:$0xff]  ;;  %v2165_v32 = vld [vmem:[#allocation7 + $0x8d8] sm:$0xff] }
 0x1d2   :  { %v1154_v57 = vpop.f32.mrb[8].mxu0 }
 0x1d3   :  { %v1376_v36 = vmul.f32 %v1374_v35, %v1154_v57  ;;  %v1225_v37 = vpop.f32.mrb[8].mxu1  ;;  %v1156_v38 = vpop.f32.mrb[9].mxu0  ;;  %v2162_v57 = vld [vmem:[#allocation7 + $0x8c0] sm:$0xff] }
 0x1d4   :  { %v1378_v39 = vmul.f32 %v1374_v35, %v1225_v37  ;;  %v1377_v40 = vmul.f32 %v1374_v35, %v1156_v38  ;;  %v1227_v41 = vpop.f32.mrb[9].mxu1  ;;  %v2156_v37 = vld [vmem:[#allocation7 + $0x890] sm:$0xff] }
 0x1d5   :  { %v1384_v51 = vadd.f32 %v1376_v36, %v6073_v1  ;;  %v1379_v18 = vmul.f32 %v1374_v35, %v1227_v41  ;;  %v1826_v1 = vlaneseq  ;;  %v2164_v38 = vld [vmem:[#allocation7 + $0x8d0] sm:$0xff] }
 0x1d6   :  { %v1386_v42 = vadd.f32 %v1378_v39, %v954_v55  ;;  %v1385_v43 = vadd.f32 %v1377_v40, %v953_v20  ;;  %v2171_v39 = vld [vmem:[#allocation7 + $0x908] sm:$0xff]  ;;  %v4749_v40 = vpack.c.bf16 %v2163_v31, %v2155_v28  ;;  %v2221_v31 = vld [vmem:[#allocation7 + $0xa98] sm:$0xff] }
 0x1d7   :  { %v1387_v23 = vadd.f32 %v1379_v18, %v955_v59  ;;  %v6097_v55 = vshrl.u32 %v1826_v1, 7  ;;  %v6104_v59 = vld [vmem:[#allocation5] sm:$0xff]  ;;  %v2195_v1 = vld [vmem:[#allocation7 + $0x9c8] sm:$0xff] }
 0x1d8   :  { %v2173_v18 = vld [vmem:[#allocation7 + $0x918] sm:$0xff]  ;;  %v2219_v28 = vld [vmem:[#allocation7 + $0xa88] sm:$0xff] }
 0x1d9   :  { %v6100_v20 = vsub.s32 0, %v6097_v55  ;;  %v6107_v60 = vsub.s32 2, %v6097_v55  ;;  %v6110_v61 = vsub.s32 1, %v6097_v55  ;;  %v6113_v62 = vsub.s32 3, %v6097_v55 }
 0x1db   :  { %v1829_v2 = vrot.slane %v6104_v59, %v6100_v20  ;;  %v1837_v8 = vrot.slane %v6104_v59, %v6107_v60  ;;  %v1833_v7 = vrot.slane %v6104_v59, %v6110_v61  ;;  %v1841_v11 = vrot.slane %v6104_v59, %v6113_v62 }
 0x1f2   :  { %v1296_v44 = vpop.f32.mrb[10].mxu0 }
 0x1f3   :  { %v1380_v45 = vmul.f32 %v1374_v35, %v1296_v44  ;;  %v1367_v30 = vpop.f32.mrb[10].mxu1  ;;  %v1298_v46 = vpop.f32.mrb[11].mxu0  ;;  %v5007_v44 = vpack.c.bf16 %v2164_v38, %v2156_v37  ;;  %v2220_v38 = vld [vmem:[#allocation7 + $0xa90] sm:$0xff] }
 0x1f4   :  { %v1382_v48 = vmul.f32 %v1374_v35, %v1367_v30  ;;  %v1381_v25 = vmul.f32 %v1374_v35, %v1298_v46  ;;  %v1369_v14 = vpop.f32.mrb[11].mxu1  ;;  %v2178_v30 = vld [vmem:[#allocation7 + $0x940] sm:$0xff] }
 0x1f5   :  { %v6089_v49 = vadd.f32 %v1380_v45, %v956_v52  ;;  %v1383_v53 = vmul.f32 %v1374_v35, %v1369_v14  ;;  %v2157_v52 = vld [vmem:[#allocation7 + $0x898] sm:$0xff]  ;;  %v2154_v35 = vld [vmem:[#allocation7 + $0x880] sm:$0xff]  ;;  %v2180_v14 = vld [vmem:[#allocation7 + $0x950] sm:$0xff] }
 0x1f6   :  { %v6091_v54 = vadd.f32 %v1382_v48, %v958_v33  ;;  %v6093_v56 = vadd.f32 %v1381_v25, %v957_v47  ;;  %v4747_v47 = vpack.c.bf16 %v2146_v21, %v2138_v16  ;;  %v5005_v41 = vpack.c.bf16 %v2165_v32, %v2157_v52  ;;  %v2170_v45 = vld [vmem:[#allocation7 + $0x900] sm:$0xff]  ;;  %v2172_v25 = vld [vmem:[#allocation7 + $0x910] sm:$0xff]  ;;  %v2229_v52 = vld [vmem:[#allocation7 + $0xad8] sm:$0xff] }
 0x1f7   :  { %v6095_v50 = vadd.f32 %v1383_v53, %v959_v34  ;;  %v5003_v34 = vpack.c.bf16 %v2148_v24, %v2140_v22  ;;  %v2187_v53 = vld [vmem:[#allocation7 + $0x988] sm:$0xff]  ;;  %v2204_v24 = vld [vmem:[#allocation7 + $0xa10] sm:$0xff]  ;;  %v5021_v37 = vpack.c.bf16 %v2229_v52, %v2221_v31  ;;  %v2269_v52 = vld [vmem:[#allocation7 + $0xc18] sm:$0xff] }
 0x212   :  { %v1586_v63 = vpop.f32.mrb[12].mxu0 }
 0x213   :  { %v1808_v0 = vmul.f32 %v6102_v58, %v1586_v63  ;;  %v1657_v3 = vpop.f32.mrb[12].mxu1  ;;  %v1588_v4 = vpop.f32.mrb[13].mxu0  ;;  %v2189_v63 = vld [vmem:[#allocation7 + $0x998] sm:$0xff] }
 0x214   :  { %v1810_v5 = vmul.f32 %v6102_v58, %v1657_v3  ;;  %v1809_v6 = vmul.f32 %v6102_v58, %v1588_v4  ;;  %v1659_v9 = vpop.f32.mrb[13].mxu1  ;;  %v5011_v3 = vpack.c.bf16 %v2180_v14, %v2172_v25  ;;  %v2186_v4 = vld [vmem:[#allocation7 + $0x980] sm:$0xff]  ;;  %v2236_v14 = vld [vmem:[#allocation7 + $0xb10] sm:$0xff] }
 0x215   :  { %v1816_v15 = vadd.f32 %v1808_v0, %v1384_v51  ;;  %v1811_v10 = vmul.f32 %v6102_v58, %v1659_v9  ;;  %v2179_v51 = vld [vmem:[#allocation7 + $0x948] sm:$0xff]  ;;  %v2197_v0 = vld [vmem:[#allocation7 + $0x9d8] sm:$0xff]  ;;  %v2196_v9 = vld [vmem:[#allocation7 + $0x9d0] sm:$0xff] }
 0x216   :  { %v1818_v12 = vadd.f32 %v1810_v5, %v1386_v42  ;;  %v1817_v13 = vadd.f32 %v1809_v6, %v1385_v43  ;;  %v2181_v42 = vld [vmem:[#allocation7 + $0x958] sm:$0xff]  ;;  %v4753_v46 = vpack.c.bf16 %v2179_v51, %v2171_v39  ;;  %v2194_v5 = vld [vmem:[#allocation7 + $0x9c0] sm:$0xff]  ;;  %v5013_v6 = vpack.c.bf16 %v2197_v0, %v2189_v63  ;;  %v2228_v39 = vld [vmem:[#allocation7 + $0xad0] sm:$0xff] }
 0x217   :  { %v1866_v17 = vadd.f32 %v1829_v2, %v1816_v15  ;;  %v1819_v19 = vadd.f32 %v1811_v10, %v1387_v23  ;;  %v4751_v23 = vpack.c.bf16 %v2162_v57, %v2154_v35  ;;  %v5009_v48 = vpack.c.bf16 %v2181_v42, %v2173_v18  ;;  %v2203_v15 = vld [vmem:[#allocation7 + $0xa08] sm:$0xff]  ;;  %v2226_v35 = vld [vmem:[#allocation7 + $0xac0] sm:$0xff]  ;;  %v2237_v51 = vld [vmem:[#allocation7 + $0xb18] sm:$0xff] }
 0x218   :  { %v6127_v26 = vadd.f32 %v1837_v8, %v1818_v12  ;;  %v1867_v27 = vadd.f32 %v1833_v7, %v1817_v13  ;;  %v4755_v2 = vpack.c.bf16 %v2178_v30, %v2170_v45  ;;  %v4757_v8 = vpack.c.bf16 %v2195_v1, %v2187_v53  ;;  %v2188_v7 = vld [vmem:[#allocation7 + $0x990] sm:$0xff]  ;;  %v2211_v10 = vld [vmem:[#allocation7 + $0xa48] sm:$0xff]  ;;  %v2213_v12 = vld [vmem:[#allocation7 + $0xa58] sm:$0xff] }
 0x219   :  { %v1869_v29 = vadd.f32 %v1841_v11, %v1819_v19  ;;  %v6131_v36 = vmax.f32 %v1866_v17, 0.0  ;;  %v2205_v11 = vld [vmem:[#allocation7 + $0xa18] sm:$0xff]  ;;  %v4759_v13 = vpack.c.bf16 %v2194_v5, %v2186_v4  ;;  %v5015_v16 = vpack.c.bf16 %v2196_v9, %v2188_v7  ;;  %v2202_v17 = vld [vmem:[#allocation7 + $0xa00] sm:$0xff]  ;;  %v2244_v53 = vld [vmem:[#allocation7 + $0xb50] sm:$0xff] }
 0x21a   :  { %v6129_v33 = vmax.f32 %v1867_v27, 0.0  ;;  %v2210_v19 = vld [vmem:[#allocation7 + $0xa40] sm:$0xff]  ;;  %v4761_v21 = vpack.c.bf16 %v2211_v10, %v2203_v15  ;;  %v5017_v22 = vpack.c.bf16 %v2213_v12, %v2205_v11  ;;  %v2212_v27 = vld [vmem:[#allocation7 + $0xa50] sm:$0xff]  ;;  %v2245_v18 = vld [vmem:[#allocation7 + $0xb58] sm:$0xff]  ;;  %v6142_v42 = vsub.s32 4, %v6097_v55 }
 0x21b   :  { %v6135_v43 = vmax.f32 %v1869_v29, 0.0  ;;  %v2227_v29 = vld [vmem:[#allocation7 + $0xac8] sm:$0xff]  ;;  %v4763_v32 = vpack.c.bf16 %v2210_v19, %v2202_v17  ;;  %v6145_v45 = vsub.s32 6, %v6097_v55  ;;  %v2234_v30 = vld [vmem:[#allocation7 + $0xb00] sm:$0xff]  ;;  %v5025_v25 = vpack.c.bf16 %v2245_v18, %v2237_v51  ;;  %v2261_v4 = vld [vmem:[#allocation7 + $0xbd8] sm:$0xff] }
 0x21c   :  { %3012 = vmatprep.mubr.f32.mxu0 %v6129_v33  ;;  %3296 = vmatprep.mubr.f32.mxu1 %v6129_v33  ;;  %v4765_v57 = vpack.c.bf16 %v2227_v29, %v2219_v28  ;;  %v2251_v1 = vld [vmem:[#allocation7 + $0xb88] sm:$0xff]  ;;  %v6148_v63 = vsub.s32 5, %v6097_v55  ;;  %v6151_v0 = vsub.s32 7, %v6097_v55  ;;  %v1845_v5 = vrot.slane %v6104_v59, %v6142_v42  ;;  %v2258_v10 = vld [vmem:[#allocation7 + $0xbc0] sm:$0xff]  ;;  %v2252_v11 = vld [vmem:[#allocation7 + $0xb90] sm:$0xff] }
 0x21d   :  { %3013 = vmatmul.mubr.f32.vlgmr.msra.gmra.mrb[16].mxu0 %v6131_v36  ;;  %3297 = vmatmul.mubr.f32.vlgmr.msra.gmra.mrb[16].mxu1 %v6131_v36  ;;  %v1853_v7 = vrot.slane %v6104_v59, %v6145_v45  ;;  %v5027_v15 = vpack.c.bf16 %v2244_v53, %v2236_v14  ;;  %v2260_v12 = vld [vmem:[#allocation7 + $0xbd0] sm:$0xff]  ;;  %v2290_v53 = vld [vmem:[#allocation7 + $0xcc0] sm:$0xff] }
 0x21e   :  { %4748 = vmatpush1.bf16.msra.mxu0 %v4747_v47  ;;  %5004 = vmatpush1.bf16.msra.mxu1 %v5003_v34  ;;  %v5019_v47 = vpack.c.bf16 %v2212_v27, %v2204_v24  ;;  %v2218_v34 = vld [vmem:[#allocation7 + $0xa80] sm:$0xff]  ;;  %v1849_v28 = vrot.slane %v6104_v59, %v6148_v63  ;;  %v1857_v31 = vrot.slane %v6104_v59, %v6151_v0  ;;  %v2268_v18 = vld [vmem:[#allocation7 + $0xc10] sm:$0xff] }
 0x21f   :  { %3083 = vmatprep.mubr.f32.mxu0 %v6135_v43  ;;  %3367 = vmatprep.mubr.f32.mxu1 %v6135_v43 }
 0x220   :  { %4750 = vmatprep.subr.bf16.mxu0 %v4749_v40  ;;  %5006 = vmatprep.subr.bf16.mxu1 %v5005_v41  ;;  %v2235_v40 = vld [vmem:[#allocation7 + $0xb08] sm:$0xff] }
 0x221   :  { %v2243_v41 = vld [vmem:[#allocation7 + $0xb48] sm:$0xff] }
 0x222   :  { %4752 = vmatpush1.bf16.msra.mxu0 %v4751_v23  ;;  %5008 = vmatpush1.bf16.msra.mxu1 %v5007_v44  ;;  %v4767_v23 = vpack.c.bf16 %v2226_v35, %v2218_v34  ;;  %v5023_v44 = vpack.c.bf16 %v2228_v39, %v2220_v38 }
 0x223   :  { %4754 = vmatprep.subr.bf16.mxu0 %v4753_v46  ;;  %5010 = vmatprep.subr.bf16.mxu1 %v5009_v48  ;;  %v2242_v46 = vld [vmem:[#allocation7 + $0xb40] sm:$0xff]  ;;  %v4769_v48 = vpack.c.bf16 %v2243_v41, %v2235_v40 }
 0x224   :  { %v4771_v9 = vpack.c.bf16 %v2242_v46, %v2234_v30  ;;  %v2266_v40 = vld [vmem:[#allocation7 + $0xc00] sm:$0xff]  ;;  %v2285_v30 = vld [vmem:[#allocation7 + $0xc98] sm:$0xff] }
 0x225   :  { %v2274_v41 = vld [vmem:[#allocation7 + $0xc40] sm:$0xff]  ;;  %v2293_v46 = vld [vmem:[#allocation7 + $0xcd8] sm:$0xff] }
 0x226   :  { %4756 = vmatpush1.bf16.msra.mxu0 %v4755_v2  ;;  %5012 = vmatpush1.bf16.msra.mxu1 %v5011_v3  ;;  %v2259_v2 = vld [vmem:[#allocation7 + $0xbc8] sm:$0xff]  ;;  %v2253_v3 = vld [vmem:[#allocation7 + $0xb98] sm:$0xff] }
 0x227   :  { %4758 = vmatprep.subr.bf16.mxu0 %v4757_v8  ;;  %5014 = vmatprep.subr.bf16.mxu1 %v5013_v6  ;;  %v2250_v8 = vld [vmem:[#allocation7 + $0xb80] sm:$0xff]  ;;  %v4773_v17 = vpack.c.bf16 %v2259_v2, %v2251_v1  ;;  %v5029_v19 = vpack.c.bf16 %v2261_v4, %v2253_v3  ;;  %v5037_v2 = vpack.c.bf16 %v2293_v46, %v2285_v30  ;;  %v2284_v3 = vld [vmem:[#allocation7 + $0xc90] sm:$0xff]  ;;  %v2349_v30 = vld [vmem:[#allocation7 + $0xe98] sm:$0xff] }
 0x228   :  { %v4775_v35 = vpack.c.bf16 %v2258_v10, %v2250_v8  ;;  %v2292_v4 = vld [vmem:[#allocation7 + $0xcd0] sm:$0xff]  ;;  %v2307_v8 = vld [vmem:[#allocation7 + $0xd48] sm:$0xff]  ;;  %v2298_v10 = vld [vmem:[#allocation7 + $0xd00] sm:$0xff] }
 0x229   :  { %v2357_v46 = vld [vmem:[#allocation7 + $0xed8] sm:$0xff] }
 0x22a   :  { %4760 = vmatpush1.bf16.msra.mxu0 %v4759_v13  ;;  %5016 = vmatpush1.bf16.msra.mxu1 %v5015_v16 }
 0x22b   :  { %4762 = vmatprep.subr.bf16.mxu0 %v4761_v21  ;;  %5018 = vmatprep.subr.bf16.mxu1 %v5017_v22  ;;  %v2267_v21 = vld [vmem:[#allocation7 + $0xc08] sm:$0xff] }
 0x22c   :  { %v2275_v22 = vld [vmem:[#allocation7 + $0xc48] sm:$0xff] }
 0x22d   :  { %v4777_v39 = vpack.c.bf16 %v2275_v22, %v2267_v21  ;;  %v2317_v21 = vld [vmem:[#allocation7 + $0xd98] sm:$0xff] }
 0x22e   :  { %4764 = vmatpush1.bf16.msra.mxu0 %v4763_v32  ;;  %5020 = vmatpush1.bf16.msra.mxu1 %v5019_v47  ;;  %v2277_v32 = vld [vmem:[#allocation7 + $0xc58] sm:$0xff] }
 0x22f   :  { %4766 = vmatprep.subr.bf16.mxu0 %v4765_v57  ;;  %5022 = vmatprep.subr.bf16.mxu1 %v5021_v37  ;;  %v5031_v57 = vpack.c.bf16 %v2260_v12, %v2252_v11  ;;  %v2306_v11 = vld [vmem:[#allocation7 + $0xd40] sm:$0xff]  ;;  %v2325_v22 = vld [vmem:[#allocation7 + $0xdd8] sm:$0xff] }
 0x232   :  { %4768 = vmatpush1.bf16.msra.mxu0 %v4767_v23  ;;  %5024 = vmatpush1.bf16.msra.mxu1 %v5023_v44  ;;  %v1728_v6 = vpop.f32.mrb[14].mxu0  ;;  %v2283_v23 = vld [vmem:[#allocation7 + $0xc88] sm:$0xff] }
 0x233   :  { %v1812_v55 = vmul.f32 %v6102_v58, %v1728_v6  ;;  %v1799_v13 = vpop.f32.mrb[14].mxu1  ;;  %v1730_v16 = vpop.f32.mrb[15].mxu0  ;;  %4770 = vmatprep.subr.bf16.mxu0 %v4769_v48  ;;  %5026 = vmatprep.subr.bf16.mxu1 %v5025_v25  ;;  %v4779_v25 = vpack.c.bf16 %v2274_v41, %v2266_v40  ;;  %v2301_v6 = vld [vmem:[#allocation7 + $0xd18] sm:$0xff]  ;;  %v2330_v40 = vld [vmem:[#allocation7 + $0xe00] sm:$0xff] }
 0x234   :  { %v1814_v24 = vmul.f32 %v6102_v58, %v1799_v13  ;;  %v1813_v27 = vmul.f32 %v6102_v58, %v1730_v16  ;;  %v1801_v29 = vpop.f32.mrb[15].mxu1  ;;  %v2300_v13 = vld [vmem:[#allocation7 + $0xd10] sm:$0xff]  ;;  %v2338_v41 = vld [vmem:[#allocation7 + $0xe40] sm:$0xff] }
 0x235   :  { %v1820_v47 = vadd.f32 %v1812_v55, %v6089_v49  ;;  %v1815_v34 = vmul.f32 %v6102_v58, %v1801_v29  ;;  %v5033_v49 = vpack.c.bf16 %v2277_v32, %v2269_v52  ;;  %v2276_v58 = vld [vmem:[#allocation7 + $0xc50] sm:$0xff]  ;;  %v2322_v29 = vld [vmem:[#allocation7 + $0xdc0] sm:$0xff]  ;;  %v5045_v52 = vpack.c.bf16 %v2325_v22, %v2317_v21  ;;  %v2381_v21 = vld [vmem:[#allocation7 + $0xf98] sm:$0xff] }
 0x236   :  { %v1822_v37 = vadd.f32 %v1814_v24, %v6091_v54  ;;  %v1821_v38 = vadd.f32 %v1813_v27, %v6093_v56  ;;  %4772 = vmatpush1.bf16.msra.mxu0 %v4771_v9  ;;  %5028 = vmatpush1.bf16.msra.mxu1 %v5027_v15  ;;  %v2291_v56 = vld [vmem:[#allocation7 + $0xcc8] sm:$0xff]  ;;  %v5035_v14 = vpack.c.bf16 %v2276_v58, %v2268_v18  ;;  %v2308_v16 = vld [vmem:[#allocation7 + $0xd50] sm:$0xff]  ;;  %v2389_v22 = vld [vmem:[#allocation7 + $0xfd8] sm:$0xff] }
 0x237   :  { %v6168_v51 = vadd.f32 %v1845_v5, %v1820_v47  ;;  %v1823_v59 = vadd.f32 %v1815_v34, %v6095_v50  ;;  %4774 = vmatprep.subr.bf16.mxu0 %v4773_v17  ;;  %5030 = vmatprep.subr.bf16.mxu1 %v5029_v19  ;;  %v2282_v50 = vld [vmem:[#allocation7 + $0xc80] sm:$0xff]  ;;  %v4781_v1 = vpack.c.bf16 %v2291_v56, %v2283_v23  ;;  %v2299_v5 = vld [vmem:[#allocation7 + $0xd08] sm:$0xff]  ;;  %v2316_v32 = vld [vmem:[#allocation7 + $0xd90] sm:$0xff] }
 0x238   :  { %v6171_v44 = vadd.f32 %v1853_v7, %v1822_v37  ;;  %v6173_v54 = vadd.f32 %v1849_v28, %v1821_v38  ;;  %v2309_v7 = vld [vmem:[#allocation7 + $0xd58] sm:$0xff]  ;;  %v4783_v9 = vpack.c.bf16 %v2290_v53, %v2282_v50  ;;  %v5039_v15 = vpack.c.bf16 %v2292_v4, %v2284_v3  ;;  %v2315_v17 = vld [vmem:[#allocation7 + $0xd88] sm:$0xff]  ;;  %v2314_v28 = vld [vmem:[#allocation7 + $0xd80] sm:$0xff] }
 0x239   :  { %v6175_v48 = vadd.f32 %v1857_v31, %v1823_v59  ;;  %v4785_v12 = vpack.c.bf16 %v2307_v8, %v2299_v5  ;;  %v5041_v55 = vpack.c.bf16 %v2309_v7, %v2301_v6  ;;  %v2323_v19 = vld [vmem:[#allocation7 + $0xdc8] sm:$0xff]  ;;  %v4787_v24 = vpack.c.bf16 %v2306_v11, %v2298_v10  ;;  %v2324_v47 = vld [vmem:[#allocation7 + $0xdd0] sm:$0xff]  ;;  %v2341_v37 = vld [vmem:[#allocation7 + $0xe58] sm:$0xff] }
 0x23a   :  { %4776 = vmatpush1.bf16.msra.mxu0 %v4775_v35  ;;  %5032 = vmatpush1.bf16.msra.mxu1 %v5031_v57  ;;  %v5043_v27 = vpack.c.bf16 %v2308_v16, %v2300_v13  ;;  %v4789_v31 = vpack.c.bf16 %v2323_v19, %v2315_v17  ;;  %v2331_v34 = vld [vmem:[#allocation7 + $0xe08] sm:$0xff]  ;;  %v2333_v57 = vld [vmem:[#allocation7 + $0xe18] sm:$0xff]  ;;  %v4791_v38 = vpack.c.bf16 %v2322_v29, %v2314_v28  ;;  %v2332_v18 = vld [vmem:[#allocation7 + $0xe10] sm:$0xff] }
 0x23b   :  { %4778 = vmatprep.subr.bf16.mxu0 %v4777_v39  ;;  %5034 = vmatprep.subr.bf16.mxu1 %v5033_v49  ;;  %v2339_v35 = vld [vmem:[#allocation7 + $0xe48] sm:$0xff]  ;;  %v5047_v39 = vpack.c.bf16 %v2324_v47, %v2316_v32  ;;  %v5049_v49 = vpack.c.bf16 %v2341_v37, %v2333_v57  ;;  %v2340_v58 = vld [vmem:[#allocation7 + $0xe50] sm:$0xff]  ;;  %v2346_v50 = vld [vmem:[#allocation7 + $0xe80] sm:$0xff] }
 0x23c   :  { %v4793_v59 = vpack.c.bf16 %v2339_v35, %v2331_v34  ;;  %v2347_v23 = vld [vmem:[#allocation7 + $0xe88] sm:$0xff]  ;;  %v2354_v53 = vld [vmem:[#allocation7 + $0xec0] sm:$0xff]  ;;  %v2348_v3 = vld [vmem:[#allocation7 + $0xe90] sm:$0xff] }
 0x23d   :  { %v2355_v56 = vld [vmem:[#allocation7 + $0xec8] sm:$0xff]  ;;  %v2356_v4 = vld [vmem:[#allocation7 + $0xed0] sm:$0xff]  ;;  %v2365_v6 = vld [vmem:[#allocation7 + $0xf18] sm:$0xff] }
 0x23e   :  { %4780 = vmatpush1.bf16.msra.mxu0 %v4779_v25  ;;  %5036 = vmatpush1.bf16.msra.mxu1 %v5035_v14  ;;  %v4795_v25 = vpack.c.bf16 %v2338_v41, %v2330_v40  ;;  %v5051_v14 = vpack.c.bf16 %v2340_v58, %v2332_v18  ;;  %v2363_v5 = vld [vmem:[#allocation7 + $0xf08] sm:$0xff]  ;;  %v2373_v7 = vld [vmem:[#allocation7 + $0xf58] sm:$0xff]  ;;  %v2362_v10 = vld [vmem:[#allocation7 + $0xf00] sm:$0xff] }
 0x23f   :  { %4782 = vmatprep.subr.bf16.mxu0 %v4781_v1  ;;  %5038 = vmatprep.subr.bf16.mxu1 %v5037_v2  ;;  %v4797_v1 = vpack.c.bf16 %v2355_v56, %v2347_v23  ;;  %v5053_v2 = vpack.c.bf16 %v2357_v46, %v2349_v30  ;;  %v2371_v8 = vld [vmem:[#allocation7 + $0xf48] sm:$0xff]  ;;  %v2370_v11 = vld [vmem:[#allocation7 + $0xf40] sm:$0xff]  ;;  %v2364_v13 = vld [vmem:[#allocation7 + $0xf10] sm:$0xff] }
 0x240   :  { %v2372_v16 = vld [vmem:[#allocation7 + $0xf50] sm:$0xff]  ;;  %v2379_v17 = vld [vmem:[#allocation7 + $0xf88] sm:$0xff]  ;;  %v2378_v28 = vld [vmem:[#allocation7 + $0xf80] sm:$0xff] }
 0x241   :  { %v2387_v19 = vld [vmem:[#allocation7 + $0xfc8] sm:$0xff]  ;;  %v2386_v29 = vld [vmem:[#allocation7 + $0xfc0] sm:$0xff]  ;;  %v2380_v32 = vld [vmem:[#allocation7 + $0xf90] sm:$0xff] }
 0x242   :  { %4784 = vmatpush1.bf16.msra.mxu0 %v4783_v9  ;;  %5040 = vmatpush1.bf16.msra.mxu1 %v5039_v15  ;;  %v4799_v9 = vpack.c.bf16 %v2354_v53, %v2346_v50  ;;  %v5055_v15 = vpack.c.bf16 %v2356_v4, %v2348_v3  ;;  %v2388_v47 = vld [vmem:[#allocation7 + $0xfd0] sm:$0xff]  ;;  %v2395_v34 = vld [vmem:[#allocation7 + $0x1008] sm:$0xff]  ;;  %v2397_v57 = vld [vmem:[#allocation7 + $0x1018] sm:$0xff]  ;;  %v6181_v3 = vmax.f32 %v6173_v54, 0.0 }
 0x243   :  { %4786 = vmatprep.subr.bf16.mxu0 %v4785_v12  ;;  %5042 = vmatprep.subr.bf16.mxu1 %v5041_v55  ;;  %v4801_v12 = vpack.c.bf16 %v2371_v8, %v2363_v5  ;;  %v5057_v55 = vpack.c.bf16 %v2373_v7, %v2365_v6  ;;  %v2403_v35 = vld [vmem:[#allocation7 + $0x1048] sm:$0xff]  ;;  %v2405_v37 = vld [vmem:[#allocation7 + $0x1058] sm:$0xff]  ;;  %v2396_v18 = vld [vmem:[#allocation7 + $0x1010] sm:$0xff] }
 0x244   :  { %v4809_v40 = vpack.c.bf16 %v2403_v35, %v2395_v34  ;;  %v5065_v41 = vpack.c.bf16 %v2405_v37, %v2397_v57  ;;  %v2404_v58 = vld [vmem:[#allocation7 + $0x1050] sm:$0xff]  ;;  %v2411_v23 = vld [vmem:[#allocation7 + $0x1088] sm:$0xff]  ;;  %v2413_v30 = vld [vmem:[#allocation7 + $0x1098] sm:$0xff] }
 0x245   :  { %v2419_v56 = vld [vmem:[#allocation7 + $0x10c8] sm:$0xff]  ;;  %v2421_v46 = vld [vmem:[#allocation7 + $0x10d8] sm:$0xff]  ;;  %v5067_v50 = vpack.c.bf16 %v2404_v58, %v2396_v18  ;;  %v2410_v53 = vld [vmem:[#allocation7 + $0x1080] sm:$0xff] }
 0x246   :  { %4788 = vmatpush1.bf16.msra.mxu0 %v4787_v24  ;;  %5044 = vmatpush1.bf16.msra.mxu1 %v5043_v27  ;;  %v4803_v24 = vpack.c.bf16 %v2370_v11, %v2362_v10  ;;  %v5059_v27 = vpack.c.bf16 %v2372_v16, %v2364_v13  ;;  %v4813_v4 = vpack.c.bf16 %v2419_v56, %v2411_v23  ;;  %v2420_v8 = vld [vmem:[#allocation7 + $0x10d0] sm:$0xff]  ;;  %v2427_v6 = vld [vmem:[#allocation7 + $0x1108] sm:$0xff]  ;;  %v2426_v11 = vld [vmem:[#allocation7 + $0x1100] sm:$0xff] }
 0x247   :  { %4790 = vmatprep.subr.bf16.mxu0 %v4789_v31  ;;  %5046 = vmatprep.subr.bf16.mxu1 %v5045_v52  ;;  %v4805_v31 = vpack.c.bf16 %v2387_v19, %v2379_v17  ;;  %v5061_v52 = vpack.c.bf16 %v2389_v22, %v2381_v21  ;;  %v5069_v5 = vpack.c.bf16 %v2421_v46, %v2413_v30  ;;  %v2435_v7 = vld [vmem:[#allocation7 + $0x1148] sm:$0xff]  ;;  %v2436_v16 = vld [vmem:[#allocation7 + $0x1150] sm:$0xff]  ;;  %v2445_v21 = vld [vmem:[#allocation7 + $0x1198] sm:$0xff] }
 0x248   :  { %v4817_v10 = vpack.c.bf16 %v2435_v7, %v2427_v6  ;;  %v2443_v17 = vld [vmem:[#allocation7 + $0x1188] sm:$0xff]  ;;  %v2453_v22 = vld [vmem:[#allocation7 + $0x11d8] sm:$0xff]  ;;  %v2468_v58 = vld [vmem:[#allocation7 + $0x1250] sm:$0xff] }
 0x249   :  { %v2451_v19 = vld [vmem:[#allocation7 + $0x11c8] sm:$0xff]  ;;  %v2461_v57 = vld [vmem:[#allocation7 + $0x1218] sm:$0xff] }
 0x24a   :  { %4792 = vmatpush1.bf16.msra.mxu0 %v4791_v38  ;;  %5048 = vmatpush1.bf16.msra.mxu1 %v5047_v39  ;;  %v4807_v38 = vpack.c.bf16 %v2386_v29, %v2378_v28  ;;  %v5063_v39 = vpack.c.bf16 %v2388_v47, %v2380_v32  ;;  %v4821_v28 = vpack.c.bf16 %v2451_v19, %v2443_v17  ;;  %v2442_v29 = vld [vmem:[#allocation7 + $0x1180] sm:$0xff]  ;;  %v2452_v47 = vld [vmem:[#allocation7 + $0x11d0] sm:$0xff]  ;;  %v2459_v34 = vld [vmem:[#allocation7 + $0x1208] sm:$0xff] }
 0x24b   :  { %4794 = vmatprep.subr.bf16.mxu0 %v4793_v59  ;;  %5050 = vmatprep.subr.bf16.mxu1 %v5049_v49  ;;  %v2394_v59 = vld [vmem:[#allocation7 + $0x1000] sm:$0xff]  ;;  %v5077_v32 = vpack.c.bf16 %v2453_v22, %v2445_v21  ;;  %v2467_v35 = vld [vmem:[#allocation7 + $0x1248] sm:$0xff]  ;;  %v2469_v37 = vld [vmem:[#allocation7 + $0x1258] sm:$0xff] }
 0x24c   :  { %v2402_v49 = vld [vmem:[#allocation7 + $0x1040] sm:$0xff]  ;;  %v5081_v18 = vpack.c.bf16 %v2469_v37, %v2461_v57  ;;  %v2475_v23 = vld [vmem:[#allocation7 + $0x1288] sm:$0xff]  ;;  %v2477_v30 = vld [vmem:[#allocation7 + $0x1298] sm:$0xff] }
 0x24d   :  { %v2483_v56 = vld [vmem:[#allocation7 + $0x12c8] sm:$0xff]  ;;  %v2485_v46 = vld [vmem:[#allocation7 + $0x12d8] sm:$0xff] }
 0x24e   :  { %4796 = vmatpush1.bf16.msra.mxu0 %v4795_v25  ;;  %5052 = vmatpush1.bf16.msra.mxu1 %v5051_v14  ;;  %v4811_v25 = vpack.c.bf16 %v2402_v49, %v2394_v59  ;;  %v6178_v14 = vmax.f32 %v6127_v26, 0.0  ;;  %v2429_v26 = vld [vmem:[#allocation7 + $0x1118] sm:$0xff]  ;;  %v2466_v59 = vld [vmem:[#allocation7 + $0x1240] sm:$0xff]  ;;  %v2460_v49 = vld [vmem:[#allocation7 + $0x1210] sm:$0xff] }
 0x24f   :  { %4798 = vmatprep.subr.bf16.mxu0 %v4797_v1  ;;  %5054 = vmatprep.subr.bf16.mxu1 %v5053_v2  ;;  %v2418_v1 = vld [vmem:[#allocation7 + $0x10c0] sm:$0xff]  ;;  %v2412_v2 = vld [vmem:[#allocation7 + $0x1090] sm:$0xff]  ;;  %v2491_v6 = vld [vmem:[#allocation7 + $0x1308] sm:$0xff] }
 0x250   :  { %v5071_v54 = vpack.c.bf16 %v2420_v8, %v2412_v2  ;;  %v2482_v2 = vld [vmem:[#allocation7 + $0x12c0] sm:$0xff]  ;;  %v2484_v8 = vld [vmem:[#allocation7 + $0x12d0] sm:$0xff]  ;;  %v2499_v7 = vld [vmem:[#allocation7 + $0x1348] sm:$0xff] }
 0x251   :  { %v2507_v17 = vld [vmem:[#allocation7 + $0x1388] sm:$0xff]  ;;  %v2509_v21 = vld [vmem:[#allocation7 + $0x1398] sm:$0xff] }
 0x252   :  { %4800 = vmatpush1.bf16.msra.mxu0 %v4799_v9  ;;  %5056 = vmatpush1.bf16.msra.mxu1 %v5055_v15  ;;  %v2437_v9 = vld [vmem:[#allocation7 + $0x1158] sm:$0xff]  ;;  %v4815_v15 = vpack.c.bf16 %v2418_v1, %v2410_v53  ;;  %v4829_v53 = vpack.c.bf16 %v2483_v56, %v2475_v23  ;;  %v2474_v1 = vld [vmem:[#allocation7 + $0x1280] sm:$0xff]  ;;  %v2515_v19 = vld [vmem:[#allocation7 + $0x13c8] sm:$0xff] }
 0x253   :  { %4802 = vmatprep.subr.bf16.mxu0 %v4801_v12  ;;  %5058 = vmatprep.subr.bf16.mxu1 %v5057_v55  ;;  %v2434_v12 = vld [vmem:[#allocation7 + $0x1140] sm:$0xff]  ;;  %v2428_v55 = vld [vmem:[#allocation7 + $0x1110] sm:$0xff]  ;;  %v5073_v13 = vpack.c.bf16 %v2437_v9, %v2429_v26  ;;  %v2493_v26 = vld [vmem:[#allocation7 + $0x1318] sm:$0xff] }
 0x254   :  { %v2501_v9 = vld [vmem:[#allocation7 + $0x1358] sm:$0xff]  ;;  %v2539_v23 = vld [vmem:[#allocation7 + $0x1488] sm:$0xff] }
 0x255   :  { %v2517_v22 = vld [vmem:[#allocation7 + $0x13d8] sm:$0xff]  ;;  %v2547_v56 = vld [vmem:[#allocation7 + $0x14c8] sm:$0xff] }
 0x256   :  { %4804 = vmatpush1.bf16.msra.mxu0 %v4803_v24  ;;  %5060 = vmatpush1.bf16.msra.mxu1 %v5059_v27  ;;  %v4819_v24 = vpack.c.bf16 %v2434_v12, %v2426_v11  ;;  %v5075_v27 = vpack.c.bf16 %v2436_v16, %v2428_v55  ;;  %v2490_v11 = vld [vmem:[#allocation7 + $0x1300] sm:$0xff]  ;;  %v2492_v55 = vld [vmem:[#allocation7 + $0x1310] sm:$0xff]  ;;  %v2525_v57 = vld [vmem:[#allocation7 + $0x1418] sm:$0xff] }
 0x257   :  { %4806 = vmatprep.subr.bf16.mxu0 %v4805_v31  ;;  %5062 = vmatprep.subr.bf16.mxu1 %v5061_v52  ;;  %v2450_v31 = vld [vmem:[#allocation7 + $0x11c0] sm:$0xff]  ;;  %v2444_v52 = vld [vmem:[#allocation7 + $0x1190] sm:$0xff]  ;;  %v2533_v37 = vld [vmem:[#allocation7 + $0x1458] sm:$0xff] }
 0x258   :  { %v2498_v12 = vld [vmem:[#allocation7 + $0x1340] sm:$0xff]  ;;  %v2500_v16 = vld [vmem:[#allocation7 + $0x1350] sm:$0xff] }
 0x25a   :  { %4808 = vmatpush1.bf16.msra.mxu0 %v4807_v38  ;;  %5064 = vmatpush1.bf16.msra.mxu1 %v5063_v39  ;;  %v4823_v38 = vpack.c.bf16 %v2450_v31, %v2442_v29  ;;  %v5079_v39 = vpack.c.bf16 %v2452_v47, %v2444_v52  ;;  %v2506_v29 = vld [vmem:[#allocation7 + $0x1380] sm:$0xff]  ;;  %v2508_v52 = vld [vmem:[#allocation7 + $0x1390] sm:$0xff] }
 0x25b   :  { %4810 = vmatprep.subr.bf16.mxu0 %v4809_v40  ;;  %5066 = vmatprep.subr.bf16.mxu1 %v5065_v41  ;;  %v4825_v40 = vpack.c.bf16 %v2467_v35, %v2459_v34  ;;  %v2458_v41 = vld [vmem:[#allocation7 + $0x1200] sm:$0xff]  ;;  %v2516_v47 = vld [vmem:[#allocation7 + $0x13d0] sm:$0xff]  ;;  %v2523_v34 = vld [vmem:[#allocation7 + $0x1408] sm:$0xff] }
 0x25c   :  { %v2514_v31 = vld [vmem:[#allocation7 + $0x13c0] sm:$0xff]  ;;  %v2531_v35 = vld [vmem:[#allocation7 + $0x1448] sm:$0xff] }
 0x25d   :  { %3084 = vmatmul.mubr.f32.vlgmr.msra.gmra.mrb[16].mxu0 %v6178_v14  ;;  %3368 = vmatmul.mubr.f32.vlgmr.msra.gmra.mrb[16].mxu1 %v6178_v14 }
 0x25e   :  { %4812 = vmatpush1.bf16.msra.mxu0 %v4811_v25  ;;  %3154 = vmatprep.mubr.f32.mxu0 %v6181_v3  ;;  %v4827_v25 = vpack.c.bf16 %v2466_v59, %v2458_v41  ;;  %v2522_v41 = vld [vmem:[#allocation7 + $0x1400] sm:$0xff] }
 0x25f   :  { %5068 = vmatpush1.bf16.msra.mxu1 %v5067_v50  ;;  %3438 = vmatprep.mubr.f32.mxu1 %v6181_v3  ;;  %v5083_v50 = vpack.c.bf16 %v2468_v58, %v2460_v49  ;;  %v2530_v59 = vld [vmem:[#allocation7 + $0x1440] sm:$0xff]  ;;  %v2524_v49 = vld [vmem:[#allocation7 + $0x1410] sm:$0xff] }
 0x260   :  { %4814 = vmatprep.subr.bf16.mxu0 %v4813_v4  ;;  %5070 = vmatprep.subr.bf16.mxu1 %v5069_v5  ;;  %v2476_v4 = vld [vmem:[#allocation7 + $0x1290] sm:$0xff]  ;;  %v5085_v5 = vpack.c.bf16 %v2485_v46, %v2477_v30  ;;  %v2541_v30 = vld [vmem:[#allocation7 + $0x1498] sm:$0xff] }
 0x261   :  { %v2532_v58 = vld [vmem:[#allocation7 + $0x1450] sm:$0xff]  ;;  %v2549_v46 = vld [vmem:[#allocation7 + $0x14d8] sm:$0xff] }
 0x262   :  { %4816 = vmatpush1.bf16.msra.mxu0 %v4815_v15  ;;  %v4831_v15 = vpack.c.bf16 %v2482_v2, %v2474_v1  ;;  %v2538_v1 = vld [vmem:[#allocation7 + $0x1480] sm:$0xff] }
 0x263   :  { %5072 = vmatpush1.bf16.msra.mxu1 %v5071_v54  ;;  %4818 = vmatprep.subr.bf16.mxu0 %v4817_v10  ;;  %v5087_v54 = vpack.c.bf16 %v2484_v8, %v2476_v4  ;;  %v4833_v10 = vpack.c.bf16 %v2499_v7, %v2491_v6  ;;  %v2546_v2 = vld [vmem:[#allocation7 + $0x14c0] sm:$0xff]  ;;  %v2540_v4 = vld [vmem:[#allocation7 + $0x1490] sm:$0xff]  ;;  %v2555_v6 = vld [vmem:[#allocation7 + $0x1508] sm:$0xff] }
 0x264   :  { %5074 = vmatprep.subr.bf16.mxu1 %v5073_v13  ;;  %v5089_v13 = vpack.c.bf16 %v2501_v9, %v2493_v26  ;;  %v2548_v8 = vld [vmem:[#allocation7 + $0x14d0] sm:$0xff]  ;;  %v2563_v7 = vld [vmem:[#allocation7 + $0x1548] sm:$0xff]  ;;  %v2557_v26 = vld [vmem:[#allocation7 + $0x1518] sm:$0xff] }
 0x265   :  { %v2565_v9 = vld [vmem:[#allocation7 + $0x1558] sm:$0xff] }
 0x266   :  { %4820 = vmatpush1.bf16.msra.mxu0 %v4819_v24  ;;  %v4835_v24 = vpack.c.bf16 %v2498_v12, %v2490_v11  ;;  %v2554_v11 = vld [vmem:[#allocation7 + $0x1500] sm:$0xff] }
 0x267   :  { %5076 = vmatpush1.bf16.msra.mxu1 %v5075_v27  ;;  %4822 = vmatprep.subr.bf16.mxu0 %v4821_v28  ;;  %v5091_v27 = vpack.c.bf16 %v2500_v16, %v2492_v55  ;;  %v4837_v28 = vpack.c.bf16 %v2515_v19, %v2507_v17  ;;  %v2562_v12 = vld [vmem:[#allocation7 + $0x1540] sm:$0xff]  ;;  %v2556_v55 = vld [vmem:[#allocation7 + $0x1510] sm:$0xff]  ;;  %v2571_v17 = vld [vmem:[#allocation7 + $0x1588] sm:$0xff] }
 0x268   :  { %5078 = vmatprep.subr.bf16.mxu1 %v5077_v32  ;;  %v5093_v32 = vpack.c.bf16 %v2517_v22, %v2509_v21  ;;  %v2564_v16 = vld [vmem:[#allocation7 + $0x1550] sm:$0xff]  ;;  %v2579_v19 = vld [vmem:[#allocation7 + $0x15c8] sm:$0xff]  ;;  %v2573_v21 = vld [vmem:[#allocation7 + $0x1598] sm:$0xff] }
 0x269   :  { %v2581_v22 = vld [vmem:[#allocation7 + $0x15d8] sm:$0xff] }
 0x26a   :  { %4824 = vmatpush1.bf16.msra.mxu0 %v4823_v38  ;;  %v4839_v38 = vpack.c.bf16 %v2514_v31, %v2506_v29  ;;  %v2570_v29 = vld [vmem:[#allocation7 + $0x1580] sm:$0xff] }
 0x26b   :  { %5080 = vmatpush1.bf16.msra.mxu1 %v5079_v39  ;;  %4826 = vmatprep.subr.bf16.mxu0 %v4825_v40  ;;  %v5095_v39 = vpack.c.bf16 %v2516_v47, %v2508_v52  ;;  %v4841_v40 = vpack.c.bf16 %v2531_v35, %v2523_v34  ;;  %v2578_v31 = vld [vmem:[#allocation7 + $0x15c0] sm:$0xff]  ;;  %v2572_v52 = vld [vmem:[#allocation7 + $0x1590] sm:$0xff]  ;;  %v2587_v34 = vld [vmem:[#allocation7 + $0x1608] sm:$0xff] }
 0x26c   :  { %5082 = vmatprep.subr.bf16.mxu1 %v5081_v18  ;;  %v5097_v18 = vpack.c.bf16 %v2533_v37, %v2525_v57  ;;  %v2580_v47 = vld [vmem:[#allocation7 + $0x15d0] sm:$0xff]  ;;  %v2595_v35 = vld [vmem:[#allocation7 + $0x1648] sm:$0xff]  ;;  %v2589_v57 = vld [vmem:[#allocation7 + $0x1618] sm:$0xff] }
 0x26d   :  { %v2597_v37 = vld [vmem:[#allocation7 + $0x1658] sm:$0xff] }
 0x26e   :  { %4828 = vmatpush1.bf16.msra.mxu0 %v4827_v25  ;;  %v4843_v25 = vpack.c.bf16 %v2530_v59, %v2522_v41  ;;  %v2586_v41 = vld [vmem:[#allocation7 + $0x1600] sm:$0xff] }
 0x26f   :  { %5084 = vmatpush1.bf16.msra.mxu1 %v5083_v50  ;;  %4830 = vmatprep.subr.bf16.mxu0 %v4829_v53  ;;  %v5099_v50 = vpack.c.bf16 %v2532_v58, %v2524_v49  ;;  %v4845_v53 = vpack.c.bf16 %v2547_v56, %v2539_v23  ;;  %v2594_v59 = vld [vmem:[#allocation7 + $0x1640] sm:$0xff]  ;;  %v2588_v49 = vld [vmem:[#allocation7 + $0x1610] sm:$0xff]  ;;  %v2603_v23 = vld [vmem:[#allocation7 + $0x1688] sm:$0xff] }
 0x270   :  { %5086 = vmatprep.subr.bf16.mxu1 %v5085_v5  ;;  %v5101_v5 = vpack.c.bf16 %v2549_v46, %v2541_v30  ;;  %v2596_v58 = vld [vmem:[#allocation7 + $0x1650] sm:$0xff]  ;;  %v2611_v56 = vld [vmem:[#allocation7 + $0x16c8] sm:$0xff]  ;;  %v2605_v30 = vld [vmem:[#allocation7 + $0x1698] sm:$0xff] }
 0x271   :  { %v2613_v46 = vld [vmem:[#allocation7 + $0x16d8] sm:$0xff] }
 0x272   :  { %4832 = vmatpush1.bf16.msra.mxu0 %v4831_v15  ;;  %v4847_v15 = vpack.c.bf16 %v2546_v2, %v2538_v1  ;;  %v2602_v1 = vld [vmem:[#allocation7 + $0x1680] sm:$0xff] }
 0x273   :  { %5088 = vmatpush1.bf16.msra.mxu1 %v5087_v54  ;;  %4834 = vmatprep.subr.bf16.mxu0 %v4833_v10  ;;  %v5103_v54 = vpack.c.bf16 %v2548_v8, %v2540_v4  ;;  %v4849_v10 = vpack.c.bf16 %v2563_v7, %v2555_v6  ;;  %v2610_v2 = vld [vmem:[#allocation7 + $0x16c0] sm:$0xff]  ;;  %v2604_v4 = vld [vmem:[#allocation7 + $0x1690] sm:$0xff]  ;;  %v2619_v6 = vld [vmem:[#allocation7 + $0x1708] sm:$0xff] }
 0x274   :  { %5090 = vmatprep.subr.bf16.mxu1 %v5089_v13  ;;  %v5105_v13 = vpack.c.bf16 %v2565_v9, %v2557_v26  ;;  %v2612_v8 = vld [vmem:[#allocation7 + $0x16d0] sm:$0xff]  ;;  %v2627_v7 = vld [vmem:[#allocation7 + $0x1748] sm:$0xff]  ;;  %v2621_v26 = vld [vmem:[#allocation7 + $0x1718] sm:$0xff] }
 0x275   :  { %v2629_v9 = vld [vmem:[#allocation7 + $0x1758] sm:$0xff] }
 0x276   :  { %4836 = vmatpush1.bf16.msra.mxu0 %v4835_v24  ;;  %v4851_v24 = vpack.c.bf16 %v2562_v12, %v2554_v11  ;;  %v2618_v11 = vld [vmem:[#allocation7 + $0x1700] sm:$0xff] }
 0x277   :  { %5092 = vmatpush1.bf16.msra.mxu1 %v5091_v27  ;;  %4838 = vmatprep.subr.bf16.mxu0 %v4837_v28  ;;  %v5107_v27 = vpack.c.bf16 %v2564_v16, %v2556_v55  ;;  %v4853_v28 = vpack.c.bf16 %v2579_v19, %v2571_v17  ;;  %v2626_v12 = vld [vmem:[#allocation7 + $0x1740] sm:$0xff]  ;;  %v2620_v55 = vld [vmem:[#allocation7 + $0x1710] sm:$0xff]  ;;  %v2635_v17 = vld [vmem:[#allocation7 + $0x1788] sm:$0xff] }
 0x278   :  { %5094 = vmatprep.subr.bf16.mxu1 %v5093_v32  ;;  %v5109_v32 = vpack.c.bf16 %v2581_v22, %v2573_v21  ;;  %v2628_v16 = vld [vmem:[#allocation7 + $0x1750] sm:$0xff]  ;;  %v2643_v19 = vld [vmem:[#allocation7 + $0x17c8] sm:$0xff]  ;;  %v2637_v21 = vld [vmem:[#allocation7 + $0x1798] sm:$0xff] }
 0x279   :  { %v2645_v22 = vld [vmem:[#allocation7 + $0x17d8] sm:$0xff] }
 0x27a   :  { %4840 = vmatpush1.bf16.msra.mxu0 %v4839_v38  ;;  %v4855_v38 = vpack.c.bf16 %v2578_v31, %v2570_v29  ;;  %v2634_v29 = vld [vmem:[#allocation7 + $0x1780] sm:$0xff] }
 0x27b   :  { %5096 = vmatpush1.bf16.msra.mxu1 %v5095_v39  ;;  %4842 = vmatprep.subr.bf16.mxu0 %v4841_v40  ;;  %v5111_v39 = vpack.c.bf16 %v2580_v47, %v2572_v52  ;;  %v4857_v40 = vpack.c.bf16 %v2595_v35, %v2587_v34  ;;  %v2642_v31 = vld [vmem:[#allocation7 + $0x17c0] sm:$0xff]  ;;  %v2636_v52 = vld [vmem:[#allocation7 + $0x1790] sm:$0xff]  ;;  %v2651_v34 = vld [vmem:[#allocation7 + $0x1808] sm:$0xff] }
 0x27c   :  { %5098 = vmatprep.subr.bf16.mxu1 %v5097_v18  ;;  %v5113_v18 = vpack.c.bf16 %v2597_v37, %v2589_v57  ;;  %v2644_v47 = vld [vmem:[#allocation7 + $0x17d0] sm:$0xff]  ;;  %v2659_v35 = vld [vmem:[#allocation7 + $0x1848] sm:$0xff]  ;;  %v2653_v57 = vld [vmem:[#allocation7 + $0x1818] sm:$0xff] }
 0x27d   :  { %v2661_v37 = vld [vmem:[#allocation7 + $0x1858] sm:$0xff] }
 0x27e   :  { %4844 = vmatpush1.bf16.msra.mxu0 %v4843_v25  ;;  %v4859_v25 = vpack.c.bf16 %v2594_v59, %v2586_v41  ;;  %v2650_v41 = vld [vmem:[#allocation7 + $0x1800] sm:$0xff] }
 0x27f   :  { %5100 = vmatpush1.bf16.msra.mxu1 %v5099_v50  ;;  %4846 = vmatprep.subr.bf16.mxu0 %v4845_v53  ;;  %v5115_v50 = vpack.c.bf16 %v2596_v58, %v2588_v49  ;;  %v4861_v53 = vpack.c.bf16 %v2611_v56, %v2603_v23  ;;  %v2658_v59 = vld [vmem:[#allocation7 + $0x1840] sm:$0xff]  ;;  %v5129_v49 = vpack.c.bf16 %v2661_v37, %v2653_v57  ;;  %v2660_v58 = vld [vmem:[#allocation7 + $0x1850] sm:$0xff]  ;;  %v2667_v23 = vld [vmem:[#allocation7 + $0x1888] sm:$0xff] }
 0x280   :  { %5102 = vmatprep.subr.bf16.mxu1 %v5101_v5  ;;  %v5117_v5 = vpack.c.bf16 %v2613_v46, %v2605_v30  ;;  %v2675_v56 = vld [vmem:[#allocation7 + $0x18c8] sm:$0xff]  ;;  %v4875_v30 = vpack.c.bf16 %v2658_v59, %v2650_v41  ;;  %v2669_v46 = vld [vmem:[#allocation7 + $0x1898] sm:$0xff]  ;;  %v2714_v41 = vld [vmem:[#allocation7 + $0x1a00] sm:$0xff] }
 0x281   :  { %v2717_v57 = vld [vmem:[#allocation7 + $0x1a18] sm:$0xff]  ;;  %v2722_v59 = vld [vmem:[#allocation7 + $0x1a40] sm:$0xff] }
 0x282   :  { %4848 = vmatpush1.bf16.msra.mxu0 %v4847_v15  ;;  %v4863_v15 = vpack.c.bf16 %v2610_v2, %v2602_v1  ;;  %v2666_v1 = vld [vmem:[#allocation7 + $0x1880] sm:$0xff]  ;;  %v2725_v37 = vld [vmem:[#allocation7 + $0x1a58] sm:$0xff] }
 0x283   :  { %5104 = vmatpush1.bf16.msra.mxu1 %v5103_v54  ;;  %4850 = vmatprep.subr.bf16.mxu0 %v4849_v10  ;;  %v5119_v54 = vpack.c.bf16 %v2612_v8, %v2604_v4  ;;  %v4865_v10 = vpack.c.bf16 %v2627_v7, %v2619_v6  ;;  %v2674_v2 = vld [vmem:[#allocation7 + $0x18c0] sm:$0xff]  ;;  %v2668_v4 = vld [vmem:[#allocation7 + $0x1890] sm:$0xff]  ;;  %v2683_v6 = vld [vmem:[#allocation7 + $0x1908] sm:$0xff] }
 0x284   :  { %5106 = vmatprep.subr.bf16.mxu1 %v5105_v13  ;;  %v5121_v13 = vpack.c.bf16 %v2629_v9, %v2621_v26  ;;  %v2676_v8 = vld [vmem:[#allocation7 + $0x18d0] sm:$0xff]  ;;  %v2691_v7 = vld [vmem:[#allocation7 + $0x1948] sm:$0xff]  ;;  %v6191_v26 = vmax.f32 %v6175_v48, 0.0 }
 0x286   :  { %4852 = vmatpush1.bf16.msra.mxu0 %v4851_v24  ;;  %v4867_v24 = vpack.c.bf16 %v2626_v12, %v2618_v11  ;;  %v4881_v11 = vpack.c.bf16 %v2691_v7, %v2683_v6  ;;  %v2682_v12 = vld [vmem:[#allocation7 + $0x1900] sm:$0xff]  ;;  %v2740_v6 = vld [vmem:[#allocation7 + $0x1ad0] sm:$0xff]  ;;  %v2747_v7 = vld [vmem:[#allocation7 + $0x1b08] sm:$0xff] }
 0x287   :  { %5108 = vmatpush1.bf16.msra.mxu1 %v5107_v27  ;;  %4854 = vmatprep.subr.bf16.mxu0 %v4853_v28  ;;  %v5123_v27 = vpack.c.bf16 %v2628_v16, %v2620_v55  ;;  %v4869_v28 = vpack.c.bf16 %v2643_v19, %v2635_v17  ;;  %v2690_v55 = vld [vmem:[#allocation7 + $0x1940] sm:$0xff]  ;;  %v2692_v16 = vld [vmem:[#allocation7 + $0x1950] sm:$0xff]  ;;  %v2699_v17 = vld [vmem:[#allocation7 + $0x1988] sm:$0xff] }
 0x288   :  { %5110 = vmatprep.subr.bf16.mxu1 %v5109_v32  ;;  %v5125_v32 = vpack.c.bf16 %v2645_v22, %v2637_v21  ;;  %v2707_v19 = vld [vmem:[#allocation7 + $0x19c8] sm:$0xff]  ;;  %v2701_v21 = vld [vmem:[#allocation7 + $0x1998] sm:$0xff] }
 0x289   :  { %v2709_v22 = vld [vmem:[#allocation7 + $0x19d8] sm:$0xff] }
 0x28a   :  { %4856 = vmatpush1.bf16.msra.mxu0 %v4855_v38  ;;  %v4871_v38 = vpack.c.bf16 %v2642_v31, %v2634_v29  ;;  %v2698_v29 = vld [vmem:[#allocation7 + $0x1980] sm:$0xff] }
 0x28b   :  { %5112 = vmatpush1.bf16.msra.mxu1 %v5111_v39  ;;  %4858 = vmatprep.subr.bf16.mxu0 %v4857_v40  ;;  %v5127_v39 = vpack.c.bf16 %v2644_v47, %v2636_v52  ;;  %v4873_v40 = vpack.c.bf16 %v2659_v35, %v2651_v34  ;;  %v2706_v31 = vld [vmem:[#allocation7 + $0x19c0] sm:$0xff]  ;;  %v2700_v52 = vld [vmem:[#allocation7 + $0x1990] sm:$0xff]  ;;  %v2715_v34 = vld [vmem:[#allocation7 + $0x1a08] sm:$0xff] }
 0x28c   :  { %5114 = vmatprep.subr.bf16.mxu1 %v5113_v18  ;;  %v2652_v18 = vld [vmem:[#allocation7 + $0x1810] sm:$0xff]  ;;  %v2723_v35 = vld [vmem:[#allocation7 + $0x1a48] sm:$0xff] }
 0x28d   :  { %v2708_v47 = vld [vmem:[#allocation7 + $0x19d0] sm:$0xff] }
 0x28e   :  { %4860 = vmatpush1.bf16.msra.mxu0 %v4859_v25  ;;  %v2677_v25 = vld [vmem:[#allocation7 + $0x18d8] sm:$0xff] }
 0x28f   :  { %5116 = vmatpush1.bf16.msra.mxu1 %v5115_v50  ;;  %4862 = vmatprep.subr.bf16.mxu0 %v4861_v53  ;;  %v6188_v50 = vmax.f32 %v6168_v51, 0.0  ;;  %v5131_v53 = vpack.c.bf16 %v2660_v58, %v2652_v18  ;;  %v5133_v9 = vpack.c.bf16 %v2677_v25, %v2669_v46  ;;  %v2693_v51 = vld [vmem:[#allocation7 + $0x1958] sm:$0xff]  ;;  %v5145_v18 = vpack.c.bf16 %v2725_v37, %v2717_v57  ;;  %v2724_v58 = vld [vmem:[#allocation7 + $0x1a50] sm:$0xff] }
 0x290   :  { %5118 = vmatprep.subr.bf16.mxu1 %v5117_v5  ;;  %v4877_v5 = vpack.c.bf16 %v2675_v56, %v2667_v23  ;;  %v2731_v23 = vld [vmem:[#allocation7 + $0x1a88] sm:$0xff]  ;;  %v2741_v46 = vld [vmem:[#allocation7 + $0x1ad8] sm:$0xff]  ;;  %v4891_v25 = vpack.c.bf16 %v2722_v59, %v2714_v41  ;;  %v2778_v41 = vld [vmem:[#allocation7 + $0x1c00] sm:$0xff] }
 0x291   :  { %v2739_v56 = vld [vmem:[#allocation7 + $0x1ac8] sm:$0xff]  ;;  %v2781_v57 = vld [vmem:[#allocation7 + $0x1c18] sm:$0xff]  ;;  %v2786_v59 = vld [vmem:[#allocation7 + $0x1c40] sm:$0xff] }
 0x292   :  { %4864 = vmatpush1.bf16.msra.mxu0 %v4863_v15  ;;  %v2685_v15 = vld [vmem:[#allocation7 + $0x1918] sm:$0xff] }
 0x293   :  { %5120 = vmatpush1.bf16.msra.mxu1 %v5119_v54  ;;  %4866 = vmatprep.subr.bf16.mxu0 %v4865_v10  ;;  %v4879_v54 = vpack.c.bf16 %v2674_v2, %v2666_v1  ;;  %v5135_v10 = vpack.c.bf16 %v2676_v8, %v2668_v4  ;;  %v5137_v48 = vpack.c.bf16 %v2693_v51, %v2685_v15  ;;  %v2730_v2 = vld [vmem:[#allocation7 + $0x1a80] sm:$0xff]  ;;  %v2749_v15 = vld [vmem:[#allocation7 + $0x1b18] sm:$0xff] }
 0x294   :  { %5122 = vmatprep.subr.bf16.mxu1 %v5121_v13  ;;  %v2684_v13 = vld [vmem:[#allocation7 + $0x1910] sm:$0xff]  ;;  %v4893_v1 = vpack.c.bf16 %v2739_v56, %v2731_v23  ;;  %v2738_v4 = vld [vmem:[#allocation7 + $0x1ac0] sm:$0xff]  ;;  %v2757_v51 = vld [vmem:[#allocation7 + $0x1b58] sm:$0xff] }
 0x295   :  { %v2789_v37 = vld [vmem:[#allocation7 + $0x1c58] sm:$0xff]  ;;  %v2795_v23 = vld [vmem:[#allocation7 + $0x1c88] sm:$0xff] }
 0x296   :  { %4868 = vmatpush1.bf16.msra.mxu0 %v4867_v24  ;;  %v4883_v24 = vpack.c.bf16 %v2690_v55, %v2682_v12  ;;  %v2746_v12 = vld [vmem:[#allocation7 + $0x1b00] sm:$0xff]  ;;  %v2803_v56 = vld [vmem:[#allocation7 + $0x1cc8] sm:$0xff] }
 0x297   :  { %5124 = vmatpush1.bf16.msra.mxu1 %v5123_v27  ;;  %4870 = vmatprep.subr.bf16.mxu0 %v4869_v28  ;;  %v5139_v27 = vpack.c.bf16 %v2692_v16, %v2684_v13  ;;  %v4885_v28 = vpack.c.bf16 %v2707_v19, %v2699_v17  ;;  %v2754_v55 = vld [vmem:[#allocation7 + $0x1b40] sm:$0xff]  ;;  %v2748_v13 = vld [vmem:[#allocation7 + $0x1b10] sm:$0xff]  ;;  %v2763_v17 = vld [vmem:[#allocation7 + $0x1b88] sm:$0xff] }
 0x298   :  { %5126 = vmatprep.subr.bf16.mxu1 %v5125_v32  ;;  %v5141_v32 = vpack.c.bf16 %v2709_v22, %v2701_v21  ;;  %v2756_v16 = vld [vmem:[#allocation7 + $0x1b50] sm:$0xff]  ;;  %v2771_v19 = vld [vmem:[#allocation7 + $0x1bc8] sm:$0xff]  ;;  %v2765_v21 = vld [vmem:[#allocation7 + $0x1b98] sm:$0xff] }
 0x299   :  { %v2773_v22 = vld [vmem:[#allocation7 + $0x1bd8] sm:$0xff] }
 0x29a   :  { %4872 = vmatpush1.bf16.msra.mxu0 %v4871_v38  ;;  %v4887_v38 = vpack.c.bf16 %v2706_v31, %v2698_v29  ;;  %v2762_v29 = vld [vmem:[#allocation7 + $0x1b80] sm:$0xff] }
 0x29b   :  { %5128 = vmatpush1.bf16.msra.mxu1 %v5127_v39  ;;  %4874 = vmatprep.subr.bf16.mxu0 %v4873_v40  ;;  %v5143_v39 = vpack.c.bf16 %v2708_v47, %v2700_v52  ;;  %v4889_v40 = vpack.c.bf16 %v2723_v35, %v2715_v34  ;;  %v2770_v31 = vld [vmem:[#allocation7 + $0x1bc0] sm:$0xff]  ;;  %v2764_v52 = vld [vmem:[#allocation7 + $0x1b90] sm:$0xff]  ;;  %v2779_v34 = vld [vmem:[#allocation7 + $0x1c08] sm:$0xff] }
 0x29c   :  { %5130 = vmatprep.subr.bf16.mxu1 %v5129_v49  ;;  %v2716_v49 = vld [vmem:[#allocation7 + $0x1a10] sm:$0xff]  ;;  %v2787_v35 = vld [vmem:[#allocation7 + $0x1c48] sm:$0xff] }
 0x29d   :  { %3155 = vmatmul.mubr.f32.vlgmr.msra.gmra.mrb[16].mxu0 %v6188_v50  ;;  %v2772_v47 = vld [vmem:[#allocation7 + $0x1bd0] sm:$0xff] }
 0x29e   :  { %3439 = vmatmul.mubr.f32.vlgmr.msra.gmra.mrb[16].mxu1 %v6188_v50  ;;  %4876 = vmatpush1.bf16.msra.mxu0 %v4875_v30  ;;  %v2733_v30 = vld [vmem:[#allocation7 + $0x1a98] sm:$0xff] }
 0x29f   :  { %3225 = vmatprep.mubr.f32.mxu0 %v6191_v26  ;;  %5132 = vmatpush1.bf16.msra.mxu1 %v5131_v53  ;;  %v5147_v53 = vpack.c.bf16 %v2724_v58, %v2716_v49  ;;  %v5149_v8 = vpack.c.bf16 %v2741_v46, %v2733_v30  ;;  %v2780_v49 = vld [vmem:[#allocation7 + $0x1c10] sm:$0xff]  ;;  %v2797_v30 = vld [vmem:[#allocation7 + $0x1c98] sm:$0xff] }
 0x2a0   :  { %3509 = vmatprep.mubr.f32.mxu1 %v6191_v26  ;;  %4878 = vmatprep.subr.bf16.mxu0 %v4877_v5  ;;  %v2732_v5 = vld [vmem:[#allocation7 + $0x1a90] sm:$0xff]  ;;  %v2805_v46 = vld [vmem:[#allocation7 + $0x1cd8] sm:$0xff] }
 0x2a1   :  { %5134 = vmatprep.subr.bf16.mxu1 %v5133_v9  ;;  %v2755_v9 = vld [vmem:[#allocation7 + $0x1b48] sm:$0xff]  ;;  %v2788_v58 = vld [vmem:[#allocation7 + $0x1c50] sm:$0xff] }
 0x2a2   :  { %4880 = vmatpush1.bf16.msra.mxu0 %v4879_v54  ;;  %v4895_v54 = vpack.c.bf16 %v2738_v4, %v2730_v2  ;;  %v2794_v2 = vld [vmem:[#allocation7 + $0x1c80] sm:$0xff] }
 0x2a3   :  { %5136 = vmatpush1.bf16.msra.mxu1 %v5135_v10  ;;  %4882 = vmatprep.subr.bf16.mxu0 %v4881_v11  ;;  %v5151_v10 = vpack.c.bf16 %v2740_v6, %v2732_v5  ;;  %v4897_v11 = vpack.c.bf16 %v2755_v9, %v2747_v7  ;;  %v2802_v4 = vld [vmem:[#allocation7 + $0x1cc0] sm:$0xff]  ;;  %v2796_v5 = vld [vmem:[#allocation7 + $0x1c90] sm:$0xff]  ;;  %v2811_v7 = vld [vmem:[#allocation7 + $0x1d08] sm:$0xff] }
 0x2a4   :  { %5138 = vmatprep.subr.bf16.mxu1 %v5137_v48  ;;  %v5153_v48 = vpack.c.bf16 %v2757_v51, %v2749_v15  ;;  %v2804_v6 = vld [vmem:[#allocation7 + $0x1cd0] sm:$0xff]  ;;  %v2819_v9 = vld [vmem:[#allocation7 + $0x1d48] sm:$0xff]  ;;  %v2813_v15 = vld [vmem:[#allocation7 + $0x1d18] sm:$0xff] }
 0x2a5   :  { %v2821_v51 = vld [vmem:[#allocation7 + $0x1d58] sm:$0xff] }
 0x2a6   :  { %4884 = vmatpush1.bf16.msra.mxu0 %v4883_v24  ;;  %v4899_v24 = vpack.c.bf16 %v2754_v55, %v2746_v12  ;;  %v2810_v12 = vld [vmem:[#allocation7 + $0x1d00] sm:$0xff] }
 0x2a7   :  { %5140 = vmatpush1.bf16.msra.mxu1 %v5139_v27  ;;  %4886 = vmatprep.subr.bf16.mxu0 %v4885_v28  ;;  %v5155_v27 = vpack.c.bf16 %v2756_v16, %v2748_v13  ;;  %v4901_v28 = vpack.c.bf16 %v2771_v19, %v2763_v17  ;;  %v2818_v55 = vld [vmem:[#allocation7 + $0x1d40] sm:$0xff]  ;;  %v2812_v13 = vld [vmem:[#allocation7 + $0x1d10] sm:$0xff]  ;;  %v2827_v17 = vld [vmem:[#allocation7 + $0x1d88] sm:$0xff] }
 0x2a8   :  { %5142 = vmatprep.subr.bf16.mxu1 %v5141_v32  ;;  %v5157_v32 = vpack.c.bf16 %v2773_v22, %v2765_v21  ;;  %v2820_v16 = vld [vmem:[#allocation7 + $0x1d50] sm:$0xff]  ;;  %v2835_v19 = vld [vmem:[#allocation7 + $0x1dc8] sm:$0xff]  ;;  %v2829_v21 = vld [vmem:[#allocation7 + $0x1d98] sm:$0xff] }
 0x2a9   :  { %v2837_v22 = vld [vmem:[#allocation7 + $0x1dd8] sm:$0xff] }
 0x2aa   :  { %4888 = vmatpush1.bf16.msra.mxu0 %v4887_v38  ;;  %v4903_v38 = vpack.c.bf16 %v2770_v31, %v2762_v29  ;;  %v2826_v29 = vld [vmem:[#allocation7 + $0x1d80] sm:$0xff] }
 0x2ab   :  { %5144 = vmatpush1.bf16.msra.mxu1 %v5143_v39  ;;  %4890 = vmatprep.subr.bf16.mxu0 %v4889_v40  ;;  %v5159_v39 = vpack.c.bf16 %v2772_v47, %v2764_v52  ;;  %v4905_v40 = vpack.c.bf16 %v2787_v35, %v2779_v34  ;;  %v2834_v31 = vld [vmem:[#allocation7 + $0x1dc0] sm:$0xff]  ;;  %v2828_v52 = vld [vmem:[#allocation7 + $0x1d90] sm:$0xff]  ;;  %v2843_v34 = vld [vmem:[#allocation7 + $0x1e08] sm:$0xff] }
 0x2ac   :  { %5146 = vmatprep.subr.bf16.mxu1 %v5145_v18  ;;  %v5161_v18 = vpack.c.bf16 %v2789_v37, %v2781_v57  ;;  %v2836_v47 = vld [vmem:[#allocation7 + $0x1dd0] sm:$0xff]  ;;  %v2851_v35 = vld [vmem:[#allocation7 + $0x1e48] sm:$0xff]  ;;  %v2845_v57 = vld [vmem:[#allocation7 + $0x1e18] sm:$0xff] }
 0x2ad   :  { %v2853_v37 = vld [vmem:[#allocation7 + $0x1e58] sm:$0xff] }
 0x2ae   :  { %4892 = vmatpush1.bf16.msra.mxu0 %v4891_v25  ;;  %v4907_v25 = vpack.c.bf16 %v2786_v59, %v2778_v41  ;;  %v2842_v41 = vld [vmem:[#allocation7 + $0x1e00] sm:$0xff] }
 0x2af   :  { %5148 = vmatpush1.bf16.msra.mxu1 %v5147_v53  ;;  %4894 = vmatprep.subr.bf16.mxu0 %v4893_v1  ;;  %v5163_v53 = vpack.c.bf16 %v2788_v58, %v2780_v49  ;;  %v4909_v1 = vpack.c.bf16 %v2803_v56, %v2795_v23  ;;  %v2850_v59 = vld [vmem:[#allocation7 + $0x1e40] sm:$0xff]  ;;  %v2844_v49 = vld [vmem:[#allocation7 + $0x1e10] sm:$0xff]  ;;  %v2859_v23 = vld [vmem:[#allocation7 + $0x1e88] sm:$0xff] }
 0x2b0   :  { %5150 = vmatprep.subr.bf16.mxu1 %v5149_v8  ;;  %v5165_v8 = vpack.c.bf16 %v2805_v46, %v2797_v30  ;;  %v2852_v58 = vld [vmem:[#allocation7 + $0x1e50] sm:$0xff]  ;;  %v2867_v56 = vld [vmem:[#allocation7 + $0x1ec8] sm:$0xff]  ;;  %v2861_v30 = vld [vmem:[#allocation7 + $0x1e98] sm:$0xff] }
 0x2b1   :  { %v2869_v46 = vld [vmem:[#allocation7 + $0x1ed8] sm:$0xff] }
 0x2b2   :  { %4896 = vmatpush1.bf16.msra.mxu0 %v4895_v54  ;;  %v4911_v54 = vpack.c.bf16 %v2802_v4, %v2794_v2  ;;  %v2858_v2 = vld [vmem:[#allocation7 + $0x1e80] sm:$0xff] }
 0x2b3   :  { %5152 = vmatpush1.bf16.msra.mxu1 %v5151_v10  ;;  %4898 = vmatprep.subr.bf16.mxu0 %v4897_v11  ;;  %v5167_v10 = vpack.c.bf16 %v2804_v6, %v2796_v5  ;;  %v4913_v11 = vpack.c.bf16 %v2819_v9, %v2811_v7  ;;  %v2866_v4 = vld [vmem:[#allocation7 + $0x1ec0] sm:$0xff]  ;;  %v2860_v5 = vld [vmem:[#allocation7 + $0x1e90] sm:$0xff]  ;;  %v2875_v7 = vld [vmem:[#allocation7 + $0x1f08] sm:$0xff] }
 0x2b4   :  { %5154 = vmatprep.subr.bf16.mxu1 %v5153_v48  ;;  %v5169_v48 = vpack.c.bf16 %v2821_v51, %v2813_v15  ;;  %v2868_v6 = vld [vmem:[#allocation7 + $0x1ed0] sm:$0xff]  ;;  %v2883_v9 = vld [vmem:[#allocation7 + $0x1f48] sm:$0xff]  ;;  %v2877_v15 = vld [vmem:[#allocation7 + $0x1f18] sm:$0xff] }
 0x2b5   :  { %v2885_v51 = vld [vmem:[#allocation7 + $0x1f58] sm:$0xff] }
 0x2b6   :  { %4900 = vmatpush1.bf16.msra.mxu0 %v4899_v24  ;;  %v4915_v24 = vpack.c.bf16 %v2818_v55, %v2810_v12  ;;  %v2874_v12 = vld [vmem:[#allocation7 + $0x1f00] sm:$0xff] }
 0x2b7   :  { %5156 = vmatpush1.bf16.msra.mxu1 %v5155_v27  ;;  %4902 = vmatprep.subr.bf16.mxu0 %v4901_v28  ;;  %v5171_v27 = vpack.c.bf16 %v2820_v16, %v2812_v13  ;;  %v4917_v28 = vpack.c.bf16 %v2835_v19, %v2827_v17  ;;  %v2882_v55 = vld [vmem:[#allocation7 + $0x1f40] sm:$0xff]  ;;  %v2876_v13 = vld [vmem:[#allocation7 + $0x1f10] sm:$0xff]  ;;  %v2891_v17 = vld [vmem:[#allocation7 + $0x1f88] sm:$0xff] }
 0x2b8   :  { %5158 = vmatprep.subr.bf16.mxu1 %v5157_v32  ;;  %v5173_v32 = vpack.c.bf16 %v2837_v22, %v2829_v21  ;;  %v2884_v16 = vld [vmem:[#allocation7 + $0x1f50] sm:$0xff]  ;;  %v2899_v19 = vld [vmem:[#allocation7 + $0x1fc8] sm:$0xff]  ;;  %v2893_v21 = vld [vmem:[#allocation7 + $0x1f98] sm:$0xff] }
 0x2b9   :  { %v2901_v22 = vld [vmem:[#allocation7 + $0x1fd8] sm:$0xff] }
 0x2ba   :  { %4904 = vmatpush1.bf16.msra.mxu0 %v4903_v38  ;;  %v4919_v38 = vpack.c.bf16 %v2834_v31, %v2826_v29  ;;  %v2890_v29 = vld [vmem:[#allocation7 + $0x1f80] sm:$0xff] }
 0x2bb   :  { %5160 = vmatpush1.bf16.msra.mxu1 %v5159_v39  ;;  %4906 = vmatprep.subr.bf16.mxu0 %v4905_v40  ;;  %v5175_v39 = vpack.c.bf16 %v2836_v47, %v2828_v52  ;;  %v4921_v40 = vpack.c.bf16 %v2851_v35, %v2843_v34  ;;  %v2898_v31 = vld [vmem:[#allocation7 + $0x1fc0] sm:$0xff]  ;;  %v2892_v52 = vld [vmem:[#allocation7 + $0x1f90] sm:$0xff]  ;;  %v1887_v34 = vld [vmem:[#allocation7 + $0x28] sm:$0xff] }
 0x2bc   :  { %5162 = vmatprep.subr.bf16.mxu1 %v5161_v18  ;;  %v5177_v18 = vpack.c.bf16 %v2853_v37, %v2845_v57  ;;  %v2900_v47 = vld [vmem:[#allocation7 + $0x1fd0] sm:$0xff]  ;;  %v1895_v35 = vld [vmem:[#allocation7 + $0x68] sm:$0xff]  ;;  %v1889_v57 = vld [vmem:[#allocation7 + $0x38] sm:$0xff] }
 0x2bd   :  { %v1897_v37 = vld [vmem:[#allocation7 + $0x78] sm:$0xff] }
 0x2be   :  { %4908 = vmatpush1.bf16.msra.mxu0 %v4907_v25  ;;  %v4923_v25 = vpack.c.bf16 %v2850_v59, %v2842_v41  ;;  %v1886_v41 = vld [vmem:[#allocation7 + $0x20] sm:$0xff] }
 0x2bf   :  { %5164 = vmatpush1.bf16.msra.mxu1 %v5163_v53  ;;  %4910 = vmatprep.subr.bf16.mxu0 %v4909_v1  ;;  %v5179_v53 = vpack.c.bf16 %v2852_v58, %v2844_v49  ;;  %v4925_v1 = vpack.c.bf16 %v2867_v56, %v2859_v23  ;;  %v1894_v59 = vld [vmem:[#allocation7 + $0x60] sm:$0xff]  ;;  %v5449_v49 = vpack.c.bf16 %v1897_v37, %v1889_v57  ;;  %v1896_v58 = vld [vmem:[#allocation7 + $0x70] sm:$0xff]  ;;  %v1903_v23 = vld [vmem:[#allocation7 + $0xa8] sm:$0xff] }
 0x2c0   :  { %5166 = vmatprep.subr.bf16.mxu1 %v5165_v8  ;;  %v5181_v8 = vpack.c.bf16 %v2869_v46, %v2861_v30  ;;  %v1911_v56 = vld [vmem:[#allocation7 + $0xe8] sm:$0xff]  ;;  %v5195_v30 = vpack.c.bf16 %v1894_v59, %v1886_v41  ;;  %v1905_v46 = vld [vmem:[#allocation7 + $0xb8] sm:$0xff]  ;;  %v1958_v41 = vld [vmem:[#allocation7 + $0x260] sm:$0xff] }
 0x2c1   :  { %v1961_v57 = vld [vmem:[#allocation7 + $0x278] sm:$0xff]  ;;  %v1952_v59 = vld [vmem:[#allocation7 + $0x230] sm:$0xff] }
 0x2c2   :  { %4912 = vmatpush1.bf16.msra.mxu0 %v4911_v54  ;;  %v4927_v54 = vpack.c.bf16 %v2866_v4, %v2858_v2  ;;  %v1902_v2 = vld [vmem:[#allocation7 + $0xa0] sm:$0xff] }
 0x2c3   :  { %5168 = vmatpush1.bf16.msra.mxu1 %v5167_v10  ;;  %4914 = vmatprep.subr.bf16.mxu0 %v4913_v11  ;;  %v5183_v10 = vpack.c.bf16 %v2868_v6, %v2860_v5  ;;  %v4929_v11 = vpack.c.bf16 %v2883_v9, %v2875_v7  ;;  %v1910_v4 = vld [vmem:[#allocation7 + $0xe0] sm:$0xff]  ;;  %v1904_v5 = vld [vmem:[#allocation7 + $0xb0] sm:$0xff]  ;;  %v1919_v7 = vld [vmem:[#allocation7 + $0x128] sm:$0xff] }
 0x2c4   :  { %5170 = vmatprep.subr.bf16.mxu1 %v5169_v48  ;;  %v5185_v48 = vpack.c.bf16 %v2885_v51, %v2877_v15  ;;  %v1912_v6 = vld [vmem:[#allocation7 + $0xf0] sm:$0xff]  ;;  %v1927_v9 = vld [vmem:[#allocation7 + $0x168] sm:$0xff]  ;;  %v1921_v51 = vld [vmem:[#allocation7 + $0x138] sm:$0xff] }
 0x2c6   :  { %4916 = vmatpush1.bf16.msra.mxu0 %v4915_v24  ;;  %v4931_v24 = vpack.c.bf16 %v2882_v55, %v2874_v12  ;;  %v1918_v12 = vld [vmem:[#allocation7 + $0x120] sm:$0xff] }
 0x2c7   :  { %5172 = vmatpush1.bf16.msra.mxu1 %v5171_v27  ;;  %4918 = vmatprep.subr.bf16.mxu0 %v4917_v28  ;;  %v5187_v27 = vpack.c.bf16 %v2884_v16, %v2876_v13  ;;  %v4933_v28 = vpack.c.bf16 %v2899_v19, %v2891_v17  ;;  %v1926_v55 = vld [vmem:[#allocation7 + $0x160] sm:$0xff]  ;;  %v1920_v13 = vld [vmem:[#allocation7 + $0x130] sm:$0xff]  ;;  %v1935_v17 = vld [vmem:[#allocation7 + $0x1a8] sm:$0xff] }
 0x2c8   :  { %5174 = vmatprep.subr.bf16.mxu1 %v5173_v32  ;;  %v5189_v32 = vpack.c.bf16 %v2901_v22, %v2893_v21  ;;  %v1928_v16 = vld [vmem:[#allocation7 + $0x170] sm:$0xff]  ;;  %v1943_v19 = vld [vmem:[#allocation7 + $0x1e8] sm:$0xff]  ;;  %v1937_v21 = vld [vmem:[#allocation7 + $0x1b8] sm:$0xff] }
 0x2c9   :  { %v1945_v22 = vld [vmem:[#allocation7 + $0x1f8] sm:$0xff] }
 0x2ca   :  { %4920 = vmatpush1.bf16.msra.mxu0 %v4919_v38  ;;  %v4935_v38 = vpack.c.bf16 %v2898_v31, %v2890_v29  ;;  %v1934_v29 = vld [vmem:[#allocation7 + $0x1a0] sm:$0xff] }
 0x2cb   :  { %5176 = vmatpush1.bf16.msra.mxu1 %v5175_v39  ;;  %4922 = vmatprep.subr.bf16.mxu0 %v4921_v40  ;;  %v5191_v39 = vpack.c.bf16 %v2900_v47, %v2892_v52  ;;  %v5193_v40 = vpack.c.bf16 %v1895_v35, %v1887_v34  ;;  %v1942_v31 = vld [vmem:[#allocation7 + $0x1e0] sm:$0xff]  ;;  %v1936_v52 = vld [vmem:[#allocation7 + $0x1b0] sm:$0xff]  ;;  %v1951_v47 = vld [vmem:[#allocation7 + $0x228] sm:$0xff] }
 0x2cc   :  { %5178 = vmatprep.subr.bf16.mxu1 %v5177_v18  ;;  %v1888_v18 = vld [vmem:[#allocation7 + $0x30] sm:$0xff]  ;;  %v1959_v34 = vld [vmem:[#allocation7 + $0x268] sm:$0xff]  ;;  %v1953_v35 = vld [vmem:[#allocation7 + $0x238] sm:$0xff]  ;;  %v5207_v37 = vpack.c.bf16 %v1942_v31, %v1934_v29 }
 0x2cd   :  { %v2006_v29 = vld [vmem:[#allocation7 + $0x3e0] sm:$0xff]  ;;  %v2000_v31 = vld [vmem:[#allocation7 + $0x3b0] sm:$0xff] }
 0x2ce   :  { %4924 = vmatpush1.bf16.msra.mxu0 %v4923_v25  ;;  %v1913_v25 = vld [vmem:[#allocation7 + $0xf8] sm:$0xff] }
 0x2cf   :  { %5180 = vmatpush1.bf16.msra.mxu1 %v5179_v53  ;;  %4926 = vmatprep.subr.bf16.mxu0 %v4925_v1  ;;  %v6198_v53 = vmax.f32 %v6171_v44, 0.0  ;;  %v5451_v1 = vpack.c.bf16 %v1896_v58, %v1888_v18  ;;  %v5453_v15 = vpack.c.bf16 %v1913_v25, %v1905_v46  ;;  %v5199_v44 = vpack.c.bf16 %v1910_v4, %v1902_v2  ;;  %v1960_v18 = vld [vmem:[#allocation7 + $0x270] sm:$0xff]  ;;  %v1967_v58 = vld [vmem:[#allocation7 + $0x2a8] sm:$0xff]  ;;  %v1966_v2 = vld [vmem:[#allocation7 + $0x2a0] sm:$0xff] }
 0x2d0   :  { %5182 = vmatprep.subr.bf16.mxu1 %v5181_v8  ;;  %v5197_v8 = vpack.c.bf16 %v1911_v56, %v1903_v23  ;;  %v1975_v23 = vld [vmem:[#allocation7 + $0x2e8] sm:$0xff]  ;;  %v1969_v56 = vld [vmem:[#allocation7 + $0x2b8] sm:$0xff]  ;;  %v5467_v25 = vpack.c.bf16 %v1960_v18, %v1952_v59  ;;  %v1974_v4 = vld [vmem:[#allocation7 + $0x2e0] sm:$0xff] }
 0x2d1   :  { %v2031_v18 = vld [vmem:[#allocation7 + $0x4a8] sm:$0xff] }
 0x2d2   :  { %4928 = vmatpush1.bf16.msra.mxu0 %v4927_v54  ;;  %v1929_v54 = vld [vmem:[#allocation7 + $0x178] sm:$0xff] }
 0x2d3   :  { %5184 = vmatpush1.bf16.msra.mxu1 %v5183_v10  ;;  %4930 = vmatprep.subr.bf16.mxu0 %v4929_v11  ;;  %v5455_v10 = vpack.c.bf16 %v1912_v6, %v1904_v5  ;;  %v5201_v11 = vpack.c.bf16 %v1927_v9, %v1919_v7  ;;  %v1968_v5 = vld [vmem:[#allocation7 + $0x2b0] sm:$0xff]  ;;  %v1983_v7 = vld [vmem:[#allocation7 + $0x328] sm:$0xff] }
 0x2d4   :  { %5186 = vmatprep.subr.bf16.mxu1 %v5185_v48  ;;  %v5457_v48 = vpack.c.bf16 %v1929_v54, %v1921_v51  ;;  %v1976_v6 = vld [vmem:[#allocation7 + $0x2f0] sm:$0xff]  ;;  %v1991_v9 = vld [vmem:[#allocation7 + $0x368] sm:$0xff]  ;;  %v1993_v51 = vld [vmem:[#allocation7 + $0x378] sm:$0xff]  ;;  %v5215_v54 = vpack.c.bf16 %v1974_v4, %v1966_v2 }
 0x2d5   :  { %v2038_v2 = vld [vmem:[#allocation7 + $0x4e0] sm:$0xff]  ;;  %v2032_v4 = vld [vmem:[#allocation7 + $0x4b0] sm:$0xff] }
 0x2d6   :  { %4932 = vmatpush1.bf16.msra.mxu0 %v4931_v24  ;;  %v5203_v24 = vpack.c.bf16 %v1926_v55, %v1918_v12  ;;  %v1990_v12 = vld [vmem:[#allocation7 + $0x360] sm:$0xff]  ;;  %v1984_v55 = vld [vmem:[#allocation7 + $0x330] sm:$0xff] }
 0x2d7   :  { %5188 = vmatpush1.bf16.msra.mxu1 %v5187_v27  ;;  %4934 = vmatprep.subr.bf16.mxu0 %v4933_v28  ;;  %v5459_v27 = vpack.c.bf16 %v1928_v16, %v1920_v13  ;;  %v5205_v28 = vpack.c.bf16 %v1943_v19, %v1935_v17  ;;  %v1999_v16 = vld [vmem:[#allocation7 + $0x3a8] sm:$0xff]  ;;  %v2001_v19 = vld [vmem:[#allocation7 + $0x3b8] sm:$0xff] }
 0x2d8   :  { %5190 = vmatprep.subr.bf16.mxu1 %v5189_v32  ;;  %v5461_v32 = vpack.c.bf16 %v1945_v22, %v1937_v21  ;;  %v2007_v17 = vld [vmem:[#allocation7 + $0x3e8] sm:$0xff]  ;;  %v2009_v21 = vld [vmem:[#allocation7 + $0x3f8] sm:$0xff] }
 0x2da   :  { %4936 = vmatpush1.bf16.msra.mxu0 %v4935_v38 }
 0x2db   :  { %5192 = vmatpush1.bf16.msra.mxu1 %v5191_v39  ;;  %5194 = vmatprep.subr.bf16.mxu0 %v5193_v40  ;;  %v5209_v39 = vpack.c.bf16 %v1959_v34, %v1951_v47  ;;  %v1950_v40 = vld [vmem:[#allocation7 + $0x220] sm:$0xff]  ;;  %v2023_v47 = vld [vmem:[#allocation7 + $0x468] sm:$0xff]  ;;  %v2017_v34 = vld [vmem:[#allocation7 + $0x438] sm:$0xff] }
 0x2dc   :  { %5450 = vmatprep.subr.bf16.mxu1 %v5449_v49  ;;  %v5465_v49 = vpack.c.bf16 %v1961_v57, %v1953_v35  ;;  %v5211_v46 = vpack.c.bf16 %v1958_v41, %v1950_v40  ;;  %v2025_v35 = vld [vmem:[#allocation7 + $0x478] sm:$0xff]  ;;  %v2022_v40 = vld [vmem:[#allocation7 + $0x460] sm:$0xff]  ;;  %v2016_v41 = vld [vmem:[#allocation7 + $0x430] sm:$0xff] }
 0x2dd   :  { %3226 = vmatmul.mubr.f32.vlgmr.msra.gmra.mrb[16].mxu0 %v6198_v53  ;;  %v5481_v59 = vpack.c.bf16 %v2025_v35, %v2017_v34  ;;  %v2089_v34 = vld [vmem:[#allocation7 + $0x678] sm:$0xff] }
 0x2de   :  { %3510 = vmatmul.mubr.f32.vlgmr.msra.gmra.mrb[16].mxu1 %v6198_v53  ;;  %5196 = vmatpush1.bf16.msra.mxu0 %v5195_v30  ;;  %v1977_v30 = vld [vmem:[#allocation7 + $0x2f8] sm:$0xff] }
 0x2df   :  { %3580 = vmatprep.mubr.f32.mxu0 %v6129_v33  ;;  %5452 = vmatpush1.bf16.msra.mxu1 %v5451_v1  ;;  %v5213_v1 = vpack.c.bf16 %v1975_v23, %v1967_v58  ;;  %v2039_v58 = vld [vmem:[#allocation7 + $0x4e8] sm:$0xff]  ;;  %v2033_v23 = vld [vmem:[#allocation7 + $0x4b8] sm:$0xff] }
 0x2e0   :  { %3864 = vmatprep.mubr.f32.mxu1 %v6129_v33  ;;  %5198 = vmatprep.subr.bf16.mxu0 %v5197_v8  ;;  %v1944_v33 = vld [vmem:[#allocation7 + $0x1f0] sm:$0xff]  ;;  %v5469_v8 = vpack.c.bf16 %v1977_v30, %v1969_v56  ;;  %v2041_v56 = vld [vmem:[#allocation7 + $0x4f8] sm:$0xff] }
 0x2e1   :  { %5454 = vmatprep.subr.bf16.mxu1 %v5453_v15  ;;  %v5463_v38 = vpack.c.bf16 %v1944_v33, %v1936_v52  ;;  %v1985_v15 = vld [vmem:[#allocation7 + $0x338] sm:$0xff]  ;;  %v5477_v52 = vpack.c.bf16 %v2009_v21, %v2001_v19  ;;  %v2015_v33 = vld [vmem:[#allocation7 + $0x428] sm:$0xff] }
 0x2e2   :  { %5200 = vmatpush1.bf16.msra.mxu0 %v5199_v44  ;;  %v5471_v44 = vpack.c.bf16 %v1976_v6, %v1968_v5  ;;  %v5473_v13 = vpack.c.bf16 %v1993_v51, %v1985_v15  ;;  %v5485_v5 = vpack.c.bf16 %v2041_v56, %v2033_v23  ;;  %v2047_v6 = vld [vmem:[#allocation7 + $0x528] sm:$0xff]  ;;  %v2057_v15 = vld [vmem:[#allocation7 + $0x578] sm:$0xff] }
 0x2e3   :  { %5456 = vmatpush1.bf16.msra.mxu1 %v5455_v10  ;;  %5202 = vmatprep.subr.bf16.mxu0 %v5201_v11  ;;  %v5217_v10 = vpack.c.bf16 %v1991_v9, %v1983_v7  ;;  %v1982_v11 = vld [vmem:[#allocation7 + $0x320] sm:$0xff]  ;;  %v2055_v7 = vld [vmem:[#allocation7 + $0x568] sm:$0xff]  ;;  %v2049_v9 = vld [vmem:[#allocation7 + $0x538] sm:$0xff] }
 0x2e4   :  { %5458 = vmatprep.subr.bf16.mxu1 %v5457_v48  ;;  %v1992_v48 = vld [vmem:[#allocation7 + $0x370] sm:$0xff]  ;;  %v5219_v22 = vpack.c.bf16 %v1990_v12, %v1982_v11  ;;  %v2054_v11 = vld [vmem:[#allocation7 + $0x560] sm:$0xff]  ;;  %v2073_v19 = vld [vmem:[#allocation7 + $0x5f8] sm:$0xff] }
 0x2e5   :  { %v2048_v12 = vld [vmem:[#allocation7 + $0x530] sm:$0xff]  ;;  %v2105_v23 = vld [vmem:[#allocation7 + $0x6f8] sm:$0xff] }
 0x2e6   :  { %5204 = vmatpush1.bf16.msra.mxu0 %v5203_v24  ;;  %v5475_v24 = vpack.c.bf16 %v1992_v48, %v1984_v55  ;;  %v5489_v55 = vpack.c.bf16 %v2057_v15, %v2049_v9  ;;  %v2063_v48 = vld [vmem:[#allocation7 + $0x5a8] sm:$0xff]  ;;  %v2121_v9 = vld [vmem:[#allocation7 + $0x778] sm:$0xff] }
 0x2e7   :  { %5460 = vmatpush1.bf16.msra.mxu1 %v5459_v27  ;;  %5206 = vmatprep.subr.bf16.mxu0 %v5205_v28  ;;  %v5221_v27 = vpack.c.bf16 %v2007_v17, %v1999_v16  ;;  %v1998_v28 = vld [vmem:[#allocation7 + $0x3a0] sm:$0xff]  ;;  %v2071_v16 = vld [vmem:[#allocation7 + $0x5e8] sm:$0xff]  ;;  %v2065_v17 = vld [vmem:[#allocation7 + $0x5b8] sm:$0xff] }
 0x2e8   :  { %5462 = vmatprep.subr.bf16.mxu1 %v5461_v32  ;;  %v2008_v32 = vld [vmem:[#allocation7 + $0x3f0] sm:$0xff]  ;;  %v5223_v57 = vpack.c.bf16 %v2006_v29, %v1998_v28  ;;  %v2070_v28 = vld [vmem:[#allocation7 + $0x5e0] sm:$0xff] }
 0x2e9   :  { %v2064_v29 = vld [vmem:[#allocation7 + $0x5b0] sm:$0xff] }
 0x2ea   :  { %5208 = vmatpush1.bf16.msra.mxu0 %v5207_v37  ;;  %v5479_v37 = vpack.c.bf16 %v2008_v32, %v2000_v31  ;;  %v5493_v31 = vpack.c.bf16 %v2073_v19, %v2065_v17  ;;  %v2079_v32 = vld [vmem:[#allocation7 + $0x628] sm:$0xff]  ;;  %v2137_v17 = vld [vmem:[#allocation7 + $0x7f8] sm:$0xff] }
 0x2eb   :  { %5464 = vmatpush1.bf16.msra.mxu1 %v5463_v38  ;;  %5210 = vmatprep.subr.bf16.mxu0 %v5209_v39  ;;  %v5225_v38 = vpack.c.bf16 %v2023_v47, %v2015_v33  ;;  %v2014_v39 = vld [vmem:[#allocation7 + $0x420] sm:$0xff]  ;;  %v2087_v33 = vld [vmem:[#allocation7 + $0x668] sm:$0xff]  ;;  %v2081_v47 = vld [vmem:[#allocation7 + $0x638] sm:$0xff] }
 0x2ec   :  { %5466 = vmatprep.subr.bf16.mxu1 %v5465_v49  ;;  %v2024_v49 = vld [vmem:[#allocation7 + $0x470] sm:$0xff]  ;;  %v5227_v30 = vpack.c.bf16 %v2022_v40, %v2014_v39  ;;  %v2086_v39 = vld [vmem:[#allocation7 + $0x660] sm:$0xff] }
 0x2ed   :  { %v2080_v40 = vld [vmem:[#allocation7 + $0x630] sm:$0xff] }
 0x2ee   :  { %5212 = vmatpush1.bf16.msra.mxu0 %v5211_v46  ;;  %v5483_v46 = vpack.c.bf16 %v2024_v49, %v2016_v41  ;;  %v5497_v41 = vpack.c.bf16 %v2089_v34, %v2081_v47  ;;  %v2095_v49 = vld [vmem:[#allocation7 + $0x6a8] sm:$0xff]  ;;  %v2153_v47 = vld [vmem:[#allocation7 + $0x878] sm:$0xff] }
 0x2ef   :  { %5468 = vmatpush1.bf16.msra.mxu1 %v5467_v25  ;;  %5214 = vmatprep.subr.bf16.mxu0 %v5213_v1  ;;  %v5229_v25 = vpack.c.bf16 %v2039_v58, %v2031_v18  ;;  %v2030_v1 = vld [vmem:[#allocation7 + $0x4a0] sm:$0xff]  ;;  %v2103_v18 = vld [vmem:[#allocation7 + $0x6e8] sm:$0xff]  ;;  %v2097_v58 = vld [vmem:[#allocation7 + $0x6b8] sm:$0xff] }
 0x2f0   :  { %5470 = vmatprep.subr.bf16.mxu1 %v5469_v8  ;;  %v2040_v8 = vld [vmem:[#allocation7 + $0x4f0] sm:$0xff]  ;;  %v5231_v51 = vpack.c.bf16 %v2038_v2, %v2030_v1  ;;  %v2102_v1 = vld [vmem:[#allocation7 + $0x6e0] sm:$0xff] }
 0x2f1   :  { %v2096_v2 = vld [vmem:[#allocation7 + $0x6b0] sm:$0xff] }
 0x2f2   :  { %5216 = vmatpush1.bf16.msra.mxu0 %v5215_v54  ;;  %v5487_v54 = vpack.c.bf16 %v2040_v8, %v2032_v4  ;;  %v5501_v4 = vpack.c.bf16 %v2105_v23, %v2097_v58  ;;  %v2111_v8 = vld [vmem:[#allocation7 + $0x728] sm:$0xff]  ;;  %v2161_v58 = vld [vmem:[#allocation7 + $0x8b8] sm:$0xff] }
 0x2f3   :  { %5472 = vmatpush1.bf16.msra.mxu1 %v5471_v44  ;;  %5218 = vmatprep.subr.bf16.mxu0 %v5217_v10  ;;  %v5233_v44 = vpack.c.bf16 %v2055_v7, %v2047_v6  ;;  %v2046_v10 = vld [vmem:[#allocation7 + $0x520] sm:$0xff]  ;;  %v2119_v6 = vld [vmem:[#allocation7 + $0x768] sm:$0xff]  ;;  %v2113_v7 = vld [vmem:[#allocation7 + $0x738] sm:$0xff] }
 0x2f4   :  { %5474 = vmatprep.subr.bf16.mxu1 %v5473_v13  ;;  %v2056_v13 = vld [vmem:[#allocation7 + $0x570] sm:$0xff]  ;;  %v5235_v21 = vpack.c.bf16 %v2054_v11, %v2046_v10  ;;  %v2118_v10 = vld [vmem:[#allocation7 + $0x760] sm:$0xff]  ;;  %v2169_v23 = vld [vmem:[#allocation7 + $0x8f8] sm:$0xff] }
 0x2f5   :  { %v2112_v11 = vld [vmem:[#allocation7 + $0x730] sm:$0xff] }
 0x2f6   :  { %5220 = vmatpush1.bf16.msra.mxu0 %v5219_v22  ;;  %v5491_v22 = vpack.c.bf16 %v2056_v13, %v2048_v12  ;;  %v5505_v12 = vpack.c.bf16 %v2121_v9, %v2113_v7  ;;  %v2127_v13 = vld [vmem:[#allocation7 + $0x7a8] sm:$0xff]  ;;  %v2185_v7 = vld [vmem:[#allocation7 + $0x978] sm:$0xff] }
 0x2f7   :  { %5476 = vmatpush1.bf16.msra.mxu1 %v5475_v24  ;;  %5222 = vmatprep.subr.bf16.mxu0 %v5221_v27  ;;  %v5237_v24 = vpack.c.bf16 %v2071_v16, %v2063_v48  ;;  %v2062_v27 = vld [vmem:[#allocation7 + $0x5a0] sm:$0xff]  ;;  %v2135_v48 = vld [vmem:[#allocation7 + $0x7e8] sm:$0xff]  ;;  %v2129_v16 = vld [vmem:[#allocation7 + $0x7b8] sm:$0xff] }
 0x2f8   :  { %5478 = vmatprep.subr.bf16.mxu1 %v5477_v52  ;;  %v2072_v52 = vld [vmem:[#allocation7 + $0x5f0] sm:$0xff]  ;;  %v5239_v35 = vpack.c.bf16 %v2070_v28, %v2062_v27  ;;  %v2134_v27 = vld [vmem:[#allocation7 + $0x7e0] sm:$0xff] }
 0x2f9   :  { %v2128_v28 = vld [vmem:[#allocation7 + $0x7b0] sm:$0xff] }
 0x2fa   :  { %5224 = vmatpush1.bf16.msra.mxu0 %v5223_v57  ;;  %v5495_v57 = vpack.c.bf16 %v2072_v52, %v2064_v29  ;;  %v5509_v29 = vpack.c.bf16 %v2137_v17, %v2129_v16  ;;  %v2143_v52 = vld [vmem:[#allocation7 + $0x828] sm:$0xff] }
 0x2fb   :  { %5480 = vmatpush1.bf16.msra.mxu1 %v5479_v37  ;;  %5226 = vmatprep.subr.bf16.mxu0 %v5225_v38  ;;  %v5241_v37 = vpack.c.bf16 %v2087_v33, %v2079_v32  ;;  %v2078_v38 = vld [vmem:[#allocation7 + $0x620] sm:$0xff]  ;;  %v2151_v32 = vld [vmem:[#allocation7 + $0x868] sm:$0xff]  ;;  %v2145_v33 = vld [vmem:[#allocation7 + $0x838] sm:$0xff] }
 0x2fc   :  { %5482 = vmatprep.subr.bf16.mxu1 %v5481_v59  ;;  %v2088_v59 = vld [vmem:[#allocation7 + $0x670] sm:$0xff]  ;;  %v5243_v56 = vpack.c.bf16 %v2086_v39, %v2078_v38  ;;  %v2150_v38 = vld [vmem:[#allocation7 + $0x860] sm:$0xff]  ;;  %v5513_v39 = vpack.c.bf16 %v2153_v47, %v2145_v33 }
 0x2fe   :  { %5228 = vmatpush1.bf16.msra.mxu0 %v5227_v30  ;;  %v5499_v30 = vpack.c.bf16 %v2088_v59, %v2080_v40  ;;  %v2144_v40 = vld [vmem:[#allocation7 + $0x830] sm:$0xff]  ;;  %v2159_v59 = vld [vmem:[#allocation7 + $0x8a8] sm:$0xff] }
 0x2ff   :  { %5484 = vmatpush1.bf16.msra.mxu1 %v5483_v46  ;;  %5230 = vmatprep.subr.bf16.mxu0 %v5229_v25  ;;  %v5245_v46 = vpack.c.bf16 %v2103_v18, %v2095_v49  ;;  %v2094_v25 = vld [vmem:[#allocation7 + $0x6a0] sm:$0xff]  ;;  %v2167_v49 = vld [vmem:[#allocation7 + $0x8e8] sm:$0xff] }
 0x300   :  { %5486 = vmatprep.subr.bf16.mxu1 %v5485_v5  ;;  %v2104_v5 = vld [vmem:[#allocation7 + $0x6f0] sm:$0xff]  ;;  %v5247_v15 = vpack.c.bf16 %v2102_v1, %v2094_v25  ;;  %v5261_v1 = vpack.c.bf16 %v2167_v49, %v2159_v59  ;;  %v2233_v59 = vld [vmem:[#allocation7 + $0xaf8] sm:$0xff] }
 0x301   :  { %v2160_v25 = vld [vmem:[#allocation7 + $0x8b0] sm:$0xff] }
 0x302   :  { %5232 = vmatpush1.bf16.msra.mxu0 %v5231_v51  ;;  %v5503_v51 = vpack.c.bf16 %v2104_v5, %v2096_v2  ;;  %v2168_v2 = vld [vmem:[#allocation7 + $0x8f0] sm:$0xff]  ;;  %v2183_v5 = vld [vmem:[#allocation7 + $0x968] sm:$0xff] }
 0x303   :  { %5488 = vmatpush1.bf16.msra.mxu1 %v5487_v54  ;;  %5234 = vmatprep.subr.bf16.mxu0 %v5233_v44  ;;  %v5249_v54 = vpack.c.bf16 %v2119_v6, %v2111_v8  ;;  %v2110_v44 = vld [vmem:[#allocation7 + $0x720] sm:$0xff]  ;;  %v5517_v8 = vpack.c.bf16 %v2169_v23, %v2161_v58  ;;  %v2177_v6 = vld [vmem:[#allocation7 + $0x938] sm:$0xff] }
 0x304   :  { %5490 = vmatprep.subr.bf16.mxu1 %v5489_v55  ;;  %v2120_v55 = vld [vmem:[#allocation7 + $0x770] sm:$0xff]  ;;  %v5251_v19 = vpack.c.bf16 %v2118_v10, %v2110_v44  ;;  %v2182_v44 = vld [vmem:[#allocation7 + $0x960] sm:$0xff] }
 0x305   :  { %v2176_v10 = vld [vmem:[#allocation7 + $0x930] sm:$0xff]  ;;  %v2222_v23 = vld [vmem:[#allocation7 + $0xaa0] sm:$0xff] }
 0x306   :  { %5236 = vmatpush1.bf16.msra.mxu0 %v5235_v21  ;;  %v5507_v21 = vpack.c.bf16 %v2120_v55, %v2112_v11  ;;  %v5521_v11 = vpack.c.bf16 %v2185_v7, %v2177_v6  ;;  %v2191_v55 = vld [vmem:[#allocation7 + $0x9a8] sm:$0xff] }
 0x307   :  { %5492 = vmatpush1.bf16.msra.mxu1 %v5491_v22  ;;  %5238 = vmatprep.subr.bf16.mxu0 %v5237_v24  ;;  %v5253_v22 = vpack.c.bf16 %v2135_v48, %v2127_v13  ;;  %v2126_v24 = vld [vmem:[#allocation7 + $0x7a0] sm:$0xff]  ;;  %v2199_v13 = vld [vmem:[#allocation7 + $0x9e8] sm:$0xff]  ;;  %v2193_v48 = vld [vmem:[#allocation7 + $0x9b8] sm:$0xff] }
 0x308   :  { %5494 = vmatprep.subr.bf16.mxu1 %v5493_v31  ;;  %v2136_v31 = vld [vmem:[#allocation7 + $0x7f0] sm:$0xff]  ;;  %v5255_v34 = vpack.c.bf16 %v2134_v27, %v2126_v24 }
 0x309   :  { %v2192_v24 = vld [vmem:[#allocation7 + $0x9b0] sm:$0xff] }
 0x30a   :  { %5240 = vmatpush1.bf16.msra.mxu0 %v5239_v35  ;;  %v5511_v35 = vpack.c.bf16 %v2136_v31, %v2128_v28  ;;  %v2207_v28 = vld [vmem:[#allocation7 + $0xa28] sm:$0xff]  ;;  %v2209_v31 = vld [vmem:[#allocation7 + $0xa38] sm:$0xff] }
 0x30b   :  { %5496 = vmatpush1.bf16.msra.mxu1 %v5495_v57  ;;  %5242 = vmatprep.subr.bf16.mxu0 %v5241_v37  ;;  %v5257_v57 = vpack.c.bf16 %v2151_v32, %v2143_v52  ;;  %v2142_v37 = vld [vmem:[#allocation7 + $0x820] sm:$0xff]  ;;  %v2217_v52 = vld [vmem:[#allocation7 + $0xa78] sm:$0xff] }
 0x30c   :  { %5498 = vmatprep.subr.bf16.mxu1 %v5497_v41  ;;  %v2152_v41 = vld [vmem:[#allocation7 + $0x870] sm:$0xff]  ;;  %v5259_v18 = vpack.c.bf16 %v2150_v38, %v2142_v37  ;;  %v5529_v37 = vpack.c.bf16 %v2217_v52, %v2209_v31 }
 0x30d   :  { %v2216_v38 = vld [vmem:[#allocation7 + $0xa70] sm:$0xff] }
 0x30e   :  { %5244 = vmatpush1.bf16.msra.mxu0 %v5243_v56  ;;  %v5515_v56 = vpack.c.bf16 %v2152_v41, %v2144_v40  ;;  %v2231_v40 = vld [vmem:[#allocation7 + $0xae8] sm:$0xff]  ;;  %v2225_v41 = vld [vmem:[#allocation7 + $0xab8] sm:$0xff] }
 0x30f   :  { %5500 = vmatpush1.bf16.msra.mxu1 %v5499_v30  ;;  %5246 = vmatprep.subr.bf16.mxu0 %v5245_v46  ;;  %v2158_v30 = vld [vmem:[#allocation7 + $0x8a0] sm:$0xff] }
 0x310   :  { %5502 = vmatprep.subr.bf16.mxu1 %v5501_v4  ;;  %v2166_v46 = vld [vmem:[#allocation7 + $0x8e0] sm:$0xff]  ;;  %v2175_v4 = vld [vmem:[#allocation7 + $0x928] sm:$0xff] }
 0x311   :  { %v5263_v9 = vpack.c.bf16 %v2166_v46, %v2158_v30  ;;  %v2224_v30 = vld [vmem:[#allocation7 + $0xab0] sm:$0xff]  ;;  %v5533_v46 = vpack.c.bf16 %v2233_v59, %v2225_v41 }
 0x312   :  { %5248 = vmatpush1.bf16.msra.mxu0 %v5247_v15  ;;  %v5519_v15 = vpack.c.bf16 %v2168_v2, %v2160_v25  ;;  %v2232_v25 = vld [vmem:[#allocation7 + $0xaf0] sm:$0xff]  ;;  %v2247_v2 = vld [vmem:[#allocation7 + $0xb68] sm:$0xff] }
 0x313   :  { %5504 = vmatpush1.bf16.msra.mxu1 %v5503_v51  ;;  %5250 = vmatprep.subr.bf16.mxu0 %v5249_v54  ;;  %v5265_v51 = vpack.c.bf16 %v2183_v5, %v2175_v4  ;;  %v2174_v54 = vld [vmem:[#allocation7 + $0x920] sm:$0xff]  ;;  %v2241_v4 = vld [vmem:[#allocation7 + $0xb38] sm:$0xff]  ;;  %v5535_v6 = vpack.c.bf16 %v2232_v25, %v2224_v30  ;;  %v2303_v30 = vld [vmem:[#allocation7 + $0xd28] sm:$0xff] }
 0x314   :  { %5506 = vmatprep.subr.bf16.mxu1 %v5505_v12  ;;  %v2184_v12 = vld [vmem:[#allocation7 + $0x970] sm:$0xff]  ;;  %v5267_v16 = vpack.c.bf16 %v2182_v44, %v2174_v54  ;;  %v2249_v5 = vld [vmem:[#allocation7 + $0xb78] sm:$0xff] }
 0x315   :  { %v5523_v17 = vpack.c.bf16 %v2184_v12, %v2176_v10  ;;  %v5537_v54 = vpack.c.bf16 %v2249_v5, %v2241_v4  ;;  %v2248_v44 = vld [vmem:[#allocation7 + $0xb70] sm:$0xff]  ;;  %v2255_v10 = vld [vmem:[#allocation7 + $0xba8] sm:$0xff]  ;;  %v2257_v12 = vld [vmem:[#allocation7 + $0xbb8] sm:$0xff] }
 0x316   :  { %5252 = vmatpush1.bf16.msra.mxu0 %v5251_v19  ;;  %v5269_v19 = vpack.c.bf16 %v2199_v13, %v2191_v55  ;;  %v2265_v55 = vld [vmem:[#allocation7 + $0xbf8] sm:$0xff] }
 0x317   :  { %5508 = vmatpush1.bf16.msra.mxu1 %v5507_v21  ;;  %5254 = vmatprep.subr.bf16.mxu0 %v5253_v22  ;;  %v2190_v21 = vld [vmem:[#allocation7 + $0x9a0] sm:$0xff]  ;;  %v2305_v25 = vld [vmem:[#allocation7 + $0xd38] sm:$0xff] }
 0x318   :  { %5510 = vmatprep.subr.bf16.mxu1 %v5509_v29  ;;  %v2198_v22 = vld [vmem:[#allocation7 + $0x9e0] sm:$0xff]  ;;  %v2215_v29 = vld [vmem:[#allocation7 + $0xa68] sm:$0xff] }
 0x319   :  { %v5271_v32 = vpack.c.bf16 %v2198_v22, %v2190_v21  ;;  %v5273_v47 = vpack.c.bf16 %v2215_v29, %v2207_v28  ;;  %v5541_v21 = vpack.c.bf16 %v2265_v55, %v2257_v12  ;;  %v2264_v22 = vld [vmem:[#allocation7 + $0xbf0] sm:$0xff]  ;;  %v2281_v28 = vld [vmem:[#allocation7 + $0xc78] sm:$0xff] }
 0x31a   :  { %5256 = vmatpush1.bf16.msra.mxu0 %v5255_v34  ;;  %v2206_v34 = vld [vmem:[#allocation7 + $0xa20] sm:$0xff] }
 0x31b   :  { %5512 = vmatpush1.bf16.msra.mxu1 %v5511_v35  ;;  %5258 = vmatprep.subr.bf16.mxu0 %v5257_v57  ;;  %v2214_v35 = vld [vmem:[#allocation7 + $0xa60] sm:$0xff]  ;;  %v2208_v57 = vld [vmem:[#allocation7 + $0xa30] sm:$0xff] }
 0x31c   :  { %5514 = vmatprep.subr.bf16.mxu1 %v5513_v39  ;;  %v2223_v39 = vld [vmem:[#allocation7 + $0xaa8] sm:$0xff]  ;;  %v5275_v49 = vpack.c.bf16 %v2214_v35, %v2206_v34  ;;  %v2280_v35 = vld [vmem:[#allocation7 + $0xc70] sm:$0xff] }
 0x31d   :  { %3581 = vmatmul.mubr.f32.vlgmr.msra.gmra.mrb[18].mxu0 %v6131_v36  ;;  %v5277_v58 = vpack.c.bf16 %v2231_v40, %v2223_v39  ;;  %v2297_v39 = vld [vmem:[#allocation7 + $0xcf8] sm:$0xff] }
 0x31e   :  { %3865 = vmatmul.mubr.f32.vlgmr.msra.gmra.mrb[18].mxu1 %v6131_v36  ;;  %5260 = vmatpush1.bf16.msra.mxu0 %v5259_v18  ;;  %v2201_v36 = vld [vmem:[#allocation7 + $0x9f8] sm:$0xff]  ;;  %v5531_v18 = vpack.c.bf16 %v2216_v38, %v2208_v57  ;;  %v2287_v57 = vld [vmem:[#allocation7 + $0xca8] sm:$0xff] }
 0x31f   :  { %3651 = vmatprep.mubr.f32.mxu0 %v6135_v43  ;;  %5516 = vmatpush1.bf16.msra.mxu1 %v5515_v56  ;;  %v5525_v27 = vpack.c.bf16 %v2201_v36, %v2193_v48  ;;  %v2230_v56 = vld [vmem:[#allocation7 + $0xae0] sm:$0xff]  ;;  %v2289_v38 = vld [vmem:[#allocation7 + $0xcb8] sm:$0xff] }
 0x320   :  { %3935 = vmatprep.mubr.f32.mxu1 %v6135_v43  ;;  %5262 = vmatprep.subr.bf16.mxu0 %v5261_v1  ;;  %v2200_v43 = vld [vmem:[#allocation7 + $0x9f0] sm:$0xff]  ;;  %v2239_v1 = vld [vmem:[#allocation7 + $0xb28] sm:$0xff] }
 0x321   :  { %5518 = vmatprep.subr.bf16.mxu1 %v5517_v8  ;;  %v5527_v33 = vpack.c.bf16 %v2200_v43, %v2192_v24  ;;  %v5279_v8 = vpack.c.bf16 %v2230_v56, %v2222_v23  ;;  %v5281_v7 = vpack.c.bf16 %v2247_v2, %v2239_v1  ;;  %v2271_v24 = vld [vmem:[#allocation7 + $0xc28] sm:$0xff]  ;;  %v2273_v43 = vld [vmem:[#allocation7 + $0xc38] sm:$0xff]  ;;  %v5549_v23 = vpack.c.bf16 %v2297_v39, %v2289_v38  ;;  %v2296_v56 = vld [vmem:[#allocation7 + $0xcf0] sm:$0xff] }
 0x322   :  { %5264 = vmatpush1.bf16.msra.mxu0 %v5263_v9  ;;  %v2238_v9 = vld [vmem:[#allocation7 + $0xb20] sm:$0xff]  ;;  %v5545_v34 = vpack.c.bf16 %v2281_v28, %v2273_v43  ;;  %v2313_v1 = vld [vmem:[#allocation7 + $0xd78] sm:$0xff] }
 0x323   :  { %5520 = vmatpush1.bf16.msra.mxu1 %v5519_v15  ;;  %5266 = vmatprep.subr.bf16.mxu0 %v5265_v51  ;;  %v2246_v15 = vld [vmem:[#allocation7 + $0xb60] sm:$0xff]  ;;  %v2240_v51 = vld [vmem:[#allocation7 + $0xb30] sm:$0xff] }
 0x324   :  { %5522 = vmatprep.subr.bf16.mxu1 %v5521_v11  ;;  %v2263_v11 = vld [vmem:[#allocation7 + $0xbe8] sm:$0xff]  ;;  %v5283_v13 = vpack.c.bf16 %v2246_v15, %v2238_v9  ;;  %v5539_v48 = vpack.c.bf16 %v2248_v44, %v2240_v51  ;;  %v5553_v9 = vpack.c.bf16 %v2313_v1, %v2305_v25  ;;  %v2312_v15 = vld [vmem:[#allocation7 + $0xd70] sm:$0xff]  ;;  %v2321_v44 = vld [vmem:[#allocation7 + $0xdb8] sm:$0xff] }
 0x325   :  { %v5285_v36 = vpack.c.bf16 %v2263_v11, %v2255_v10  ;;  %v2319_v51 = vld [vmem:[#allocation7 + $0xda8] sm:$0xff]  ;;  %v2329_v10 = vld [vmem:[#allocation7 + $0xdf8] sm:$0xff] }
 0x326   :  { %5268 = vmatpush1.bf16.msra.mxu0 %v5267_v16  ;;  %v2254_v16 = vld [vmem:[#allocation7 + $0xba0] sm:$0xff] }
 0x327   :  { %5524 = vmatpush1.bf16.msra.mxu1 %v5523_v17  ;;  %5270 = vmatprep.subr.bf16.mxu0 %v5269_v19  ;;  %v2262_v17 = vld [vmem:[#allocation7 + $0xbe0] sm:$0xff]  ;;  %v2256_v19 = vld [vmem:[#allocation7 + $0xbb0] sm:$0xff] }
 0x328   :  { %5526 = vmatprep.subr.bf16.mxu1 %v5525_v27  ;;  %v2279_v27 = vld [vmem:[#allocation7 + $0xc68] sm:$0xff]  ;;  %v5287_v29 = vpack.c.bf16 %v2262_v17, %v2254_v16  ;;  %v5543_v31 = vpack.c.bf16 %v2264_v22, %v2256_v19  ;;  %v5557_v16 = vpack.c.bf16 %v2329_v10, %v2321_v44  ;;  %v2328_v17 = vld [vmem:[#allocation7 + $0xdf0] sm:$0xff]  ;;  %v2337_v22 = vld [vmem:[#allocation7 + $0xe38] sm:$0xff] }
 0x329   :  { %v5289_v52 = vpack.c.bf16 %v2279_v27, %v2271_v24  ;;  %v2335_v19 = vld [vmem:[#allocation7 + $0xe28] sm:$0xff]  ;;  %v2345_v24 = vld [vmem:[#allocation7 + $0xe78] sm:$0xff] }
 0x32a   :  { %5272 = vmatpush1.bf16.msra.mxu0 %v5271_v32  ;;  %v2270_v32 = vld [vmem:[#allocation7 + $0xc20] sm:$0xff] }
 0x32b   :  { %5528 = vmatpush1.bf16.msra.mxu1 %v5527_v33  ;;  %5274 = vmatprep.subr.bf16.mxu0 %v5273_v47  ;;  %v2278_v33 = vld [vmem:[#allocation7 + $0xc60] sm:$0xff]  ;;  %v2272_v47 = vld [vmem:[#allocation7 + $0xc30] sm:$0xff] }
 0x32c   :  { %5530 = vmatprep.subr.bf16.mxu1 %v5529_v37  ;;  %v2295_v37 = vld [vmem:[#allocation7 + $0xce8] sm:$0xff]  ;;  %v5291_v40 = vpack.c.bf16 %v2278_v33, %v2270_v32  ;;  %v5547_v41 = vpack.c.bf16 %v2280_v35, %v2272_v47  ;;  %v5561_v32 = vpack.c.bf16 %v2345_v24, %v2337_v22  ;;  %v2344_v33 = vld [vmem:[#allocation7 + $0xe70] sm:$0xff]  ;;  %v2353_v35 = vld [vmem:[#allocation7 + $0xeb8] sm:$0xff] }
 0x32d   :  { %v5293_v59 = vpack.c.bf16 %v2295_v37, %v2287_v57  ;;  %v2351_v47 = vld [vmem:[#allocation7 + $0xea8] sm:$0xff]  ;;  %v2361_v57 = vld [vmem:[#allocation7 + $0xef8] sm:$0xff] }
 0x32e   :  { %5276 = vmatpush1.bf16.msra.mxu0 %v5275_v49  ;;  %v2286_v49 = vld [vmem:[#allocation7 + $0xca0] sm:$0xff] }
 0x32f   :  { %5532 = vmatpush1.bf16.msra.mxu1 %v5531_v18  ;;  %5278 = vmatprep.subr.bf16.mxu0 %v5277_v58  ;;  %v2294_v18 = vld [vmem:[#allocation7 + $0xce0] sm:$0xff]  ;;  %v2288_v58 = vld [vmem:[#allocation7 + $0xcb0] sm:$0xff] }
 0x330   :  { %5534 = vmatprep.subr.bf16.mxu1 %v5533_v46  ;;  %v2311_v46 = vld [vmem:[#allocation7 + $0xd68] sm:$0xff]  ;;  %v5295_v2 = vpack.c.bf16 %v2294_v18, %v2286_v49  ;;  %v5551_v4 = vpack.c.bf16 %v2296_v56, %v2288_v58  ;;  %v5565_v49 = vpack.c.bf16 %v2361_v57, %v2353_v35  ;;  %v2360_v18 = vld [vmem:[#allocation7 + $0xef0] sm:$0xff]  ;;  %v2369_v56 = vld [vmem:[#allocation7 + $0xf38] sm:$0xff] }
 0x331   :  { %v5297_v5 = vpack.c.bf16 %v2311_v46, %v2303_v30  ;;  %v2367_v58 = vld [vmem:[#allocation7 + $0xf28] sm:$0xff]  ;;  %v2377_v30 = vld [vmem:[#allocation7 + $0xf78] sm:$0xff]  ;;  %v2414_v57 = vld [vmem:[#allocation7 + $0x10a0] sm:$0xff] }
 0x332   :  { %5280 = vmatpush1.bf16.msra.mxu0 %v5279_v8  ;;  %v2302_v8 = vld [vmem:[#allocation7 + $0xd20] sm:$0xff] }
 0x333   :  { %5536 = vmatpush1.bf16.msra.mxu1 %v5535_v6  ;;  %5282 = vmatprep.subr.bf16.mxu0 %v5281_v7  ;;  %v2310_v6 = vld [vmem:[#allocation7 + $0xd60] sm:$0xff]  ;;  %v2304_v7 = vld [vmem:[#allocation7 + $0xd30] sm:$0xff] }
 0x334   :  { %5538 = vmatprep.subr.bf16.mxu1 %v5537_v54  ;;  %v2327_v54 = vld [vmem:[#allocation7 + $0xde8] sm:$0xff]  ;;  %v5299_v11 = vpack.c.bf16 %v2310_v6, %v2302_v8  ;;  %v5555_v12 = vpack.c.bf16 %v2312_v15, %v2304_v7  ;;  %v5569_v8 = vpack.c.bf16 %v2377_v30, %v2369_v56  ;;  %v2376_v6 = vld [vmem:[#allocation7 + $0xf70] sm:$0xff]  ;;  %v2385_v15 = vld [vmem:[#allocation7 + $0xfb8] sm:$0xff] }
 0x335   :  { %v5301_v55 = vpack.c.bf16 %v2327_v54, %v2319_v51  ;;  %v2383_v7 = vld [vmem:[#allocation7 + $0xfa8] sm:$0xff]  ;;  %v2393_v51 = vld [vmem:[#allocation7 + $0xff8] sm:$0xff] }
 0x336   :  { %5284 = vmatpush1.bf16.msra.mxu0 %v5283_v13  ;;  %v2318_v13 = vld [vmem:[#allocation7 + $0xda0] sm:$0xff] }
 0x337   :  { %5540 = vmatpush1.bf16.msra.mxu1 %v5539_v48  ;;  %5286 = vmatprep.subr.bf16.mxu0 %v5285_v36  ;;  %v2326_v48 = vld [vmem:[#allocation7 + $0xde0] sm:$0xff]  ;;  %v2320_v36 = vld [vmem:[#allocation7 + $0xdb0] sm:$0xff] }
 0x338   :  { %5542 = vmatprep.subr.bf16.mxu1 %v5541_v21  ;;  %v2343_v21 = vld [vmem:[#allocation7 + $0xe68] sm:$0xff]  ;;  %v5303_v27 = vpack.c.bf16 %v2326_v48, %v2318_v13  ;;  %v5559_v43 = vpack.c.bf16 %v2328_v17, %v2320_v36  ;;  %v5573_v13 = vpack.c.bf16 %v2393_v51, %v2385_v15  ;;  %v2392_v48 = vld [vmem:[#allocation7 + $0xff0] sm:$0xff]  ;;  %v2401_v17 = vld [vmem:[#allocation7 + $0x1038] sm:$0xff] }
 0x339   :  { %v5305_v28 = vpack.c.bf16 %v2343_v21, %v2335_v19  ;;  %v2399_v36 = vld [vmem:[#allocation7 + $0x1028] sm:$0xff]  ;;  %v2409_v19 = vld [vmem:[#allocation7 + $0x1078] sm:$0xff]  ;;  %v2446_v51 = vld [vmem:[#allocation7 + $0x11a0] sm:$0xff] }
 0x33a   :  { %5288 = vmatpush1.bf16.msra.mxu0 %v5287_v29  ;;  %v2334_v29 = vld [vmem:[#allocation7 + $0xe20] sm:$0xff] }
 0x33b   :  { %5544 = vmatpush1.bf16.msra.mxu1 %v5543_v31  ;;  %5290 = vmatprep.subr.bf16.mxu0 %v5289_v52  ;;  %v2342_v31 = vld [vmem:[#allocation7 + $0xe60] sm:$0xff]  ;;  %v2336_v52 = vld [vmem:[#allocation7 + $0xe30] sm:$0xff] }
 0x33c   :  { %5546 = vmatprep.subr.bf16.mxu1 %v5545_v34  ;;  %v2359_v34 = vld [vmem:[#allocation7 + $0xee8] sm:$0xff]  ;;  %v5307_v37 = vpack.c.bf16 %v2342_v31, %v2334_v29  ;;  %v5563_v38 = vpack.c.bf16 %v2344_v33, %v2336_v52  ;;  %v2400_v29 = vld [vmem:[#allocation7 + $0x1030] sm:$0xff] }
 0x33d   :  { %v5309_v39 = vpack.c.bf16 %v2359_v34, %v2351_v47  ;;  %v2408_v31 = vld [vmem:[#allocation7 + $0x1070] sm:$0xff]  ;;  %v2415_v52 = vld [vmem:[#allocation7 + $0x10a8] sm:$0xff]  ;;  %v2417_v47 = vld [vmem:[#allocation7 + $0x10b8] sm:$0xff] }
 0x33e   :  { %5292 = vmatpush1.bf16.msra.mxu0 %v5291_v40  ;;  %v2350_v40 = vld [vmem:[#allocation7 + $0xea0] sm:$0xff]  ;;  %v2425_v34 = vld [vmem:[#allocation7 + $0x10f8] sm:$0xff]  ;;  %v5579_v35 = vpack.c.bf16 %v2408_v31, %v2400_v29 }
 0x33f   :  { %5548 = vmatpush1.bf16.msra.mxu1 %v5547_v41  ;;  %5294 = vmatprep.subr.bf16.mxu0 %v5293_v59  ;;  %v2358_v41 = vld [vmem:[#allocation7 + $0xee0] sm:$0xff]  ;;  %v2352_v59 = vld [vmem:[#allocation7 + $0xeb0] sm:$0xff]  ;;  %v2489_v29 = vld [vmem:[#allocation7 + $0x12f8] sm:$0xff] }
 0x340   :  { %5550 = vmatprep.subr.bf16.mxu1 %v5549_v23  ;;  %v2375_v23 = vld [vmem:[#allocation7 + $0xf68] sm:$0xff]  ;;  %v5311_v46 = vpack.c.bf16 %v2358_v41, %v2350_v40  ;;  %v5567_v25 = vpack.c.bf16 %v2360_v18, %v2352_v59  ;;  %v2424_v40 = vld [vmem:[#allocation7 + $0x10f0] sm:$0xff]  ;;  %v2433_v18 = vld [vmem:[#allocation7 + $0x1138] sm:$0xff] }
 0x341   :  { %v5313_v1 = vpack.c.bf16 %v2375_v23, %v2367_v58  ;;  %v2431_v41 = vld [vmem:[#allocation7 + $0x1128] sm:$0xff]  ;;  %v2441_v58 = vld [vmem:[#allocation7 + $0x1178] sm:$0xff] }
 0x342   :  { %5296 = vmatpush1.bf16.msra.mxu0 %v5295_v2  ;;  %v2366_v2 = vld [vmem:[#allocation7 + $0xf20] sm:$0xff]  ;;  %v2439_v59 = vld [vmem:[#allocation7 + $0x1168] sm:$0xff] }
 0x343   :  { %5552 = vmatpush1.bf16.msra.mxu1 %v5551_v4  ;;  %5298 = vmatprep.subr.bf16.mxu0 %v5297_v5  ;;  %v2374_v4 = vld [vmem:[#allocation7 + $0xf60] sm:$0xff]  ;;  %v2368_v5 = vld [vmem:[#allocation7 + $0xf30] sm:$0xff]  ;;  %v5329_v30 = vpack.c.bf16 %v2439_v59, %v2431_v41 }
 0x344   :  { %5554 = vmatprep.subr.bf16.mxu1 %v5553_v9  ;;  %v2391_v9 = vld [vmem:[#allocation7 + $0xfe8] sm:$0xff]  ;;  %v5315_v54 = vpack.c.bf16 %v2374_v4, %v2366_v2  ;;  %v5571_v44 = vpack.c.bf16 %v2376_v6, %v2368_v5  ;;  %v5585_v2 = vpack.c.bf16 %v2441_v58, %v2433_v18  ;;  %v2440_v4 = vld [vmem:[#allocation7 + $0x1170] sm:$0xff]  ;;  %v2449_v6 = vld [vmem:[#allocation7 + $0x11b8] sm:$0xff] }
 0x345   :  { %v5317_v10 = vpack.c.bf16 %v2391_v9, %v2383_v7  ;;  %v2447_v5 = vld [vmem:[#allocation7 + $0x11a8] sm:$0xff]  ;;  %v2494_v18 = vld [vmem:[#allocation7 + $0x1320] sm:$0xff] }
 0x346   :  { %5300 = vmatpush1.bf16.msra.mxu0 %v5299_v11  ;;  %v2382_v11 = vld [vmem:[#allocation7 + $0xfa0] sm:$0xff] }
 0x347   :  { %5556 = vmatpush1.bf16.msra.mxu1 %v5555_v12  ;;  %5302 = vmatprep.subr.bf16.mxu0 %v5301_v55  ;;  %v2390_v12 = vld [vmem:[#allocation7 + $0xfe0] sm:$0xff]  ;;  %v2384_v55 = vld [vmem:[#allocation7 + $0xfb0] sm:$0xff] }
 0x348   :  { %5558 = vmatprep.subr.bf16.mxu1 %v5557_v16  ;;  %v2407_v16 = vld [vmem:[#allocation7 + $0x1068] sm:$0xff]  ;;  %v5319_v21 = vpack.c.bf16 %v2390_v12, %v2382_v11  ;;  %v5575_v22 = vpack.c.bf16 %v2392_v48, %v2384_v55  ;;  %v2465_v55 = vld [vmem:[#allocation7 + $0x1238] sm:$0xff]  ;;  %v2502_v58 = vld [vmem:[#allocation7 + $0x1360] sm:$0xff] }
 0x349   :  { %v5321_v24 = vpack.c.bf16 %v2407_v16, %v2399_v36  ;;  %v2463_v11 = vld [vmem:[#allocation7 + $0x1228] sm:$0xff] }
 0x34a   :  { %5304 = vmatpush1.bf16.msra.mxu0 %v5303_v27  ;;  %v2398_v27 = vld [vmem:[#allocation7 + $0x1020] sm:$0xff]  ;;  %v2471_v12 = vld [vmem:[#allocation7 + $0x1268] sm:$0xff] }
 0x34b   :  { %5560 = vmatpush1.bf16.msra.mxu1 %v5559_v43  ;;  %5306 = vmatprep.subr.bf16.mxu0 %v5305_v28  ;;  %v2406_v43 = vld [vmem:[#allocation7 + $0x1060] sm:$0xff]  ;;  %v5577_v28 = vpack.c.bf16 %v2409_v19, %v2401_v17  ;;  %v5337_v16 = vpack.c.bf16 %v2471_v12, %v2463_v11 }
 0x34c   :  { %5562 = vmatprep.subr.bf16.mxu1 %v5561_v32  ;;  %v2423_v32 = vld [vmem:[#allocation7 + $0x10e8] sm:$0xff]  ;;  %v5323_v33 = vpack.c.bf16 %v2406_v43, %v2398_v27  ;;  %v2462_v17 = vld [vmem:[#allocation7 + $0x1220] sm:$0xff] }
 0x34d   :  { %v2470_v19 = vld [vmem:[#allocation7 + $0x1260] sm:$0xff]  ;;  %v2479_v27 = vld [vmem:[#allocation7 + $0x12a8] sm:$0xff] }
 0x34e   :  { %5308 = vmatpush1.bf16.msra.mxu0 %v5307_v37  ;;  %v2422_v37 = vld [vmem:[#allocation7 + $0x10e0] sm:$0xff]  ;;  %v2487_v43 = vld [vmem:[#allocation7 + $0x12e8] sm:$0xff]  ;;  %v5339_v31 = vpack.c.bf16 %v2470_v19, %v2462_v17 }
 0x34f   :  { %5564 = vmatpush1.bf16.msra.mxu1 %v5563_v38  ;;  %5310 = vmatprep.subr.bf16.mxu0 %v5309_v39  ;;  %v2416_v38 = vld [vmem:[#allocation7 + $0x10b0] sm:$0xff]  ;;  %v5325_v39 = vpack.c.bf16 %v2423_v32, %v2415_v52  ;;  %v5327_v23 = vpack.c.bf16 %v2422_v37, %v2414_v57  ;;  %v5341_v32 = vpack.c.bf16 %v2487_v43, %v2479_v27  ;;  %v2495_v37 = vld [vmem:[#allocation7 + $0x1328] sm:$0xff] }
 0x350   :  { %5566 = vmatprep.subr.bf16.mxu1 %v5565_v49  ;;  %v5581_v49 = vpack.c.bf16 %v2425_v34, %v2417_v47  ;;  %v5583_v56 = vpack.c.bf16 %v2424_v40, %v2416_v38  ;;  %v2486_v47 = vld [vmem:[#allocation7 + $0x12e0] sm:$0xff]  ;;  %v2480_v34 = vld [vmem:[#allocation7 + $0x12b0] sm:$0xff]  ;;  %v2503_v38 = vld [vmem:[#allocation7 + $0x1368] sm:$0xff] }
 0x351   :  { %v2488_v57 = vld [vmem:[#allocation7 + $0x12f0] sm:$0xff]  ;;  %v2505_v40 = vld [vmem:[#allocation7 + $0x1378] sm:$0xff]  ;;  %v2543_v17 = vld [vmem:[#allocation7 + $0x14a8] sm:$0xff] }
 0x352   :  { %5312 = vmatpush1.bf16.msra.mxu0 %v5311_v46  ;;  %v2430_v46 = vld [vmem:[#allocation7 + $0x1120] sm:$0xff]  ;;  %v5599_v59 = vpack.c.bf16 %v2488_v57, %v2480_v34  ;;  %v2551_v19 = vld [vmem:[#allocation7 + $0x14e8] sm:$0xff]  ;;  %v2561_v34 = vld [vmem:[#allocation7 + $0x1538] sm:$0xff] }
 0x353   :  { %5568 = vmatpush1.bf16.msra.mxu1 %v5567_v25  ;;  %5314 = vmatprep.subr.bf16.mxu0 %v5313_v1  ;;  %v2438_v25 = vld [vmem:[#allocation7 + $0x1160] sm:$0xff]  ;;  %v2432_v1 = vld [vmem:[#allocation7 + $0x1130] sm:$0xff]  ;;  %v5357_v43 = vpack.c.bf16 %v2551_v19, %v2543_v17 }
 0x354   :  { %5570 = vmatprep.subr.bf16.mxu1 %v5569_v8  ;;  %v2455_v8 = vld [vmem:[#allocation7 + $0x11e8] sm:$0xff]  ;;  %v5331_v7 = vpack.c.bf16 %v2438_v25, %v2430_v46  ;;  %v5587_v9 = vpack.c.bf16 %v2440_v4, %v2432_v1  ;;  %v2513_v1 = vld [vmem:[#allocation7 + $0x13b8] sm:$0xff]  ;;  %v5347_v4 = vpack.c.bf16 %v2502_v58, %v2494_v18 }
 0x355   :  { %v5333_v15 = vpack.c.bf16 %v2455_v8, %v2447_v5  ;;  %v2511_v46 = vld [vmem:[#allocation7 + $0x13a8] sm:$0xff] }
 0x356   :  { %5316 = vmatpush1.bf16.msra.mxu0 %v5315_v54  ;;  %v2454_v54 = vld [vmem:[#allocation7 + $0x11e0] sm:$0xff]  ;;  %v2519_v25 = vld [vmem:[#allocation7 + $0x13e8] sm:$0xff] }
 0x357   :  { %5572 = vmatpush1.bf16.msra.mxu1 %v5571_v44  ;;  %5318 = vmatprep.subr.bf16.mxu0 %v5317_v10  ;;  %v2448_v44 = vld [vmem:[#allocation7 + $0x11b0] sm:$0xff]  ;;  %v5335_v48 = vpack.c.bf16 %v2454_v54, %v2446_v51  ;;  %v5349_v8 = vpack.c.bf16 %v2519_v25, %v2511_v46  ;;  %v2527_v51 = vld [vmem:[#allocation7 + $0x1428] sm:$0xff] }
 0x358   :  { %5574 = vmatprep.subr.bf16.mxu1 %v5573_v13  ;;  %v2473_v13 = vld [vmem:[#allocation7 + $0x1278] sm:$0xff]  ;;  %v2535_v54 = vld [vmem:[#allocation7 + $0x1468] sm:$0xff] }
 0x359   :  { %v5353_v12 = vpack.c.bf16 %v2535_v54, %v2527_v51  ;;  %v2575_v18 = vld [vmem:[#allocation7 + $0x15a8] sm:$0xff] }
 0x35a   :  { %5320 = vmatpush1.bf16.msra.mxu0 %v5319_v21  ;;  %v2464_v21 = vld [vmem:[#allocation7 + $0x1230] sm:$0xff]  ;;  %v2583_v58 = vld [vmem:[#allocation7 + $0x15e8] sm:$0xff] }
 0x35b   :  { %5576 = vmatpush1.bf16.msra.mxu1 %v5575_v22  ;;  %5322 = vmatprep.subr.bf16.mxu0 %v5321_v24  ;;  %v5593_v22 = vpack.c.bf16 %v2473_v13, %v2465_v55  ;;  %v2472_v24 = vld [vmem:[#allocation7 + $0x1270] sm:$0xff]  ;;  %v2526_v55 = vld [vmem:[#allocation7 + $0x1420] sm:$0xff]  ;;  %v5365_v25 = vpack.c.bf16 %v2583_v58, %v2575_v18 }
 0x35c   :  { %5578 = vmatprep.subr.bf16.mxu1 %v5577_v28  ;;  %v2481_v28 = vld [vmem:[#allocation7 + $0x12b8] sm:$0xff]  ;;  %v5595_v52 = vpack.c.bf16 %v2472_v24, %v2464_v21  ;;  %v2534_v13 = vld [vmem:[#allocation7 + $0x1460] sm:$0xff] }
 0x35d   :  { %3652 = vmatmul.mubr.f32.vlgmr.msra.gmra.mrb[18].mxu0 %v6178_v14  ;;  %v2545_v21 = vld [vmem:[#allocation7 + $0x14b8] sm:$0xff]  ;;  %v5355_v24 = vpack.c.bf16 %v2534_v13, %v2526_v55  ;;  %v2607_v55 = vld [vmem:[#allocation7 + $0x16a8] sm:$0xff] }
 0x35e   :  { %3936 = vmatmul.mubr.f32.vlgmr.msra.gmra.mrb[18].mxu1 %v6178_v14  ;;  %5324 = vmatpush1.bf16.msra.mxu0 %v5323_v33  ;;  %v2457_v14 = vld [vmem:[#allocation7 + $0x11f8] sm:$0xff]  ;;  %v2478_v33 = vld [vmem:[#allocation7 + $0x12a0] sm:$0xff]  ;;  %v2615_v13 = vld [vmem:[#allocation7 + $0x16e8] sm:$0xff] }
 0x35f   :  { %3722 = vmatprep.mubr.f32.mxu0 %v6181_v3  ;;  %5580 = vmatpush1.bf16.msra.mxu1 %v5579_v35  ;;  %v5589_v10 = vpack.c.bf16 %v2457_v14, %v2449_v6  ;;  %v5597_v35 = vpack.c.bf16 %v2489_v29, %v2481_v28  ;;  %v5343_v41 = vpack.c.bf16 %v2486_v47, %v2478_v33  ;;  %v2510_v6 = vld [vmem:[#allocation7 + $0x13a0] sm:$0xff]  ;;  %v2559_v33 = vld [vmem:[#allocation7 + $0x1528] sm:$0xff] }
 0x360   :  { %4006 = vmatprep.mubr.f32.mxu1 %v6181_v3  ;;  %5326 = vmatprep.subr.bf16.mxu0 %v5325_v39  ;;  %v2456_v3 = vld [vmem:[#allocation7 + $0x11f0] sm:$0xff]  ;;  %v2497_v39 = vld [vmem:[#allocation7 + $0x1338] sm:$0xff]  ;;  %v2518_v14 = vld [vmem:[#allocation7 + $0x13e0] sm:$0xff]  ;;  %v5373_v19 = vpack.c.bf16 %v2615_v13, %v2607_v55 }
 0x361   :  { %5582 = vmatprep.subr.bf16.mxu1 %v5581_v49  ;;  %v5591_v36 = vpack.c.bf16 %v2456_v3, %v2448_v44  ;;  %v5345_v49 = vpack.c.bf16 %v2503_v38, %v2495_v37  ;;  %v2529_v44 = vld [vmem:[#allocation7 + $0x1438] sm:$0xff]  ;;  %v5351_v3 = vpack.c.bf16 %v2518_v14, %v2510_v6  ;;  %v2542_v28 = vld [vmem:[#allocation7 + $0x14a0] sm:$0xff]  ;;  %v2567_v47 = vld [vmem:[#allocation7 + $0x1568] sm:$0xff] }
 0x362   :  { %5328 = vmatpush1.bf16.msra.mxu0 %v5327_v23  ;;  %v2496_v23 = vld [vmem:[#allocation7 + $0x1330] sm:$0xff]  ;;  %v2550_v29 = vld [vmem:[#allocation7 + $0x14e0] sm:$0xff]  ;;  %v5361_v38 = vpack.c.bf16 %v2567_v47, %v2559_v33  ;;  %v2591_v6 = vld [vmem:[#allocation7 + $0x1628] sm:$0xff] }
 0x363   :  { %5584 = vmatpush1.bf16.msra.mxu1 %v5583_v56  ;;  %5330 = vmatprep.subr.bf16.mxu0 %v5329_v30  ;;  %v5601_v56 = vpack.c.bf16 %v2505_v40, %v2497_v39  ;;  %v2504_v30 = vld [vmem:[#allocation7 + $0x1370] sm:$0xff]  ;;  %v5359_v57 = vpack.c.bf16 %v2550_v29, %v2542_v28  ;;  %v2558_v39 = vld [vmem:[#allocation7 + $0x1520] sm:$0xff]  ;;  %v2599_v14 = vld [vmem:[#allocation7 + $0x1668] sm:$0xff] }
 0x364   :  { %5586 = vmatprep.subr.bf16.mxu1 %v5585_v2  ;;  %v2521_v2 = vld [vmem:[#allocation7 + $0x13f8] sm:$0xff]  ;;  %v5603_v5 = vpack.c.bf16 %v2504_v30, %v2496_v23  ;;  %v2566_v40 = vld [vmem:[#allocation7 + $0x1560] sm:$0xff]  ;;  %v5369_v54 = vpack.c.bf16 %v2599_v14, %v2591_v6  ;;  %v2623_v28 = vld [vmem:[#allocation7 + $0x1728] sm:$0xff] }
 0x365   :  { %v2577_v23 = vld [vmem:[#allocation7 + $0x15b8] sm:$0xff]  ;;  %v5363_v30 = vpack.c.bf16 %v2566_v40, %v2558_v39  ;;  %v2631_v29 = vld [vmem:[#allocation7 + $0x1768] sm:$0xff]  ;;  %v2670_v13 = vld [vmem:[#allocation7 + $0x18a0] sm:$0xff] }
 0x366   :  { %5332 = vmatpush1.bf16.msra.mxu0 %v5331_v7  ;;  %v2512_v7 = vld [vmem:[#allocation7 + $0x13b0] sm:$0xff]  ;;  %v5377_v47 = vpack.c.bf16 %v2631_v29, %v2623_v28  ;;  %v2639_v39 = vld [vmem:[#allocation7 + $0x17a8] sm:$0xff] }
 0x367   :  { %5588 = vmatpush1.bf16.msra.mxu1 %v5587_v9  ;;  %5334 = vmatprep.subr.bf16.mxu0 %v5333_v15  ;;  %v5605_v9 = vpack.c.bf16 %v2521_v2, %v2513_v1  ;;  %v2520_v15 = vld [vmem:[#allocation7 + $0x13f0] sm:$0xff]  ;;  %v2574_v1 = vld [vmem:[#allocation7 + $0x15a0] sm:$0xff]  ;;  %v2647_v40 = vld [vmem:[#allocation7 + $0x17e8] sm:$0xff] }
 0x368   :  { %5590 = vmatprep.subr.bf16.mxu1 %v5589_v10  ;;  %v2537_v10 = vld [vmem:[#allocation7 + $0x1478] sm:$0xff]  ;;  %v5607_v11 = vpack.c.bf16 %v2520_v15, %v2512_v7  ;;  %v2582_v2 = vld [vmem:[#allocation7 + $0x15e0] sm:$0xff]  ;;  %v5381_v58 = vpack.c.bf16 %v2647_v40, %v2639_v39 }
 0x369   :  { %v2593_v7 = vld [vmem:[#allocation7 + $0x1638] sm:$0xff]  ;;  %v5367_v15 = vpack.c.bf16 %v2582_v2, %v2574_v1  ;;  %v2655_v1 = vld [vmem:[#allocation7 + $0x1828] sm:$0xff]  ;;  %v2702_v40 = vld [vmem:[#allocation7 + $0x19a0] sm:$0xff] }
 0x36a   :  { %5336 = vmatpush1.bf16.msra.mxu0 %v5335_v48  ;;  %v2528_v48 = vld [vmem:[#allocation7 + $0x1430] sm:$0xff]  ;;  %v2663_v2 = vld [vmem:[#allocation7 + $0x1868] sm:$0xff] }
 0x36b   :  { %5592 = vmatpush1.bf16.msra.mxu1 %v5591_v36  ;;  %5338 = vmatprep.subr.bf16.mxu0 %v5337_v16  ;;  %v5609_v36 = vpack.c.bf16 %v2537_v10, %v2529_v44  ;;  %v2536_v16 = vld [vmem:[#allocation7 + $0x1470] sm:$0xff]  ;;  %v2590_v44 = vld [vmem:[#allocation7 + $0x1620] sm:$0xff]  ;;  %v5385_v14 = vpack.c.bf16 %v2663_v2, %v2655_v1 }
 0x36c   :  { %5594 = vmatprep.subr.bf16.mxu1 %v5593_v22  ;;  %v2553_v22 = vld [vmem:[#allocation7 + $0x14f8] sm:$0xff]  ;;  %v5611_v27 = vpack.c.bf16 %v2536_v16, %v2528_v48  ;;  %v2598_v10 = vld [vmem:[#allocation7 + $0x1660] sm:$0xff] }
 0x36d   :  { %v2609_v48 = vld [vmem:[#allocation7 + $0x16b8] sm:$0xff]  ;;  %v5371_v16 = vpack.c.bf16 %v2598_v10, %v2590_v44  ;;  %v2671_v44 = vld [vmem:[#allocation7 + $0x18a8] sm:$0xff]  ;;  %v2718_v1 = vld [vmem:[#allocation7 + $0x1a20] sm:$0xff] }
 0x36e   :  { %5340 = vmatpush1.bf16.msra.mxu0 %v5339_v31  ;;  %v2544_v31 = vld [vmem:[#allocation7 + $0x14b0] sm:$0xff]  ;;  %v2679_v10 = vld [vmem:[#allocation7 + $0x18e8] sm:$0xff]  ;;  %v2726_v2 = vld [vmem:[#allocation7 + $0x1a60] sm:$0xff] }
 0x36f   :  { %5596 = vmatpush1.bf16.msra.mxu1 %v5595_v52  ;;  %5342 = vmatprep.subr.bf16.mxu0 %v5341_v32  ;;  %v5613_v52 = vpack.c.bf16 %v2553_v22, %v2545_v21  ;;  %v2552_v32 = vld [vmem:[#allocation7 + $0x14f0] sm:$0xff]  ;;  %v2606_v21 = vld [vmem:[#allocation7 + $0x16a0] sm:$0xff] }
 0x370   :  { %5598 = vmatprep.subr.bf16.mxu1 %v5597_v35  ;;  %v2569_v35 = vld [vmem:[#allocation7 + $0x1578] sm:$0xff]  ;;  %v5615_v37 = vpack.c.bf16 %v2552_v32, %v2544_v31  ;;  %v2614_v22 = vld [vmem:[#allocation7 + $0x16e0] sm:$0xff] }
 0x371   :  { %v2625_v31 = vld [vmem:[#allocation7 + $0x1738] sm:$0xff]  ;;  %v5375_v32 = vpack.c.bf16 %v2614_v22, %v2606_v21  ;;  %v2695_v21 = vld [vmem:[#allocation7 + $0x1968] sm:$0xff] }
 0x372   :  { %5344 = vmatpush1.bf16.msra.mxu0 %v5343_v41  ;;  %v2560_v41 = vld [vmem:[#allocation7 + $0x1530] sm:$0xff] }
 0x373   :  { %5600 = vmatpush1.bf16.msra.mxu1 %v5599_v59  ;;  %5346 = vmatprep.subr.bf16.mxu0 %v5345_v49  ;;  %v5617_v59 = vpack.c.bf16 %v2569_v35, %v2561_v34  ;;  %v2568_v49 = vld [vmem:[#allocation7 + $0x1570] sm:$0xff]  ;;  %v2622_v34 = vld [vmem:[#allocation7 + $0x1720] sm:$0xff] }
 0x374   :  { %5602 = vmatprep.subr.bf16.mxu1 %v5601_v56  ;;  %v2585_v56 = vld [vmem:[#allocation7 + $0x15f8] sm:$0xff]  ;;  %v5619_v46 = vpack.c.bf16 %v2568_v49, %v2560_v41  ;;  %v2630_v35 = vld [vmem:[#allocation7 + $0x1760] sm:$0xff] }
 0x375   :  { %v2641_v41 = vld [vmem:[#allocation7 + $0x17b8] sm:$0xff]  ;;  %v5379_v49 = vpack.c.bf16 %v2630_v35, %v2622_v34  ;;  %v2703_v34 = vld [vmem:[#allocation7 + $0x19a8] sm:$0xff] }
 0x376   :  { %5348 = vmatpush1.bf16.msra.mxu0 %v5347_v4  ;;  %v2576_v4 = vld [vmem:[#allocation7 + $0x15b0] sm:$0xff]  ;;  %v2711_v35 = vld [vmem:[#allocation7 + $0x19e8] sm:$0xff] }
 0x377   :  { %5604 = vmatpush1.bf16.msra.mxu1 %v5603_v5  ;;  %5350 = vmatprep.subr.bf16.mxu0 %v5349_v8  ;;  %v5621_v5 = vpack.c.bf16 %v2585_v56, %v2577_v23  ;;  %v2584_v8 = vld [vmem:[#allocation7 + $0x15f0] sm:$0xff]  ;;  %v2638_v23 = vld [vmem:[#allocation7 + $0x17a0] sm:$0xff]  ;;  %v5397_v39 = vpack.c.bf16 %v2711_v35, %v2703_v34  ;;  %v2767_v34 = vld [vmem:[#allocation7 + $0x1ba8] sm:$0xff] }
 0x378   :  { %5606 = vmatprep.subr.bf16.mxu1 %v5605_v9  ;;  %v2601_v9 = vld [vmem:[#allocation7 + $0x1678] sm:$0xff]  ;;  %v5623_v51 = vpack.c.bf16 %v2584_v8, %v2576_v4  ;;  %v2646_v56 = vld [vmem:[#allocation7 + $0x17e0] sm:$0xff]  ;;  %v2775_v35 = vld [vmem:[#allocation7 + $0x1be8] sm:$0xff] }
 0x379   :  { %v2657_v4 = vld [vmem:[#allocation7 + $0x1838] sm:$0xff]  ;;  %v5383_v8 = vpack.c.bf16 %v2646_v56, %v2638_v23 }
 0x37a   :  { %5352 = vmatpush1.bf16.msra.mxu0 %v5351_v3  ;;  %v2592_v3 = vld [vmem:[#allocation7 + $0x1630] sm:$0xff]  ;;  %v2721_v23 = vld [vmem:[#allocation7 + $0x1a38] sm:$0xff] }
 0x37b   :  { %5608 = vmatpush1.bf16.msra.mxu1 %v5607_v11  ;;  %5354 = vmatprep.subr.bf16.mxu0 %v5353_v12  ;;  %v5625_v11 = vpack.c.bf16 %v2601_v9, %v2593_v7  ;;  %v2600_v12 = vld [vmem:[#allocation7 + $0x1670] sm:$0xff]  ;;  %v2654_v7 = vld [vmem:[#allocation7 + $0x1820] sm:$0xff]  ;;  %v2729_v56 = vld [vmem:[#allocation7 + $0x1a78] sm:$0xff] }
 0x37c   :  { %5610 = vmatprep.subr.bf16.mxu1 %v5609_v36  ;;  %v2617_v36 = vld [vmem:[#allocation7 + $0x16f8] sm:$0xff]  ;;  %v5627_v17 = vpack.c.bf16 %v2600_v12, %v2592_v3  ;;  %v2662_v9 = vld [vmem:[#allocation7 + $0x1860] sm:$0xff] }
 0x37d   :  { %v5387_v3 = vpack.c.bf16 %v2662_v9, %v2654_v7  ;;  %v2681_v12 = vld [vmem:[#allocation7 + $0x18f8] sm:$0xff] }
 0x37e   :  { %5356 = vmatpush1.bf16.msra.mxu0 %v5355_v24  ;;  %v2608_v24 = vld [vmem:[#allocation7 + $0x16b0] sm:$0xff]  ;;  %v2737_v7 = vld [vmem:[#allocation7 + $0x1ab8] sm:$0xff] }
 0x37f   :  { %5612 = vmatpush1.bf16.msra.mxu1 %v5611_v27  ;;  %5358 = vmatprep.subr.bf16.mxu0 %v5357_v43  ;;  %v5629_v27 = vpack.c.bf16 %v2617_v36, %v2609_v48  ;;  %v2616_v43 = vld [vmem:[#allocation7 + $0x16f0] sm:$0xff]  ;;  %v2678_v48 = vld [vmem:[#allocation7 + $0x18e0] sm:$0xff]  ;;  %v2745_v9 = vld [vmem:[#allocation7 + $0x1af8] sm:$0xff] }
 0x380   :  { %5614 = vmatprep.subr.bf16.mxu1 %v5613_v52  ;;  %v2633_v52 = vld [vmem:[#allocation7 + $0x1778] sm:$0xff]  ;;  %v5631_v33 = vpack.c.bf16 %v2616_v43, %v2608_v24  ;;  %v2672_v36 = vld [vmem:[#allocation7 + $0x18b0] sm:$0xff]  ;;  %v5391_v43 = vpack.c.bf16 %v2678_v48, %v2670_v13  ;;  %v2751_v13 = vld [vmem:[#allocation7 + $0x1b28] sm:$0xff] }
 0x381   :  { %v2689_v24 = vld [vmem:[#allocation7 + $0x1938] sm:$0xff]  ;;  %v2759_v48 = vld [vmem:[#allocation7 + $0x1b68] sm:$0xff] }
 0x382   :  { %5360 = vmatpush1.bf16.msra.mxu0 %v5359_v57  ;;  %v2624_v57 = vld [vmem:[#allocation7 + $0x1730] sm:$0xff] }
 0x383   :  { %5616 = vmatpush1.bf16.msra.mxu1 %v5615_v37  ;;  %5362 = vmatprep.subr.bf16.mxu0 %v5361_v38  ;;  %v5633_v37 = vpack.c.bf16 %v2633_v52, %v2625_v31  ;;  %v2632_v38 = vld [vmem:[#allocation7 + $0x1770] sm:$0xff]  ;;  %v2686_v31 = vld [vmem:[#allocation7 + $0x1920] sm:$0xff] }
 0x384   :  { %5618 = vmatprep.subr.bf16.mxu1 %v5617_v59  ;;  %v2649_v59 = vld [vmem:[#allocation7 + $0x17f8] sm:$0xff]  ;;  %v5635_v18 = vpack.c.bf16 %v2632_v38, %v2624_v57  ;;  %v2694_v52 = vld [vmem:[#allocation7 + $0x1960] sm:$0xff] }
 0x385   :  { %v2705_v57 = vld [vmem:[#allocation7 + $0x19b8] sm:$0xff] }
 0x386   :  { %5364 = vmatpush1.bf16.msra.mxu0 %v5363_v30  ;;  %v2640_v30 = vld [vmem:[#allocation7 + $0x17b0] sm:$0xff] }
 0x387   :  { %5620 = vmatpush1.bf16.msra.mxu1 %v5619_v46  ;;  %5366 = vmatprep.subr.bf16.mxu0 %v5365_v25  ;;  %v5637_v46 = vpack.c.bf16 %v2649_v59, %v2641_v41  ;;  %v2648_v25 = vld [vmem:[#allocation7 + $0x17f0] sm:$0xff]  ;;  %v2710_v41 = vld [vmem:[#allocation7 + $0x19e0] sm:$0xff] }
 0x388   :  { %5622 = vmatprep.subr.bf16.mxu1 %v5621_v5  ;;  %v2665_v5 = vld [vmem:[#allocation7 + $0x1878] sm:$0xff]  ;;  %v5639_v6 = vpack.c.bf16 %v2648_v25, %v2640_v30  ;;  %v2704_v59 = vld [vmem:[#allocation7 + $0x19b0] sm:$0xff]  ;;  %v5399_v30 = vpack.c.bf16 %v2710_v41, %v2702_v40 }
 0x389   :  { %v2777_v40 = vld [vmem:[#allocation7 + $0x1bf8] sm:$0xff] }
 0x38a   :  { %5368 = vmatpush1.bf16.msra.mxu0 %v5367_v15  ;;  %v5641_v15 = vpack.c.bf16 %v2665_v5, %v2657_v4  ;;  %v2720_v4 = vld [vmem:[#allocation7 + $0x1a30] sm:$0xff]  ;;  %v5657_v5 = vpack.c.bf16 %v2729_v56, %v2721_v23 }
 0x38b   :  { %5624 = vmatpush1.bf16.msra.mxu1 %v5623_v51  ;;  %5370 = vmatprep.subr.bf16.mxu0 %v5369_v54  ;;  %v2656_v51 = vld [vmem:[#allocation7 + $0x1830] sm:$0xff] }
 0x38c   :  { %5626 = vmatprep.subr.bf16.mxu1 %v5625_v11  ;;  %v2664_v54 = vld [vmem:[#allocation7 + $0x1870] sm:$0xff]  ;;  %v2673_v11 = vld [vmem:[#allocation7 + $0x18b8] sm:$0xff] }
 0x38d   :  { %v5643_v55 = vpack.c.bf16 %v2664_v54, %v2656_v51  ;;  %v5645_v22 = vpack.c.bf16 %v2681_v12, %v2673_v11  ;;  %v6216_v51 = vld [vmem:[#allocation8] sm:$0xff]  ;;  %v2736_v11 = vld [vmem:[#allocation7 + $0x1ab0] sm:$0xff]  ;;  %v5661_v12 = vpack.c.bf16 %v2745_v9, %v2737_v7  ;;  %v2785_v7 = vld [vmem:[#allocation7 + $0x1c38] sm:$0xff] }
 0x38e   :  { %5372 = vmatpush1.bf16.msra.mxu0 %v5371_v16  ;;  %v5389_v16 = vpack.c.bf16 %v2679_v10, %v2671_v44  ;;  %v2734_v10 = vld [vmem:[#allocation7 + $0x1aa0] sm:$0xff]  ;;  %v2793_v9 = vld [vmem:[#allocation7 + $0x1c78] sm:$0xff] }
 0x38f   :  { %5628 = vmatpush1.bf16.msra.mxu1 %v5627_v17  ;;  %5374 = vmatprep.subr.bf16.mxu0 %v5373_v19  ;;  %v2680_v17 = vld [vmem:[#allocation7 + $0x18f0] sm:$0xff]  ;;  %v2687_v19 = vld [vmem:[#allocation7 + $0x1928] sm:$0xff] }
 0x390   :  { %5630 = vmatprep.subr.bf16.mxu1 %v5629_v27  ;;  %v2697_v27 = vld [vmem:[#allocation7 + $0x1978] sm:$0xff]  ;;  %v5647_v28 = vpack.c.bf16 %v2680_v17, %v2672_v36  ;;  %v5393_v29 = vpack.c.bf16 %v2695_v21, %v2687_v19  ;;  %v2911_v36 = vrot.slane %v6216_v51, %v6100_v20  ;;  %v6220_v19 = vld [vmem:[#allocation10] sm:$0xff]  ;;  %v2919_v21 = vrot.slane %v6216_v51, %v6107_v60 }
 0x391   :  { %v2761_v17 = vld [vmem:[#allocation7 + $0x1b78] sm:$0xff] }
 0x392   :  { %5376 = vmatpush1.bf16.msra.mxu0 %v5375_v32  ;;  %v2688_v32 = vld [vmem:[#allocation7 + $0x1930] sm:$0xff] }
 0x393   :  { %5632 = vmatpush1.bf16.msra.mxu1 %v5631_v33  ;;  %5378 = vmatprep.subr.bf16.mxu0 %v5377_v47  ;;  %v5649_v33 = vpack.c.bf16 %v2697_v27, %v2689_v24  ;;  %v2696_v47 = vld [vmem:[#allocation7 + $0x1970] sm:$0xff]  ;;  %v2923_v27 = vrot.slane %v6216_v51, %v6113_v62 }
 0x394   :  { %5634 = vmatprep.subr.bf16.mxu1 %v5633_v37  ;;  %v5395_v37 = vpack.c.bf16 %v2694_v52, %v2686_v31  ;;  %v5651_v38 = vpack.c.bf16 %v2696_v47, %v2688_v32  ;;  %v2758_v31 = vld [vmem:[#allocation7 + $0x1b60] sm:$0xff]  ;;  %v2752_v52 = vld [vmem:[#allocation7 + $0x1b30] sm:$0xff] }
 0x395   :  { %v2760_v47 = vld [vmem:[#allocation7 + $0x1b70] sm:$0xff] }
 0x396   :  { %5380 = vmatpush1.bf16.msra.mxu0 %v5379_v49  ;;  %v5667_v56 = vpack.c.bf16 %v2760_v47, %v2752_v52  ;;  %v2806_v52 = vld [vmem:[#allocation7 + $0x1ce0] sm:$0xff] }
 0x397   :  { %5636 = vmatpush1.bf16.msra.mxu1 %v5635_v18  ;;  %5382 = vmatprep.subr.bf16.mxu0 %v5381_v58  ;;  %v2719_v18 = vld [vmem:[#allocation7 + $0x1a28] sm:$0xff] }
 0x398   :  { %5638 = vmatprep.subr.bf16.mxu1 %v5637_v46  ;;  %v2727_v58 = vld [vmem:[#allocation7 + $0x1a68] sm:$0xff] }
 0x399   :  { %v5401_v25 = vpack.c.bf16 %v2727_v58, %v2719_v18 }
 0x39a   :  { %5384 = vmatpush1.bf16.msra.mxu0 %v5383_v8  ;;  %v2728_v8 = vld [vmem:[#allocation7 + $0x1a70] sm:$0xff] }
 0x39b   :  { %5640 = vmatpush1.bf16.msra.mxu1 %v5639_v6  ;;  %5386 = vmatprep.subr.bf16.mxu0 %v5385_v14  ;;  %v2735_v6 = vld [vmem:[#allocation7 + $0x1aa8] sm:$0xff]  ;;  %v5659_v54 = vpack.c.bf16 %v2728_v8, %v2720_v4 }
 0x39c   :  { %5642 = vmatprep.subr.bf16.mxu1 %v5641_v15  ;;  %v2743_v14 = vld [vmem:[#allocation7 + $0x1ae8] sm:$0xff]  ;;  %v5403_v15 = vpack.c.bf16 %v2726_v2, %v2718_v1  ;;  %v4105_v2 = vrot.slane %v6220_v19, %v6107_v60 }
 0x39d   :  { %3723 = vmatmul.mubr.f32.vlgmr.msra.gmra.mrb[18].mxu0 %v6188_v50  ;;  %v5405_v44 = vpack.c.bf16 %v2743_v14, %v2735_v6  ;;  %v2783_v8 = vld [vmem:[#allocation7 + $0x1c28] sm:$0xff] }
 0x39e   :  { %4007 = vmatmul.mubr.f32.vlgmr.msra.gmra.mrb[18].mxu1 %v6188_v50  ;;  %5388 = vmatpush1.bf16.msra.mxu0 %v5387_v3  ;;  %v2713_v50 = vld [vmem:[#allocation7 + $0x19f8] sm:$0xff]  ;;  %v2742_v3 = vld [vmem:[#allocation7 + $0x1ae0] sm:$0xff]  ;;  %v2791_v6 = vld [vmem:[#allocation7 + $0x1c68] sm:$0xff] }
 0x39f   :  { %3793 = vmatprep.mubr.f32.mxu0 %v6191_v26  ;;  %5644 = vmatpush1.bf16.msra.mxu1 %v5643_v55  ;;  %v5653_v49 = vpack.c.bf16 %v2713_v50, %v2705_v57  ;;  %v2744_v55 = vld [vmem:[#allocation7 + $0x1af0] sm:$0xff]  ;;  %v5407_v24 = vpack.c.bf16 %v2742_v3, %v2734_v10  ;;  %v4097_v50 = vrot.slane %v6220_v19, %v6100_v20  ;;  %v2774_v20 = vld [vmem:[#allocation7 + $0x1be0] sm:$0xff] }
 0x3a0   :  { %4077 = vmatprep.mubr.f32.mxu1 %v6191_v26  ;;  %5390 = vmatprep.subr.bf16.mxu0 %v5389_v16  ;;  %v2712_v26 = vld [vmem:[#allocation7 + $0x19f0] sm:$0xff]  ;;  %v2753_v16 = vld [vmem:[#allocation7 + $0x1b38] sm:$0xff]  ;;  %v5417_v60 = vpack.c.bf16 %v2791_v6, %v2783_v8  ;;  %v2847_v8 = vld [vmem:[#allocation7 + $0x1e28] sm:$0xff] }
 0x3a1   :  { %5646 = vmatprep.subr.bf16.mxu1 %v5645_v22  ;;  %v5655_v46 = vpack.c.bf16 %v2712_v26, %v2704_v59  ;;  %v2915_v22 = vrot.slane %v6216_v51, %v6110_v61  ;;  %v2855_v6 = vld [vmem:[#allocation7 + $0x1e68] sm:$0xff] }
 0x3a2   :  { %5392 = vmatpush1.bf16.msra.mxu0 %v5391_v43  ;;  %v5663_v43 = vpack.c.bf16 %v2744_v55, %v2736_v11  ;;  %v2782_v11 = vld [vmem:[#allocation7 + $0x1c20] sm:$0xff]  ;;  %v2784_v55 = vld [vmem:[#allocation7 + $0x1c30] sm:$0xff] }
 0x3a3   :  { %5648 = vmatpush1.bf16.msra.mxu1 %v5647_v28  ;;  %5394 = vmatprep.subr.bf16.mxu0 %v5393_v29  ;;  %v5409_v28 = vpack.c.bf16 %v2759_v48, %v2751_v13  ;;  %v2750_v29 = vld [vmem:[#allocation7 + $0x1b20] sm:$0xff] }
 0x3a4   :  { %5650 = vmatprep.subr.bf16.mxu1 %v5649_v33  ;;  %v5665_v33 = vpack.c.bf16 %v2761_v17, %v2753_v16  ;;  %v5411_v18 = vpack.c.bf16 %v2758_v31, %v2750_v29  ;;  %v2792_v16 = vld [vmem:[#allocation7 + $0x1c70] sm:$0xff]  ;;  %v2799_v17 = vld [vmem:[#allocation7 + $0x1ca8] sm:$0xff]  ;;  %v2798_v31 = vld [vmem:[#allocation7 + $0x1ca0] sm:$0xff] }
 0x3a6   :  { %5396 = vmatpush1.bf16.msra.mxu0 %v5395_v37 }
 0x3a7   :  { %5652 = vmatpush1.bf16.msra.mxu1 %v5651_v38  ;;  %5398 = vmatprep.subr.bf16.mxu0 %v5397_v39  ;;  %v2769_v39 = vld [vmem:[#allocation7 + $0x1bb8] sm:$0xff] }
 0x3a8   :  { %5654 = vmatprep.subr.bf16.mxu1 %v5653_v49  ;;  %v4101_v49 = vrot.slane %v6220_v19, %v6110_v61  ;;  %v2776_v61 = vld [vmem:[#allocation7 + $0x1bf0] sm:$0xff] }
 0x3aa   :  { %5400 = vmatpush1.bf16.msra.mxu0 %v5399_v30  ;;  %v5413_v30 = vpack.c.bf16 %v2775_v35, %v2767_v34  ;;  %v2808_v34 = vld [vmem:[#allocation7 + $0x1cf0] sm:$0xff]  ;;  %v2815_v35 = vld [vmem:[#allocation7 + $0x1d28] sm:$0xff] }
 0x3ab   :  { %5656 = vmatpush1.bf16.msra.mxu1 %v5655_v46  ;;  %5402 = vmatprep.subr.bf16.mxu0 %v5401_v25  ;;  %v2766_v46 = vld [vmem:[#allocation7 + $0x1ba0] sm:$0xff]  ;;  %v2768_v25 = vld [vmem:[#allocation7 + $0x1bb0] sm:$0xff] }
 0x3ac   :  { %5658 = vmatprep.subr.bf16.mxu1 %v5657_v5  ;;  %v5669_v5 = vpack.c.bf16 %v2777_v40, %v2769_v39  ;;  %v5415_v10 = vpack.c.bf16 %v2774_v20, %v2766_v46  ;;  %v5671_v3 = vpack.c.bf16 %v2776_v61, %v2768_v25  ;;  %v2840_v61 = vld [vmem:[#allocation7 + $0x1df0] sm:$0xff] }
 0x3ae   :  { %5404 = vmatpush1.bf16.msra.mxu0 %v5403_v15 }
 0x3af   :  { %5660 = vmatpush1.bf16.msra.mxu1 %v5659_v54  ;;  %5406 = vmatprep.subr.bf16.mxu0 %v5405_v44  ;;  %v4109_v44 = vrot.slane %v6220_v19, %v6113_v62 }
 0x3b0   :  { %v3227_v32 = vpop.f32.mrb[16].mxu0  ;;  %5662 = vmatprep.subr.bf16.mxu1 %v5661_v12  ;;  %v2790_v12 = vld [vmem:[#allocation7 + $0x1c60] sm:$0xff] }
 0x3b1   :  { %v5705_v57 = vadd.f32 %v3227_v32, %v2911_v36  ;;  %v3511_v37 = vpop.f32.mrb[16].mxu1  ;;  %v3229_v38 = vpop.f32.mrb[17].mxu0  ;;  %v5673_v36 = vpack.c.bf16 %v2793_v9, %v2785_v7  ;;  %v2800_v32 = vld [vmem:[#allocation7 + $0x1cb0] sm:$0xff]  ;;  %v2857_v7 = vld [vmem:[#allocation7 + $0x1e78] sm:$0xff] }
 0x3b2   :  { %v5707_v41 = vadd.f32 %v3511_v37, %v2919_v21  ;;  %v5706_v59 = vadd.f32 %v3229_v38, %v2915_v22  ;;  %v3513_v26 = vpop.f32.mrb[17].mxu1  ;;  %5408 = vmatpush1.bf16.msra.mxu0 %v5407_v24  ;;  %v2807_v21 = vld [vmem:[#allocation7 + $0x1ce8] sm:$0xff]  ;;  %v2801_v22 = vld [vmem:[#allocation7 + $0x1cb8] sm:$0xff]  ;;  %v5423_v38 = vpack.c.bf16 %v2806_v52, %v2798_v31  ;;  %v5679_v39 = vpack.c.bf16 %v2808_v34, %v2800_v32  ;;  %v2878_v34 = vld [vmem:[#allocation7 + $0x1f20] sm:$0xff] }
 0x3b3   :  { %v4084_v58 = vmax.f32 %v5705_v57, 0.0  ;;  %v5708_v23 = vadd.f32 %v3513_v26, %v2923_v27  ;;  %5664 = vmatpush1.bf16.msra.mxu1 %v5663_v43  ;;  %5410 = vmatprep.subr.bf16.mxu0 %v5409_v28  ;;  %v2809_v24 = vld [vmem:[#allocation7 + $0x1cf8] sm:$0xff]  ;;  %v5419_v43 = vpack.c.bf16 %v2790_v12, %v2782_v11  ;;  %v5675_v28 = vpack.c.bf16 %v2792_v16, %v2784_v55  ;;  %v2823_v57 = vld [vmem:[#allocation7 + $0x1d68] sm:$0xff]  ;;  %v2856_v11 = vld [vmem:[#allocation7 + $0x1e70] sm:$0xff] }
 0x3b4   :  { %v4086_v1 = vmax.f32 %v5707_v41, 0.0  ;;  %v4085_v4 = vmax.f32 %v5706_v59, 0.0  ;;  %5666 = vmatprep.subr.bf16.mxu1 %v5665_v33  ;;  %v5421_v29 = vpack.c.bf16 %v2807_v21, %v2799_v17  ;;  %v5677_v47 = vpack.c.bf16 %v2809_v24, %v2801_v22  ;;  %v2825_v37 = vld [vmem:[#allocation7 + $0x1d78] sm:$0xff]  ;;  %v2814_v41 = vld [vmem:[#allocation7 + $0x1d20] sm:$0xff]  ;;  %v2863_v12 = vld [vmem:[#allocation7 + $0x1ea8] sm:$0xff] }
 0x3b5   :  { %v4134_v14 = vmul.f32 %v4097_v50, %v4084_v58  ;;  %v4087_v54 = vmax.f32 %v5708_v23, 0.0  ;;  %v2817_v50 = vld [vmem:[#allocation7 + $0x1d38] sm:$0xff]  ;;  %v5425_v40 = vpack.c.bf16 %v2823_v57, %v2815_v35  ;;  %v2822_v59 = vld [vmem:[#allocation7 + $0x1d60] sm:$0xff]  ;;  %v2831_v58 = vld [vmem:[#allocation7 + $0x1da8] sm:$0xff] }
 0x3b6   :  { %v4135_v15 = vmul.f32 %v4101_v49, %v4085_v4  ;;  %5412 = vmatpush1.bf16.msra.mxu0 %v5411_v18  ;;  %v4136_v13 = vmul.f32 %v4105_v2, %v4086_v1  ;;  %v2816_v49 = vld [vmem:[#allocation7 + $0x1d30] sm:$0xff]  ;;  %v5681_v26 = vpack.c.bf16 %v2825_v37, %v2817_v50  ;;  %v2839_v23 = vld [vmem:[#allocation7 + $0x1de8] sm:$0xff]  ;;  %v5427_v46 = vpack.c.bf16 %v2822_v59, %v2814_v41  ;;  %v2830_v1 = vld [vmem:[#allocation7 + $0x1da0] sm:$0xff] }
 0x3b7   :  { %5668 = vmatpush1.bf16.msra.mxu1 %v5667_v56  ;;  %5414 = vmatprep.subr.bf16.mxu0 %v5413_v30  ;;  %v4137_v27 = vmul.f32 %v4109_v44, %v4087_v54  ;;  %v2824_v18 = vld [vmem:[#allocation7 + $0x1d70] sm:$0xff]  ;;  %v2833_v56 = vld [vmem:[#allocation7 + $0x1db8] sm:$0xff]  ;;  %v5429_v25 = vpack.c.bf16 %v2839_v23, %v2831_v58  ;;  %v2838_v2 = vld [vmem:[#allocation7 + $0x1de0] sm:$0xff]  ;;  %v5433_v54 = vpack.c.bf16 %v2855_v6, %v2847_v8 }
 0x3b8   :  { %v4142_v48 = vadd.f32 %v4135_v15, %v4134_v14  ;;  %5670 = vmatprep.subr.bf16.mxu1 %v5669_v5  ;;  %v2841_v30 = vld [vmem:[#allocation7 + $0x1df8] sm:$0xff]  ;;  %v5683_v20 = vpack.c.bf16 %v2824_v18, %v2816_v49  ;;  %v2832_v4 = vld [vmem:[#allocation7 + $0x1db0] sm:$0xff]  ;;  %v5431_v9 = vpack.c.bf16 %v2838_v2, %v2830_v1  ;;  %v2846_v44 = vld [vmem:[#allocation7 + $0x1e20] sm:$0xff]  ;;  %v2935_v1 = vrot.slane %v6216_v51, %v6145_v45 }
 0x3b9   :  { %v5685_v5 = vpack.c.bf16 %v2841_v30, %v2833_v56  ;;  %v2849_v14 = vld [vmem:[#allocation7 + $0x1e38] sm:$0xff]  ;;  %v5687_v15 = vpack.c.bf16 %v2840_v61, %v2832_v4  ;;  %v2871_v55 = vld [vmem:[#allocation7 + $0x1ee8] sm:$0xff]  ;;  %v2862_v21 = vld [vmem:[#allocation7 + $0x1ea0] sm:$0xff]  ;;  %v2931_v2 = vrot.slane %v6216_v51, %v6148_v63  ;;  %v2939_v4 = vrot.slane %v6216_v51, %v6151_v0 }
 0x3ba   :  { %v4143_v62 = vadd.f32 %v4142_v48, %v4136_v13  ;;  %5416 = vmatpush1.bf16.msra.mxu0 %v5415_v10  ;;  %v2854_v10 = vld [vmem:[#allocation7 + $0x1e60] sm:$0xff]  ;;  %v2865_v13 = vld [vmem:[#allocation7 + $0x1eb8] sm:$0xff]  ;;  %v5437_v17 = vpack.c.bf16 %v2871_v55, %v2863_v12  ;;  %v2864_v24 = vld [vmem:[#allocation7 + $0x1eb0] sm:$0xff]  ;;  %v4113_v8 = vrot.slane %v6220_v19, %v6142_v42  ;;  %v4125_v55 = vrot.slane %v6220_v19, %v6151_v0 }
 0x3bb   :  { %5672 = vmatpush1.bf16.msra.mxu1 %v5671_v3  ;;  %5418 = vmatprep.subr.bf16.mxu0 %v5417_v60  ;;  %v2848_v3 = vld [vmem:[#allocation7 + $0x1e30] sm:$0xff]  ;;  %v5689_v60 = vpack.c.bf16 %v2857_v7, %v2849_v14  ;;  %v2873_v48 = vld [vmem:[#allocation7 + $0x1ef8] sm:$0xff]  ;;  %v2870_v22 = vld [vmem:[#allocation7 + $0x1ee0] sm:$0xff] }
 0x3bc   :  { %v6236_v33 = vadd.f32 %v4143_v62, %v4137_v27  ;;  %5674 = vmatprep.subr.bf16.mxu1 %v5673_v36  ;;  %v5435_v36 = vpack.c.bf16 %v2854_v10, %v2846_v44  ;;  %v5691_v16 = vpack.c.bf16 %v2856_v11, %v2848_v3  ;;  %v5693_v27 = vpack.c.bf16 %v2873_v48, %v2865_v13  ;;  %v2872_v62 = vld [vmem:[#allocation7 + $0x1ef0] sm:$0xff]  ;;  %v2889_v31 = vld [vmem:[#allocation7 + $0x1f78] sm:$0xff]  ;;  %v2886_v35 = vld [vmem:[#allocation7 + $0x1f60] sm:$0xff] }
 0x3bd   :  { %v5439_v52 = vpack.c.bf16 %v2870_v22, %v2862_v21  ;;  %v5695_v32 = vpack.c.bf16 %v2872_v62, %v2864_v24  ;;  %v2880_v57 = vld [vmem:[#allocation7 + $0x1f30] sm:$0xff]  ;;  %v2905_v41 = vld [vmem:[#allocation7 + $0x1ff8] sm:$0xff]  ;;  %v5443_v59 = vpack.c.bf16 %v2886_v35, %v2878_v34  ;;  %v2894_v18 = vld [vmem:[#allocation7 + $0x1fa0] sm:$0xff] }
 0x3be   :  { %5420 = vmatpush1.bf16.msra.mxu0 %v5419_v43  ;;  %v2879_v43 = vld [vmem:[#allocation7 + $0x1f28] sm:$0xff]  ;;  %v2888_v37 = vld [vmem:[#allocation7 + $0x1f70] sm:$0xff]  ;;  %v2902_v58 = vld [vmem:[#allocation7 + $0x1fe0] sm:$0xff] }
 0x3bf   :  { %5676 = vmatpush1.bf16.msra.mxu1 %v5675_v28  ;;  %5422 = vmatprep.subr.bf16.mxu0 %v5421_v29  ;;  %v2887_v28 = vld [vmem:[#allocation7 + $0x1f68] sm:$0xff]  ;;  %v2881_v29 = vld [vmem:[#allocation7 + $0x1f38] sm:$0xff]  ;;  %v5699_v49 = vpack.c.bf16 %v2888_v37, %v2880_v57  ;;  %v2896_v56 = vld [vmem:[#allocation7 + $0x1fb0] sm:$0xff] }
 0x3c0   :  { %5678 = vmatprep.subr.bf16.mxu1 %v5677_v47  ;;  %v5441_v47 = vpack.c.bf16 %v2887_v28, %v2879_v43  ;;  %v5697_v50 = vpack.c.bf16 %v2889_v31, %v2881_v29  ;;  %v2904_v30 = vld [vmem:[#allocation7 + $0x1ff0] sm:$0xff] }
 0x3c2   :  { %5424 = vmatpush1.bf16.msra.mxu0 %v5423_v38  ;;  %v2895_v38 = vld [vmem:[#allocation7 + $0x1fa8] sm:$0xff] }
 0x3c3   :  { %5680 = vmatpush1.bf16.msra.mxu1 %v5679_v39  ;;  %5426 = vmatprep.subr.bf16.mxu0 %v5425_v40  ;;  %v2903_v39 = vld [vmem:[#allocation7 + $0x1fe8] sm:$0xff]  ;;  %v2897_v40 = vld [vmem:[#allocation7 + $0x1fb8] sm:$0xff] }
 0x3c4   :  { %5682 = vmatprep.subr.bf16.mxu1 %v5681_v26  ;;  %v5445_v26 = vpack.c.bf16 %v2903_v39, %v2895_v38  ;;  %v5701_v23 = vpack.c.bf16 %v2905_v41, %v2897_v40 }
 0x3c6   :  { %5428 = vmatpush1.bf16.msra.mxu0 %v5427_v46  ;;  %v5447_v46 = vpack.c.bf16 %v2902_v58, %v2894_v18 }
 0x3c7   :  { %5684 = vmatpush1.bf16.msra.mxu1 %v5683_v20  ;;  %5430 = vmatprep.subr.bf16.mxu0 %v5429_v25  ;;  %v5703_v20 = vpack.c.bf16 %v2904_v30, %v2896_v56  ;;  %v2927_v25 = vrot.slane %v6216_v51, %v6142_v42  ;;  %v4121_v51 = vrot.slane %v6220_v19, %v6145_v45 }
 0x3c8   :  { %5686 = vmatprep.subr.bf16.mxu1 %v5685_v5 }
 0x3ca   :  { %5432 = vmatpush1.bf16.msra.mxu0 %v5431_v9  ;;  %v4117_v9 = vrot.slane %v6220_v19, %v6148_v63 }
 0x3cb   :  { %5688 = vmatpush1.bf16.msra.mxu1 %v5687_v15  ;;  %5434 = vmatprep.subr.bf16.mxu0 %v5433_v54 }
 0x3cc   :  { %5690 = vmatprep.subr.bf16.mxu1 %v5689_v60 }
 0x3ce   :  { %5436 = vmatpush1.bf16.msra.mxu0 %v5435_v36 }
 0x3cf   :  { %5692 = vmatpush1.bf16.msra.mxu1 %v5691_v16  ;;  %5438 = vmatprep.subr.bf16.mxu0 %v5437_v17  ;;  %v4168_v17 = vld [vmem:[#allocation2] ss:$0 sm:$0xff] }
 0x3d0   :  { %5694 = vmatprep.subr.bf16.mxu1 %v5693_v27 }
 0x3d2   :  { %5440 = vmatpush1.bf16.msra.mxu0 %v5439_v52 }
 0x3d3   :  { %5696 = vmatpush1.bf16.msra.mxu1 %v5695_v32  ;;  %5442 = vmatprep.subr.bf16.mxu0 %v5441_v47 }
 0x3d4   :  { %5698 = vmatprep.subr.bf16.mxu1 %v5697_v50 }
 0x3d6   :  { %5444 = vmatpush1.bf16.msra.mxu0 %v5443_v59 }
 0x3d7   :  { %5700 = vmatpush1.bf16.msra.mxu1 %v5699_v49  ;;  %5446 = vmatprep.subr.bf16.mxu0 %v5445_v26 }
 0x3d8   :  { %5702 = vmatprep.subr.bf16.mxu1 %v5701_v23 }
 0x3da   :  { %5448 = vmatpush1.bf16.msra.mxu0 %v5447_v46 }
 0x3db   :  { %5704 = vmatpush1.bf16.msra.mxu1 %v5703_v20 }
 0x3dd   :  { %3794 = vmatmul.mubr.f32.vlgmr.msra.gmra.mrb[18].mxu0 %v6198_v53 }
 0x3de   :  { %4078 = vmatmul.mubr.f32.vlgmr.msra.gmra.mrb[18].mxu1 %v6198_v53 }
 0x4b0   :  { %v3795_v5 = vpop.f32.mrb[18].mxu0 }
 0x4b1   :  { %v5709_v61 = vadd.f32 %v3795_v5, %v2927_v25  ;;  %v4079_v6 = vpop.f32.mrb[18].mxu1  ;;  %v3797_v14 = vpop.f32.mrb[19].mxu0 }
 0x4b2   :  { %v5711_v53 = vadd.f32 %v4079_v6, %v2935_v1  ;;  %v5710_v7 = vadd.f32 %v3797_v14, %v2931_v2  ;;  %v4081_v15 = vpop.f32.mrb[19].mxu1 }
 0x4b3   :  { %v4088_v54 = vmax.f32 %v5709_v61, 0.0  ;;  %v5712_v44 = vadd.f32 %v4081_v15, %v2939_v4 }
 0x4b4   :  { %v4089_v10 = vmax.f32 %v5710_v7, 0.0  ;;  %v4090_v60 = vmax.f32 %v5711_v53, 0.0 }
 0x4b5   :  { %v4138_v3 = vmul.f32 %v4113_v8, %v4088_v54  ;;  %v4091_v42 = vmax.f32 %v5712_v44, 0.0 }
 0x4b6   :  { %v4139_v11 = vmul.f32 %v4117_v9, %v4089_v10  ;;  %v4140_v13 = vmul.f32 %v4121_v51, %v4090_v60 }
 0x4b7   :  { %v4145_v12 = vadd.f32 %v6236_v33, %v4138_v3  ;;  %v4141_v36 = vmul.f32 %v4125_v55, %v4091_v42 }
 0x4b9   :  { %v4146_v48 = vadd.f32 %v4145_v12, %v4139_v11 }
 0x4bb   :  { %v4147_v63 = vadd.f32 %v4146_v48, %v4140_v13 }
 0x4bd   :  { %v4148_v16 = vadd.f32 %v4147_v63, %v4141_v36 }
 0x4bf   :  { %4149 = vadd.xlane.f32.xlu1 %v4148_v16 }
 0x54c   :  { %v4150_v21 = vpop.xlane.xlu1 %4149 }
 0x54d   :  { %v4158_v22 = vadd.f32 %v4168_v17, %v4150_v21 }
 0x54f   :  { %4160 = vst.msk [vmem:[%s6268_s8] sm:$0xff] %vm4159_vm0, %v4158_v22 }
 0x550   :  { %4165 = vsyncpa [#allocation4], 1 }
 0x551   :  { %4166 = vsyncpa [#allocation6], 1 }
 0x552   :  { %4167 = vsyncpa [#allocation9], 1 }

</bundles_post_ra>
